<compile_context>
chip_gen: v7x
topology: tpu7x:2x2x1
jax: 0.10.0
libtpu: 0.0.40
codegen_flags: <defaults>
</compile_context>

<pallas_src>
import functools
import math

import jax
import jax.numpy as jnp
from jax.experimental import pallas as pl
from jax.experimental.pallas import tpu as pltpu

DATA_CONSTRAINT = 0.9
_LDJ_CONST = math.log(1.0 + math.exp(math.log(1.0 - DATA_CONSTRAINT)
                                     - math.log(DATA_CONSTRAINT)))

_LANE = 128
_MAX_TILE_M = 1024
_VMEM_LIMIT = 48 * 1024 * 1024   # < v7x 64 MiB physical, > all default scoped limits
_TAPS = [(-1, -1), (-1, 0), (-1, 1),
         (0, -1), (0, 0), (0, 1),
         (1, -1), (1, 0), (1, 1)]


def _round_up(v, m):
    return (v + m - 1) // m * m


def _choose_tile_m(m):
    """M tiling: >= 2 grid steps when possible (v7x dual TC), tiles <= _MAX_TILE_M."""
    m8 = _round_up(m, 8)
    if m8 <= 16:
        return m8, m8
    if m8 <= 2 * _MAX_TILE_M:
        tile = _round_up((m8 + 1) // 2, 8)
        return tile, _round_up(m8, tile)
    return _MAX_TILE_M, _round_up(m8, _MAX_TILE_M)


def _elem_tile_rows(n, d_pad, n_streams):
    budget = 24 * 1024 * 1024
    per_row = d_pad * 4 * n_streams * 2            # f32, double-buffered
    rows = max(8, (min(256, budget // per_row) // 8) * 8)
    return min(rows, _round_up(n, 8))


# ----------------------------------------------------------------------------
# Pallas kernels: 1x1-conv matmuls (bias / fused BN+ReLU prologue / fused skip acc)
# ----------------------------------------------------------------------------
def _mm_kernel(a_ref, b_ref, bias_ref, o_ref):
    o_ref[...] = (jnp.dot(a_ref[...], b_ref[...],
                          preferred_element_type=jnp.float32) + bias_ref[...])


def _mm_acc_kernel(a_ref, b_ref, bias_ref, prev_ref, o_ref):
    # fused x_skip accumulation: out = A@B + bias + prev   (prev aliased to out)
    o_ref[...] = (jnp.dot(a_ref[...], b_ref[...],
                          preferred_element_type=jnp.float32)
                  + bias_ref[...] + prev_ref[...])


def _mm_bnrelu_kernel(a_ref, scale_ref, shift_ref, b_ref, bias_ref, o_ref):
    # fused per-K-column BatchNorm affine + ReLU prologue (f32), then bf16 MXU matmul
    a = jnp.maximum(a_ref[...] * scale_ref[...] + shift_ref[...], 0.0)
    o_ref[...] = (jnp.dot(a.astype(jnp.bfloat16), b_ref[...],
                          preferred_element_type=jnp.float32) + bias_ref[...])


def pallas_matmul_bias(a, b, bias, *, scale=None, shift=None, prev=None,
                       keep_padded=False):
    """(M, K) @ (K, N) + bias, tiled over M with VMEM-resident weights.

    * K never padded (full-K blocks); N padded to 128 (lane-dense stores).
    * bf16 MXU inputs with f32 accumulation; when the BN+ReLU prologue is fused
      the A tile stays f32 so BN is applied at full precision.
    * prev (padded (m_pad, n_pad) f32) is accumulated in-kernel and aliased to
      the output (input_output_aliases) -> no separate read-add-write pass.
    """
    m, k = a.shape
    kb, n_out = b.shape
    assert kb == k
    n_pad = _round_up(n_out, _LANE)
    tile_m, m_pad = _choose_tile_m(m)

    a_p = a.astype(jnp.float32 if scale is not None else jnp.bfloat16)
    if m_pad != m:
        a_p = jnp.pad(a_p, ((0, m_pad - m), (0, 0)))
    b_p = b.astype(jnp.bfloat16)
    if n_pad != n_out:
        b_p = jnp.pad(b_p, ((0, 0), (0, n_pad - n_out)))
    bias_p = bias.astype(jnp.float32)
    if n_pad != n_out:
        bias_p = jnp.pad(bias_p, (0, n_pad - n_out))
    bias_p = bias_p.reshape(1, n_pad)

    row_spec = pl.BlockSpec((tile_m, k), lambda i: (i, 0))
    w_spec = pl.BlockSpec((k, n_pad), lambda i: (0, 0))          # resident
    vec_spec = pl.BlockSpec((1, n_pad), lambda i: (0, 0))        # resident
    out_spec = pl.BlockSpec((tile_m, n_pad), lambda i: (i, 0))

    io_alias = {}
    if scale is not None:
        kernel = _mm_bnrelu_kernel
        kvec_spec = pl.BlockSpec((1, k), lambda i: (0, 0))
        in_specs = [row_spec, kvec_spec, kvec_spec, w_spec, vec_spec]
        args = (a_p, scale.astype(jnp.float32).reshape(1, k),
                shift.astype(jnp.float32).reshape(1, k), b_p, bias_p)
    elif prev is not None:
        assert prev.shape == (m_pad, n_pad) and prev.dtype == jnp.float32
        kernel = _mm_acc_kernel
        in_specs = [row_spec, w_spec, vec_spec,
                    pl.BlockSpec((tile_m, n_pad), lambda i: (i, 0))]
        args = (a_p, b_p, bias_p, prev)
        io_alias = {3: 0}
    else:
        kernel = _mm_kernel
        in_specs = [row_spec, w_spec, vec_spec]
        args = (a_p, b_p, bias_p)

    out = pl.pallas_call(
        kernel,
        out_shape=jax.ShapeDtypeStruct((m_pad, n_pad), jnp.float32),
        grid=(m_pad // tile_m,),
        in_specs=in_specs,
        out_specs=out_spec,
        input_output_aliases=io_alias,
        compiler_params=pltpu.CompilerParams(
            dimension_semantics=("parallel",),
            vmem_limit_bytes=_VMEM_LIMIT),
    )(*args)
    if keep_padded:
        return out
    return out[:m, :n_out]


# ----------------------------------------------------------------------------
# Pallas kernel: 3x3 conv via 9 shifted VMEM views of an NHWC slab (no im2col)
# ----------------------------------------------------------------------------
def _conv3x3_kernel(hw, w_sp, x_ref, wt_ref, mneg_ref, mpos_ref, bias_ref, o_ref):
    # x_ref : (1, hw + 2*w_sp + 2, Cin) bf16 zero-padded slab (one image)
    # wt_ref: (9, Cin, Cout) bf16; masks: (hw, 1) bf16; bias: (1, Cout) f32
    acc = None
    for t, (di, dj) in enumerate(_TAPS):
        start = (di + 1) * w_sp + (dj + 1)
        a = x_ref[0, start:start + hw, :]
        if dj == -1:
            a = a * mneg_ref[...]     # kill horizontal wrap at column 0
        elif dj == 1:
            a = a * mpos_ref[...]     # kill horizontal wrap at column W-1
        d = jnp.dot(a, wt_ref[t], preferred_element_type=jnp.float32)
        acc = d if acc is None else acc + d
    o_ref[0] = acc + bias_ref[...]


def conv3x3_flat(x_flat, h, w, conv_p):
    """x_flat: (N, H*W, Cin) NHWC-flat f32 -> (N, H*W, Cout) f32 (stride 1, pad 1)."""
    n, hw, cin = x_flat.shape
    w4 = wn_weight(conv_p)
    cout = w4.shape[0]
    halo = w + 1
    xp = jnp.pad(x_flat.astype(jnp.bfloat16), ((0, 0), (halo, halo), (0, 0)))
    wt = jnp.transpose(w4, (2, 3, 1, 0)).reshape(9, cin, cout).astype(jnp.bfloat16)
    col = jnp.arange(hw, dtype=jnp.int32) % w
    mneg = (col != 0).astype(jnp.bfloat16).reshape(hw, 1)
    mpos = (col != w - 1).astype(jnp.bfloat16).reshape(hw, 1)
    biasr = conv_p["b"].astype(jnp.float32).reshape(1, cout)
    p_len = hw + 2 * halo

    return pl.pallas_call(
        functools.partial(_conv3x3_kernel, hw, w),
        out_shape=jax.ShapeDtypeStruct((n, hw, cout), jnp.float32),
        grid=(n,),
        in_specs=[
            pl.BlockSpec((1, p_len, cin), lambda i: (i, 0, 0)),
            pl.BlockSpec((9, cin, cout), lambda i: (0, 0, 0)),   # resident
            pl.BlockSpec((hw, 1), lambda i: (0, 0)),             # resident
            pl.BlockSpec((hw, 1), lambda i: (0, 0)),             # resident
            pl.BlockSpec((1, cout), lambda i: (0, 0)),           # resident
        ],
        out_specs=pl.BlockSpec((1, hw, cout), lambda i: (i, 0, 0)),
        compiler_params=pltpu.CompilerParams(
            dimension_semantics=("parallel",),
            vmem_limit_bytes=_VMEM_LIMIT),
    )(xp, wt, mneg, mpos, biasr)


# ----------------------------------------------------------------------------
# Pallas kernels: elementwise pre-process and coupling tail (gridded over rows)
# ----------------------------------------------------------------------------
def _preprocess_kernel(d_valid, x_ref, noise_ref, y_ref, ldj_ref):
    x = x_ref[...] * 0.5 + 0.5                       # un-normalize (-1,1) -> (0,1)
    x = (x * 255.0 + noise_ref[...]) / 256.0         # de-quantize
    p = ((2.0 * x - 1.0) * DATA_CONSTRAINT + 1.0) * 0.5
    log_p = jnp.log(p)
    log_1mp = jnp.log1p(-p)
    y_ref[...] = log_p - log_1mp                     # logit
    # softplus(y) + softplus(-y) == -(log p + log(1-p)) : reuse the two logs
    lane = jax.lax.broadcasted_iota(jnp.int32, x.shape, 1)
    valid = (lane < d_valid).astype(jnp.float32)
    ldj = (-(log_p + log_1mp) - _LDJ_CONST) * valid
    d_pad = x.shape[-1]
    acc = ldj[:, 0:_LANE]                            # lane-dense partial sums
    for c in range(1, d_pad // _LANE):
        acc = acc + ldj[:, c * _LANE:(c + 1) * _LANE]
    ldj_ref[...] = acc


def preprocess(x, noise):
    n = x.shape[0]
    d = x.size // n
    d_pad = _round_up(d, _LANE)
    tile_n = _elem_tile_rows(n, d_pad, 3)
    n_pad = _round_up(n, tile_n)
    xf = jnp.pad(x.reshape(n, d), ((0, n_pad - n), (0, d_pad - d)))
    nf = jnp.pad(noise.reshape(n, d), ((0, n_pad - n), (0, d_pad - d)))
    row = pl.BlockSpec((tile_n, d_pad), lambda i: (i, 0))
    y, ldj = pl.pallas_call(
        functools.partial(_preprocess_kernel, d),
        out_shape=(jax.ShapeDtypeStruct((n_pad, d_pad), jnp.float32),
                   jax.ShapeDtypeStruct((n_pad, _LANE), jnp.float32)),
        grid=(n_pad // tile_n,),
        in_specs=[row, row],
        out_specs=(row, pl.BlockSpec((tile_n, _LANE), lambda i: (i, 0))),
        compiler_params=pltpu.CompilerParams(
            dimension_semantics=("parallel",),
            vmem_limit_bytes=_VMEM_LIMIT),
    )(xf, nf)
    return y[:n, :d].reshape(x.shape), jnp.sum(ldj[:n], axis=-1)


def _coupling_tail_kernel(x_ref, s_ref, t_ref, ss_ref, tm_ref, y_ref, ldj_ref):
    s = ss_ref[...] * jnp.tanh(s_ref[...])           # rescale * (1-b) * tanh(s_raw)
    t = t_ref[...] * tm_ref[...]
    y_ref[...] = (x_ref[...] + t) * jnp.exp(s)       # forward affine coupling
    d_pad = s.shape[-1]
    acc = s[:, 0:_LANE]                              # lane-dense ldj partial sums
    for c in range(1, d_pad // _LANE):
        acc = acc + s[:, c * _LANE:(c + 1) * _LANE]
    ldj_ref[...] = acc


def coupling_tail(x, s_raw, t_raw, s_scale, t_mask):
    """All NHWC: x, s_raw, t_raw (N,H,W,C); s_scale, t_mask (1,H,W,C).
    Returns transformed x (NHWC) and per-sample log-det."""
    n, h, w, c = x.shape
    d = h * w * c
    d_pad = _round_up(d, _LANE)
    tile_n = _elem_tile_rows(n, d_pad, 4)
    n_pad = _round_up(n, tile_n)

    def flat(a):
        return jnp.pad(a.reshape(n, d), ((0, n_pad - n), (0, d_pad - d)))

    ss = jnp.pad(s_scale.reshape(1, d), ((0, 0), (0, d_pad - d)))  # 0 pad -> s = 0
    tm = jnp.pad(t_mask.reshape(1, d), ((0, 0), (0, d_pad - d)))
    row = pl.BlockSpec((tile_n, d_pad), lambda i: (i, 0))
    res = pl.BlockSpec((1, d_pad), lambda i: (0, 0))
    y, ldj = pl.pallas_call(
        _coupling_tail_kernel,
        out_shape=(jax.ShapeDtypeStruct((n_pad, d_pad), jnp.float32),
                   jax.ShapeDtypeStruct((n_pad, _LANE), jnp.float32)),
        grid=(n_pad // tile_n,),
        in_specs=[row, row, row, res, res],
        out_specs=(row, pl.BlockSpec((tile_n, _LANE), lambda i: (i, 0))),
        compiler_params=pltpu.CompilerParams(
            dimension_semantics=("parallel",),
            vmem_limit_bytes=_VMEM_LIMIT),
    )(flat(x), flat(s_raw), flat(t_raw), ss, tm)
    return y[:n, :d].reshape(n, h, w, c), jnp.sum(ldj[:n], axis=-1)


# ----------------------------------------------------------------------------
# JAX glue: weight norm, batchnorm, squeezes, masks (all NHWC-resident)
# ----------------------------------------------------------------------------
def wn_weight(conv_p):
    """Weight-normalized conv weight (PyTorch weight_norm, dim=0)."""
    v = conv_p["v"]
    norm = jnp.sqrt(jnp.sum(jnp.square(v), axis=(1, 2, 3), keepdims=True))
    return v * (conv_p["g"].reshape(-1, 1, 1, 1) / norm)


def _w1x1(conv_p):
    w4 = wn_weight(conv_p)
    return w4.reshape(w4.shape[0], w4.shape[1]).T          # (Cin, Cout)


def batchnorm_flat(x, p, eps=1e-5):
    # training-mode BatchNorm2d on (N, H*W, C): batch statistics, biased variance
    mean = jnp.mean(x, axis=(0, 1), keepdims=True)
    var = jnp.mean(jnp.square(x - mean), axis=(0, 1), keepdims=True)
    return (x - mean) * (p["gamma"] / jnp.sqrt(var + eps)) + p["beta"]


def conv1x1_bn_relu_from_padded(xp, m, c, bn, conv_p, eps=1e-5):
    """ReLU(BatchNorm(x_skip)) -> 1x1 conv, consuming the padded skip accumulator
    directly; BN+ReLU fused into the matmul prologue (zero scale/shift on pads)."""
    xr = xp[:m, :c]
    mean = jnp.mean(xr, axis=0)
    var = jnp.mean(jnp.square(xr - mean), axis=0)
    scale = bn["gamma"] * jax.lax.rsqrt(var + eps)
    shift = bn["beta"] - mean * scale
    k_pad = xp.shape[1]
    w4 = wn_weight(conv_p)
    cout = w4.shape[0]
    wmat = jnp.pad(w4.reshape(cout, c).T, ((0, k_pad - c), (0, 0)))
    scale_p = jnp.pad(scale, (0, k_pad - c))
    shift_p = jnp.pad(shift, (0, k_pad - c))
    out = pallas_matmul_bias(xp, wmat, conv_p["b"], scale=scale_p, shift=shift_p,
                             keep_padded=True)
    return out[:m, :cout]


def checkerboard_mask(h, w, reverse):
    ii = jnp.arange(h).reshape(h, 1)
    jj = jnp.arange(w).reshape(1, w)
    m = ((ii + jj) % 2).astype(jnp.float32)
    if reverse:
        m = 1.0 - m
    return m.reshape(1, h, w, 1)


def squeeze_2x2_nhwc(x, reverse=False):
    n, h, w, c = x.shape
    if reverse:
        x = x.reshape(n, h, w, c // 4, 2, 2)
        x = x.transpose(0, 1, 4, 2, 5, 3)
        return x.reshape(n, 2 * h, 2 * w, c // 4)
    x = x.reshape(n, h // 2, 2, w // 2, 2, c)
    x = x.transpose(0, 1, 3, 5, 2, 4)
    return x.reshape(n, h // 2, w // 2, c * 4)


def squeeze_2x2_alt_nhwc(x, reverse=False):
    # equivalent to the F.conv2d / conv_transpose2d permutation in the reference
    if not reverse:
        a = x[:, 0::2, 0::2, :]
        b = x[:, 1::2, 1::2, :]
        c = x[:, 0::2, 1::2, :]
        d = x[:, 1::2, 0::2, :]
        return jnp.concatenate([a, b, c, d], axis=-1)
    n, h, w, c4 = x.shape
    c = c4 // 4
    a, b, cc, d = x[..., :c], x[..., c:2 * c], x[..., 2 * c:3 * c], x[..., 3 * c:]
    out = jnp.zeros((n, 2 * h, 2 * w, c), x.dtype)
    out = out.at[:, 0::2, 0::2, :].set(a)
    out = out.at[:, 1::2, 1::2, :].set(b)
    out = out.at[:, 0::2, 1::2, :].set(cc)
    out = out.at[:, 1::2, 0::2, :].set(d)
    return out


# ----------------------------------------------------------------------------
# s/t ResNet and coupling layers (NHWC, flat spatial inside the ResNet)
# ----------------------------------------------------------------------------
def residual_block_flat(p, x, h, w):
    skip = x
    x = jax.nn.relu(batchnorm_flat(x, p["in_norm"]))
    x = conv3x3_flat(x, h, w, p["in_conv"])
    x = jax.nn.relu(batchnorm_flat(x, p["out_norm"]))
    x = conv3x3_flat(x, h, w, p["out_conv"])
    return x + skip


def resnet_forward(p, x_nhwc, double_after_norm):
    n, h, w, _ = x_nhwc.shape
    hw = h * w
    x = x_nhwc.reshape(n, hw, -1)
    x = batchnorm_flat(x, p["in_norm"])
    if double_after_norm:
        x = x * 2.0
    x = jnp.concatenate([x, -x], axis=-1)
    x = jax.nn.relu(x)
    x = conv3x3_flat(x, h, w, p["in_conv"])
    mid = x.shape[-1]
    m = n * hw
    # padded (m_pad, n_pad) f32 skip accumulator, updated in-kernel (aliased)
    xs_p = pallas_matmul_bias(x.reshape(m, mid), _w1x1(p["in_skip"]),
                              p["in_skip"]["b"], keep_padded=True)
    for blk, skip in zip(p["blocks"], p["skips"]):
        x = residual_block_flat(blk, x, h, w)
        xs_p = pallas_matmul_bias(x.reshape(m, mid), _w1x1(skip), skip["b"],
                                  prev=xs_p, keep_padded=True)
    st = conv1x1_bn_relu_from_padded(xs_p, m, mid, p["out_norm"], p["out_conv"])
    cout = p["out_conv"]["v"].shape[0]
    return st.reshape(n, h, w, cout)


def coupling_forward(p, x, sldj):
    n, h, w, c = x.shape
    if p["mask_type"] == "checkerboard":
        b = checkerboard_mask(h, w, p["reverse_mask"])
        x_b = x * b
        st = resnet_forward(p["st"], x_b, double_after_norm=True)
        s_raw, t_raw = st[..., :c], st[..., c:]
        one_m_b = 1.0 - b
        s_scale = p["rescale_w"].reshape(1, 1, 1, c) * one_m_b
        t_mask = jnp.broadcast_to(one_m_b, (1, h, w, c))
        y, dldj = coupling_tail(x, s_raw, t_raw, s_scale, t_mask)
        return y, sldj + dldj
    # channel-wise mask
    half = c // 2
    if p["reverse_mask"]:
        x_id, x_change = x[..., :half], x[..., half:]
    else:
        x_change, x_id = x[..., :half], x[..., half:]
    st = resnet_forward(p["st"], x_id, double_after_norm=False)
    s_raw, t_raw = st[..., :half], st[..., half:]
    s_scale = jnp.broadcast_to(p["rescale_w"].reshape(1, 1, 1, half),
                               (1, h, w, half))
    t_mask = jnp.ones((1, h, w, half), jnp.float32)
    y_change, dldj = coupling_tail(x_change, s_raw, t_raw, s_scale, t_mask)
    if p["reverse_mask"]:
        y = jnp.concatenate([x_id, y_change], axis=-1)
    else:
        y = jnp.concatenate([y_change, x_id], axis=-1)
    return y, sldj + dldj


# ----------------------------------------------------------------------------
# _RealNVP recursive scale (forward / density direction only)
# ----------------------------------------------------------------------------
def realnvp_scale_forward(p, x, sldj):
    for cp in p["in_couplings"]:
        x, sldj = coupling_forward(cp, x, sldj)
    if not p["is_last"]:
        x = squeeze_2x2_nhwc(x, reverse=False)
        for cp in p["out_couplings"]:
            x, sldj = coupling_forward(cp, x, sldj)
        x = squeeze_2x2_nhwc(x, reverse=True)
        x = squeeze_2x2_alt_nhwc(x, reverse=False)
        half = x.shape[-1] // 2
        x, x_split = x[..., :half], x[..., half:]
        x, sldj = realnvp_scale_forward(p["next"], x, sldj)
        x = jnp.concatenate([x, x_split], axis=-1)
        x = squeeze_2x2_alt_nhwc(x, reverse=True)
    return x, sldj


def realnvp_forward(params, x, noise):
    y, sldj = preprocess(x, noise)              # de-quantize + logits + ldj (Pallas)
    y = jnp.transpose(y, (0, 2, 3, 1))          # single NCHW -> NHWC transpose
    y, sldj = realnvp_scale_forward(params, y, sldj)
    return jnp.transpose(y, (0, 3, 1, 2)), sldj # single NHWC -> NCHW transpose


# ----------------------------------------------------------------------------
# Deterministic parameter init (matches shapes of the PyTorch module)
# ----------------------------------------------------------------------------
def init_conv(key, c_out, c_in, k):
    v = jax.random.normal(key, (c_out, c_in, k, k), jnp.float32) * 0.05
    g = jnp.sqrt(jnp.sum(jnp.square(v), axis=(1, 2, 3)))     # weight-norm init: w == v
    return {"v": v, "g": g, "b": jnp.zeros((c_out,), jnp.float32)}


def init_bn(c):
    return {"gamma": jnp.ones((c,), jnp.float32),
            "beta": jnp.zeros((c,), jnp.float32)}


def init_resnet(key, in_ch, mid_ch, out_ch, num_blocks):
    keys = iter(jax.random.split(key, 3 + 3 * num_blocks))
    p = {
        "in_norm": init_bn(in_ch),
        "in_conv": init_conv(next(keys), mid_ch, 2 * in_ch, 3),
        "in_skip": init_conv(next(keys), mid_ch, mid_ch, 1),
        "blocks": [],
        "skips": [],
        "out_norm": init_bn(mid_ch),
        "out_conv": init_conv(next(keys), out_ch, mid_ch, 1),
    }
    for _ in range(num_blocks):
        p["blocks"].append({
            "in_norm": init_bn(mid_ch),
            "in_conv": init_conv(next(keys), mid_ch, mid_ch, 3),
            "out_norm": init_bn(mid_ch),
            "out_conv": init_conv(next(keys), mid_ch, mid_ch, 3),
        })
        p["skips"].append(init_conv(next(keys), mid_ch, mid_ch, 1))
    return p


def init_coupling(key, in_ch, mid_ch, num_blocks, mask_type, reverse_mask):
    if mask_type == "channel":
        in_ch = in_ch // 2
    return {
        "mask_type": mask_type,
        "reverse_mask": reverse_mask,
        "st": init_resnet(key, in_ch, mid_ch, 2 * in_ch, num_blocks),
        "rescale_w": jnp.ones((in_ch,), jnp.float32),   # weight-norm Rescale at init
    }


def init_scale(key, scale_idx, num_scales, in_ch, mid_ch, num_blocks):
    is_last = scale_idx == num_scales - 1
    keys = jax.random.split(key, 8)
    p = {"is_last": is_last}
    n_in = 4 if is_last else 3
    rmasks = [False, True, False, True][:n_in]
    p["in_couplings"] = [
        init_coupling(keys[i], in_ch, mid_ch, num_blocks, "checkerboard", rmasks[i])
        for i in range(n_in)
    ]
    if not is_last:
        out_masks = [False, True, False]
        p["out_couplings"] = [
            init_coupling(keys[3 + i], 4 * in_ch, 2 * mid_ch, num_blocks,
                          "channel", out_masks[i])
            for i in range(3)
        ]
        p["next"] = init_scale(keys[7], scale_idx + 1, num_scales,
                               2 * in_ch, 2 * mid_ch, num_blocks)
    return p


# ----------------------------------------------------------------------------
if __name__ == "__main__":
    key = jax.random.PRNGKey(0)
    k_x, k_noise, k_params = jax.random.split(key, 3)

    # small config: num_scales=2, in_channels=3, mid_channels=16, num_blocks=2
    N, C, H, W = 2, 3, 8, 8
    x = jax.random.uniform(k_x, (N, C, H, W), jnp.float32,
                           minval=-1.0, maxval=1.0)                 # normalized input
    noise = jax.random.uniform(k_noise, (N, C, H, W), jnp.float32)  # dequant noise
    params = init_scale(k_params, 0, 2, C, 16, 2)

    fwd = jax.jit(functools.partial(realnvp_forward, params))
    y, sldj = jax.block_until_ready(fwd(x, noise))

    assert y.shape == (N, C, H, W), y.shape
    assert sldj.shape == (N,), sldj.shape
    assert bool(jnp.all(jnp.isfinite(y))) and bool(jnp.all(jnp.isfinite(sldj)))
    print("KERNEL_OK")
</pallas_src>

<mosaic_0001>
module attributes {stable_mosaic.version = 11 : i64} {
  func.func @_preprocess_kernel(%arg0: i32, %arg1: memref<8x256xf32, #tpu.memory_space<vmem>>, %arg2: memref<8x256xf32, #tpu.memory_space<vmem>>, %arg3: memref<8x256xf32, #tpu.memory_space<vmem>>, %arg4: memref<8x128xf32, #tpu.memory_space<vmem>>) attributes {dimension_semantics = [#tpu.dimension_semantics<parallel>], iteration_bounds = array<i64: 1>, scalar_prefetch = 0 : i64, scratch_operands = 0 : i64, tpu.core_type = #tpu.core_type<tc>, window_params = [{transform_indices = @transform_0, window_bounds = array<i64: 8, 256>}, {transform_indices = @transform_1, window_bounds = array<i64: 8, 256>}, {transform_indices = @transform_2, window_bounds = array<i64: 8, 256>}, {transform_indices = @transform_3, window_bounds = array<i64: 8, 128>}]} {
    %c0 = arith.constant 0 : index
    %c0_0 = arith.constant 0 : index
    %0 = vector.load %arg1[%c0, %c0_0] : memref<8x256xf32, #tpu.memory_space<vmem>>, vector<8x256xf32>
    %cst = arith.constant 5.000000e-01 : f32
    %1 = vector.broadcast %cst : f32 to vector<8x256xf32>
    %2 = arith.mulf %0, %1 : vector<8x256xf32>
    %cst_1 = arith.constant 5.000000e-01 : f32
    %3 = vector.broadcast %cst_1 : f32 to vector<8x256xf32>
    %4 = arith.addf %2, %3 : vector<8x256xf32>
    %cst_2 = arith.constant 2.550000e+02 : f32
    %5 = vector.broadcast %cst_2 : f32 to vector<8x256xf32>
    %6 = arith.mulf %4, %5 : vector<8x256xf32>
    %c0_3 = arith.constant 0 : index
    %c0_4 = arith.constant 0 : index
    %7 = vector.load %arg2[%c0_3, %c0_4] : memref<8x256xf32, #tpu.memory_space<vmem>>, vector<8x256xf32>
    %8 = arith.addf %6, %7 : vector<8x256xf32>
    %cst_5 = arith.constant 2.560000e+02 : f32
    %9 = vector.broadcast %cst_5 : f32 to vector<8x256xf32>
    %10 = arith.divf %8, %9 : vector<8x256xf32>
    %cst_6 = arith.constant 2.000000e+00 : f32
    %11 = vector.broadcast %cst_6 : f32 to vector<8x256xf32>
    %12 = arith.mulf %11, %10 : vector<8x256xf32>
    %cst_7 = arith.constant 1.000000e+00 : f32
    %13 = vector.broadcast %cst_7 : f32 to vector<8x256xf32>
    %14 = arith.subf %12, %13 : vector<8x256xf32>
    %cst_8 = arith.constant 0.899999976 : f32
    %15 = vector.broadcast %cst_8 : f32 to vector<8x256xf32>
    %16 = arith.mulf %14, %15 : vector<8x256xf32>
    %cst_9 = arith.constant 1.000000e+00 : f32
    %17 = vector.broadcast %cst_9 : f32 to vector<8x256xf32>
    %18 = arith.addf %16, %17 : vector<8x256xf32>
    %cst_10 = arith.constant 5.000000e-01 : f32
    %19 = vector.broadcast %cst_10 : f32 to vector<8x256xf32>
    %20 = arith.mulf %18, %19 : vector<8x256xf32>
    %21 = math.log %20 : vector<8x256xf32>
    %cst_11 = arith.constant 0.000000e+00 : f32
    %22 = vector.broadcast %cst_11 : f32 to vector<8x256xf32>
    %23 = arith.subf %22, %20 : vector<8x256xf32>
    %24 = math.log1p %23 : vector<8x256xf32>
    %25 = arith.subf %21, %24 : vector<8x256xf32>
    %c0_12 = arith.constant 0 : index
    %c0_13 = arith.constant 0 : index
    %26 = vector.load %arg3[%c0_12, %c0_13] : memref<8x256xf32, #tpu.memory_space<vmem>>, vector<8x256xf32>
    tpu.vector_store %arg3[%c0_12, %c0_13], %25 {strides = array<i32>} : memref<8x256xf32, #tpu.memory_space<vmem>>, vector<8x256xf32>,
    %27 = tpu.iota {dimensions = array<i32: 1>} : vector<8x256xi32>
    %c192_i32 = arith.constant 192 : i32
    %28 = vector.broadcast %c192_i32 : i32 to vector<8x256xi32>
    %29 = arith.cmpi slt, %27, %28 : vector<8x256xi32>
    %30 = arith.extui %29 : vector<8x256xi1> to vector<8x256xi32>
    %31 = arith.sitofp %30 : vector<8x256xi32> to vector<8x256xf32>
    %32 = arith.addf %21, %24 : vector<8x256xf32>
    %cst_14 = arith.constant 0.000000e+00 : f32
    %33 = vector.broadcast %cst_14 : f32 to vector<8x256xf32>
    %34 = arith.subf %33, %32 : vector<8x256xf32>
    %cst_15 = arith.constant 0.105360515 : f32
    %35 = vector.broadcast %cst_15 : f32 to vector<8x256xf32>
    %36 = arith.subf %34, %35 : vector<8x256xf32>
    %37 = arith.mulf %36, %31 : vector<8x256xf32>
    %38 = vector.extract_strided_slice %37 {offsets = [0, 0], sizes = [8, 128], strides = [1, 1]} : vector<8x256xf32> to vector<8x128xf32>
    %39 = vector.extract_strided_slice %37 {offsets = [0, 128], sizes = [8, 128], strides = [1, 1]} : vector<8x256xf32> to vector<8x128xf32>
    %40 = arith.addf %38, %39 : vector<8x128xf32>
    %c0_16 = arith.constant 0 : index
    %c0_17 = arith.constant 0 : index
    %41 = vector.load %arg4[%c0_16, %c0_17] : memref<8x128xf32, #tpu.memory_space<vmem>>, vector<8x128xf32>
    tpu.vector_store %arg4[%c0_16, %c0_17], %40 {strides = array<i32>} : memref<8x128xf32, #tpu.memory_space<vmem>>, vector<8x128xf32>,
    return
  }
  func.func @transform_0(%arg0: i32) -> (i32, i32) {
    %c0_i32 = arith.constant 0 : i32
    %c0_i32_0 = arith.constant 0 : i32
    return %arg0, %c0_i32 : i32, i32
  }
  func.func @transform_1(%arg0: i32) -> (i32, i32) {
    %c0_i32 = arith.constant 0 : i32
    %c0_i32_0 = arith.constant 0 : i32
    return %arg0, %c0_i32 : i32, i32
  }
  func.func @transform_2(%arg0: i32) -> (i32, i32) {
    %c0_i32 = arith.constant 0 : i32
    %c0_i32_0 = arith.constant 0 : i32
    return %arg0, %c0_i32 : i32, i32
  }
  func.func @transform_3(%arg0: i32) -> (i32, i32) {
    %c0_i32 = arith.constant 0 : i32
    %c0_i32_0 = arith.constant 0 : i32
    return %arg0, %c0_i32 : i32, i32
  }
}

module attributes {stable_mosaic.version = 11 : i64} {
  func.func @_conv3x3_kernel(%arg0: i32, %arg1: memref<1x82x6xbf16, #tpu.memory_space<vmem>>, %arg2: memref<9x6x16xbf16, #tpu.memory_space<vmem>>, %arg3: memref<64x1xbf16, #tpu.memory_space<vmem>>, %arg4: memref<64x1xbf16, #tpu.memory_space<vmem>>, %arg5: memref<1x16xf32, #tpu.memory_space<vmem>>, %arg6: memref<1x64x16xf32, #tpu.memory_space<vmem>>) attributes {dimension_semantics = [#tpu.dimension_semantics<parallel>], iteration_bounds = array<i64: 2>, scalar_prefetch = 0 : i64, scratch_operands = 0 : i64, tpu.core_type = #tpu.core_type<tc>, window_params = [{transform_indices = @transform_0, window_bounds = array<i64: 1, 82, 6>}, {pipeline_mode = #tpu.pipeline_mode<synchronous>, transform_indices = @transform_1, window_bounds = array<i64: 9, 6, 16>}, {pipeline_mode = #tpu.pipeline_mode<synchronous>, transform_indices = @transform_2, window_bounds = array<i64: 64, 1>}, {pipeline_mode = #tpu.pipeline_mode<synchronous>, transform_indices = @transform_3, window_bounds = array<i64: 64, 1>}, {pipeline_mode = #tpu.pipeline_mode<synchronous>, transform_indices = @transform_4, window_bounds = array<i64: 1, 16>}, {transform_indices = @transform_5, window_bounds = array<i64: 1, 64, 16>}]} {
    %c0 = arith.constant 0 : index
    %c0_0 = arith.constant 0 : index
    %c0_1 = arith.constant 0 : index
    %0 = vector.load %arg1[%c0, %c0_0, %c0_1] : memref<1x82x6xbf16, #tpu.memory_space<vmem>>, vector<1x64x6xbf16>
    %1 = vector.shape_cast %0 : vector<1x64x6xbf16> to vector<64x6xbf16>
    %c0_2 = arith.constant 0 : index
    %c0_3 = arith.constant 0 : index
    %2 = vector.load %arg3[%c0_2, %c0_3] : memref<64x1xbf16, #tpu.memory_space<vmem>>, vector<64x1xbf16>
    %3 = vector.broadcast %2 : vector<64x1xbf16> to vector<64x6xbf16>
    %4 = arith.mulf %1, %3 : vector<64x6xbf16>
    %c0_4 = arith.constant 0 : index
    %c0_5 = arith.constant 0 : index
    %c0_6 = arith.constant 0 : index
    %5 = vector.load %arg2[%c0_4, %c0_5, %c0_6] : memref<9x6x16xbf16, #tpu.memory_space<vmem>>, vector<1x6x16xbf16>
    %6 = vector.shape_cast %5 : vector<1x6x16xbf16> to vector<6x16xbf16>
    %cst = arith.constant dense<0.000000e+00> : vector<64x16xf32>
    %7 = tpu.matmul %4, %6, %cst {dimension_numbers = #tpu.dot_dimension_numbers<[1], [0], [0], [1], [0, 0, 1, 1], [], []>} : vector<64x6xbf16>, vector<6x16xbf16>, vector<64x16xf32> -> vector<64x16xf32>
    %c0_7 = arith.constant 0 : index
    %c1 = arith.constant 1 : index
    %c0_8 = arith.constant 0 : index
    %8 = vector.load %arg1[%c0_7, %c1, %c0_8] : memref<1x82x6xbf16, #tpu.memory_space<vmem>>, vector<1x64x6xbf16>
    %9 = vector.shape_cast %8 : vector<1x64x6xbf16> to vector<64x6xbf16>
    %c1_9 = arith.constant 1 : index
    %c0_10 = arith.constant 0 : index
    %c0_11 = arith.constant 0 : index
    %10 = vector.load %arg2[%c1_9, %c0_10, %c0_11] : memref<9x6x16xbf16, #tpu.memory_space<vmem>>, vector<1x6x16xbf16>
    %11 = vector.shape_cast %10 : vector<1x6x16xbf16> to vector<6x16xbf16>
    %cst_12 = arith.constant dense<0.000000e+00> : vector<64x16xf32>
    %12 = tpu.matmul %9, %11, %cst_12 {dimension_numbers = #tpu.dot_dimension_numbers<[1], [0], [0], [1], [0, 0, 1, 1], [], []>} : vector<64x6xbf16>, vector<6x16xbf16>, vector<64x16xf32> -> vector<64x16xf32>
    %13 = arith.addf %7, %12 : vector<64x16xf32>
    %c0_13 = arith.constant 0 : index
    %c2 = arith.constant 2 : index
    %c0_14 = arith.constant 0 : index
    %14 = vector.load %arg1[%c0_13, %c2, %c0_14] : memref<1x82x6xbf16, #tpu.memory_space<vmem>>, vector<1x64x6xbf16>
    %15 = vector.shape_cast %14 : vector<1x64x6xbf16> to vector<64x6xbf16>
    %c0_15 = arith.constant 0 : index
    %c0_16 = arith.constant 0 : index
    %16 = vector.load %arg4[%c0_15, %c0_16] : memref<64x1xbf16, #tpu.memory_space<vmem>>, vector<64x1xbf16>
    %17 = vector.broadcast %16 : vector<64x1xbf16> to vector<64x6xbf16>
    %18 = arith.mulf %15, %17 : vector<64x6xbf16>
    %c2_17 = arith.constant 2 : index
    %c0_18 = arith.constant 0 : index
    %c0_19 = arith.constant 0 : index
    %19 = vector.load %arg2[%c2_17, %c0_18, %c0_19] : memref<9x6x16xbf16, #tpu.memory_space<vmem>>, vector<1x6x16xbf16>
    %20 = vector.shape_cast %19 : vector<1x6x16xbf16> to vector<6x16xbf16>
    %cst_20 = arith.constant dense<0.000000e+00> : vector<64x16xf32>
    %21 = tpu.matmul %18, %20, %cst_20 {dimension_numbers = #tpu.dot_dimension_numbers<[1], [0], [0], [1], [0, 0, 1, 1], [], []>} : vector<64x6xbf16>, vector<6x16xbf16>, vector<64x16xf32> -> vector<64x16xf32>
    %22 = arith.addf %13, %21 : vector<64x16xf32>
    %c0_21 = arith.constant 0 : index
    %c8 = arith.constant 8 : index
    %c0_22 = arith.constant 0 : index
    %23 = vector.load %arg1[%c0_21, %c8, %c0_22] : memref<1x82x6xbf16, #tpu.memory_space<vmem>>, vector<1x64x6xbf16>
    %24 = vector.shape_cast %23 : vector<1x64x6xbf16> to vector<64x6xbf16>
    %c0_23 = arith.constant 0 : index
    %c0_24 = arith.constant 0 : index
    %25 = vector.load %arg3[%c0_23, %c0_24] : memref<64x1xbf16, #tpu.memory_space<vmem>>, vector<64x1xbf16>
    %26 = vector.broadcast %25 : vector<64x1xbf16> to vector<64x6xbf16>
    %27 = arith.mulf %24, %26 : vector<64x6xbf16>
    %c3 = arith.constant 3 : index
    %c0_25 = arith.constant 0 : index
    %c0_26 = arith.constant 0 : index
    %28 = vector.load %arg2[%c3, %c0_25, %c0_26] : memref<9x6x16xbf16, #tpu.memory_space<vmem>>, vector<1x6x16xbf16>
    %29 = vector.shape_cast %28 : vector<1x6x16xbf16> to vector<6x16xbf16>
    %cst_27 = arith.constant dense<0.000000e+00> : vector<64x16xf32>
    %30 = tpu.matmul %27, %29, %cst_27 {dimension_numbers = #tpu.dot_dimension_numbers<[1], [0], [0], [1], [0, 0, 1, 1], [], []>} : vector<64x6xbf16>, vector<6x16xbf16>, vector<64x16xf32> -> vector<64x16xf32>
    %31 = arith.addf %22, %30 : vector<64x16xf32>
    %c0_28 = arith.constant 0 : index
    %c9 = arith.constant 9 : index
    %c0_29 = arith.constant 0 : index
    %32 = vector.load %arg1[%c0_28, %c9, %c0_29] : memref<1x82x6xbf16, #tpu.memory_space<vmem>>, vector<1x64x6xbf16>
    %33 = vector.shape_cast %32 : vector<1x64x6xbf16> to vector<64x6xbf16>
    %c4 = arith.constant 4 : index
    %c0_30 = arith.constant 0 : index
    %c0_31 = arith.constant 0 : index
    %34 = vector.load %arg2[%c4, %c0_30, %c0_31] : memref<9x6x16xbf16, #tpu.memory_space<vmem>>, vector<1x6x16xbf16>
    %35 = vector.shape_cast %34 : vector<1x6x16xbf16> to vector<6x16xbf16>
    %cst_32 = arith.constant dense<0.000000e+00> : vector<64x16xf32>
    %36 = tpu.matmul %33, %35, %cst_32 {dimension_numbers = #tpu.dot_dimension_numbers<[1], [0], [0], [1], [0, 0, 1, 1], [], []>} : vector<64x6xbf16>, vector<6x16xbf16>, vector<64x16xf32> -> vector<64x16xf32>
    %37 = arith.addf %31, %36 : vector<64x16xf32>
    %c0_33 = arith.constant 0 : index
    %c10 = arith.constant 10 : index
    %c0_34 = arith.constant 0 : index
    %38 = vector.load %arg1[%c0_33, %c10, %c0_34] : memref<1x82x6xbf16, #tpu.memory_space<vmem>>, vector<1x64x6xbf16>
    %39 = vector.shape_cast %38 : vector<1x64x6xbf16> to vector<64x6xbf16>
    %c0_35 = arith.constant 0 : index
    %c0_36 = arith.constant 0 : index
    %40 = vector.load %arg4[%c0_35, %c0_36] : memref<64x1xbf16, #tpu.memory_space<vmem>>, vector<64x1xbf16>
    %41 = vector.broadcast %40 : vector<64x1xbf16> to vector<64x6xbf16>
    %42 = arith.mulf %39, %41 : vector<64x6xbf16>
    %c5 = arith.constant 5 : index
    %c0_37 = arith.constant 0 : index
    %c0_38 = arith.constant 0 : index
    %43 = vector.load %arg2[%c5, %c0_37, %c0_38] : memref<9x6x16xbf16, #tpu.memory_space<vmem>>, vector<1x6x16xbf16>
    %44 = vector.shape_cast %43 : vector<1x6x16xbf16> to vector<6x16xbf16>
    %cst_39 = arith.constant dense<0.000000e+00> : vector<64x16xf32>
    %45 = tpu.matmul %42, %44, %cst_39 {dimension_numbers = #tpu.dot_dimension_numbers<[1], [0], [0], [1], [0, 0, 1, 1], [], []>} : vector<64x6xbf16>, vector<6x16xbf16>, vector<64x16xf32> -> vector<64x16xf32>
    %46 = arith.addf %37, %45 : vector<64x16xf32>
    %c0_40 = arith.constant 0 : index
    %c16 = arith.constant 16 : index
    %c0_41 = arith.constant 0 : index
    %47 = vector.load %arg1[%c0_40, %c16, %c0_41] : memref<1x82x6xbf16, #tpu.memory_space<vmem>>, vector<1x64x6xbf16>
    %48 = vector.shape_cast %47 : vector<1x64x6xbf16> to vector<64x6xbf16>
    %c0_42 = arith.constant 0 : index
    %c0_43 = arith.constant 0 : index
    %49 = vector.load %arg3[%c0_42, %c0_43] : memref<64x1xbf16, #tpu.memory_space<vmem>>, vector<64x1xbf16>
    %50 = vector.broadcast %49 : vector<64x1xbf16> to vector<64x6xbf16>
    %51 = arith.mulf %48, %50 : vector<64x6xbf16>
    %c6 = arith.constant 6 : index
    %c0_44 = arith.constant 0 : index
    %c0_45 = arith.constant 0 : index
    %52 = vector.load %arg2[%c6, %c0_44, %c0_45] : memref<9x6x16xbf16, #tpu.memory_space<vmem>>, vector<1x6x16xbf16>
    %53 = vector.shape_cast %52 : vector<1x6x16xbf16> to vector<6x16xbf16>
    %cst_46 = arith.constant dense<0.000000e+00> : vector<64x16xf32>
    %54 = tpu.matmul %51, %53, %cst_46 {dimension_numbers = #tpu.dot_dimension_numbers<[1], [0], [0], [1], [0, 0, 1, 1], [], []>} : vector<64x6xbf16>, vector<6x16xbf16>, vector<64x16xf32> -> vector<64x16xf32>
    %55 = arith.addf %46, %54 : vector<64x16xf32>
    %c0_47 = arith.constant 0 : index
    %c17 = arith.constant 17 : index
    %c0_48 = arith.constant 0 : index
    %56 = vector.load %arg1[%c0_47, %c17, %c0_48] : memref<1x82x6xbf16, #tpu.memory_space<vmem>>, vector<1x64x6xbf16>
    %57 = vector.shape_cast %56 : vector<1x64x6xbf16> to vector<64x6xbf16>
    %c7 = arith.constant 7 : index
    %c0_49 = arith.constant 0 : index
    %c0_50 = arith.constant 0 : index
    %58 = vector.load %arg2[%c7, %c0_49, %c0_50] : memref<9x6x16xbf16, #tpu.memory_space<vmem>>, vector<1x6x16xbf16>
    %59 = vector.shape_cast %58 : vector<1x6x16xbf16> to vector<6x16xbf16>
    %cst_51 = arith.constant dense<0.000000e+00> : vector<64x16xf32>
    %60 = tpu.matmul %57, %59, %cst_51 {dimension_numbers = #tpu.dot_dimension_numbers<[1], [0], [0], [1], [0, 0, 1, 1], [], []>} : vector<64x6xbf16>, vector<6x16xbf16>, vector<64x16xf32> -> vector<64x16xf32>
    %61 = arith.addf %55, %60 : vector<64x16xf32>
    %c0_52 = arith.constant 0 : index
    %c18 = arith.constant 18 : index
    %c0_53 = arith.constant 0 : index
    %62 = vector.load %arg1[%c0_52, %c18, %c0_53] : memref<1x82x6xbf16, #tpu.memory_space<vmem>>, vector<1x64x6xbf16>
    %63 = vector.shape_cast %62 : vector<1x64x6xbf16> to vector<64x6xbf16>
    %c0_54 = arith.constant 0 : index
    %c0_55 = arith.constant 0 : index
    %64 = vector.load %arg4[%c0_54, %c0_55] : memref<64x1xbf16, #tpu.memory_space<vmem>>, vector<64x1xbf16>
    %65 = vector.broadcast %64 : vector<64x1xbf16> to vector<64x6xbf16>
    %66 = arith.mulf %63, %65 : vector<64x6xbf16>
    %c8_56 = arith.constant 8 : index
    %c0_57 = arith.constant 0 : index
    %c0_58 = arith.constant 0 : index
    %67 = vector.load %arg2[%c8_56, %c0_57, %c0_58] : memref<9x6x16xbf16, #tpu.memory_space<vmem>>, vector<1x6x16xbf16>
    %68 = vector.shape_cast %67 : vector<1x6x16xbf16> to vector<6x16xbf16>
    %cst_59 = arith.constant dense<0.000000e+00> : vector<64x16xf32>
    %69 = tpu.matmul %66, %68, %cst_59 {dimension_numbers = #tpu.dot_dimension_numbers<[1], [0], [0], [1], [0, 0, 1, 1], [], []>} : vector<64x6xbf16>, vector<6x16xbf16>, vector<64x16xf32> -> vector<64x16xf32>
    %70 = arith.addf %61, %69 : vector<64x16xf32>
    %c0_60 = arith.constant 0 : index
    %c0_61 = arith.constant 0 : index
    %71 = vector.load %arg5[%c0_60, %c0_61] : memref<1x16xf32, #tpu.memory_space<vmem>>, vector<1x16xf32>
    %72 = vector.broadcast %71 : vector<1x16xf32> to vector<64x16xf32>
    %73 = arith.addf %70, %72 : vector<64x16xf32>
    %c0_62 = arith.constant 0 : index
    %c0_63 = arith.constant 0 : index
    %c0_64 = arith.constant 0 : index
    %74 = vector.load %arg6[%c0_62, %c0_63, %c0_64] : memref<1x64x16xf32, #tpu.memory_space<vmem>>, vector<1x64x16xf32>
    %75 = vector.shape_cast %74 : vector<1x64x16xf32> to vector<64x16xf32>
    %76 = vector.shape_cast %73 : vector<64x16xf32> to vector<1x64x16xf32>
    tpu.vector_store %arg6[%c0_62, %c0_63, %c0_64], %76 {strides = array<i32>} : memref<1x64x16xf32, #tpu.memory_space<vmem>>, vector<1x64x16xf32>,
    return
  }
  func.func @transform_0(%arg0: i32) -> (i32, i32, i32) {
    %c0_i32 = arith.constant 0 : i32
    %c0_i32_0 = arith.constant 0 : i32
    %c0_i32_1 = arith.constant 0 : i32
    return %arg0, %c0_i32, %c0_i32_0 : i32, i32, i32
  }
  func.func @transform_1(%arg0: i32) -> (i32, i32, i32) {
    %c0_i32 = arith.constant 0 : i32
    %c0_i32_0 = arith.constant 0 : i32
    %c0_i32_1 = arith.constant 0 : i32
    %c0_i32_2 = arith.constant 0 : i32
    return %c0_i32, %c0_i32_0, %c0_i32_1 : i32, i32, i32
  }
  func.func @transform_2(%arg0: i32) -> (i32, i32) {
    %c0_i32 = arith.constant 0 : i32
    %c0_i32_0 = arith.constant 0 : i32
    %c0_i32_1 = arith.constant 0 : i32
    return %c0_i32, %c0_i32_0 : i32, i32
  }
  func.func @transform_3(%arg0: i32) -> (i32, i32) {
    %c0_i32 = arith.constant 0 : i32
    %c0_i32_0 = arith.constant 0 : i32
    %c0_i32_1 = arith.constant 0 : i32
    return %c0_i32, %c0_i32_0 : i32, i32
  }
  func.func @transform_4(%arg0: i32) -> (i32, i32) {
    %c0_i32 = arith.constant 0 : i32
    %c0_i32_0 = arith.constant 0 : i32
    %c0_i32_1 = arith.constant 0 : i32
    return %c0_i32, %c0_i32_0 : i32, i32
  }
  func.func @transform_5(%arg0: i32) -> (i32, i32, i32) {
    %c0_i32 = arith.constant 0 : i32
    %c0_i32_0 = arith.constant 0 : i32
    %c0_i32_1 = arith.constant 0 : i32
    return %arg0, %c0_i32, %c0_i32_0 : i32, i32, i32
  }
}

module attributes {stable_mosaic.version = 11 : i64} {
  func.func @_conv3x3_kernel(%arg0: i32, %arg1: memref<1x82x16xbf16, #tpu.memory_space<vmem>>, %arg2: memref<9x16x16xbf16, #tpu.memory_space<vmem>>, %arg3: memref<64x1xbf16, #tpu.memory_space<vmem>>, %arg4: memref<64x1xbf16, #tpu.memory_space<vmem>>, %arg5: memref<1x16xf32, #tpu.memory_space<vmem>>, %arg6: memref<1x64x16xf32, #tpu.memory_space<vmem>>) attributes {dimension_semantics = [#tpu.dimension_semantics<parallel>], iteration_bounds = array<i64: 2>, scalar_prefetch = 0 : i64, scratch_operands = 0 : i64, tpu.core_type = #tpu.core_type<tc>, window_params = [{transform_indices = @transform_0, window_bounds = array<i64: 1, 82, 16>}, {pipeline_mode = #tpu.pipeline_mode<synchronous>, transform_indices = @transform_1, window_bounds = array<i64: 9, 16, 16>}, {pipeline_mode = #tpu.pipeline_mode<synchronous>, transform_indices = @transform_2, window_bounds = array<i64: 64, 1>}, {pipeline_mode = #tpu.pipeline_mode<synchronous>, transform_indices = @transform_3, window_bounds = array<i64: 64, 1>}, {pipeline_mode = #tpu.pipeline_mode<synchronous>, transform_indices = @transform_4, window_bounds = array<i64: 1, 16>}, {transform_indices = @transform_5, window_bounds = array<i64: 1, 64, 16>}]} {
    %c0 = arith.constant 0 : index
    %c0_0 = arith.constant 0 : index
    %c0_1 = arith.constant 0 : index
    %0 = vector.load %arg1[%c0, %c0_0, %c0_1] : memref<1x82x16xbf16, #tpu.memory_space<vmem>>, vector<1x64x16xbf16>
    %1 = vector.shape_cast %0 : vector<1x64x16xbf16> to vector<64x16xbf16>
    %c0_2 = arith.constant 0 : index
    %c0_3 = arith.constant 0 : index
    %2 = vector.load %arg3[%c0_2, %c0_3] : memref<64x1xbf16, #tpu.memory_space<vmem>>, vector<64x1xbf16>
    %3 = vector.broadcast %2 : vector<64x1xbf16> to vector<64x16xbf16>
    %4 = arith.mulf %1, %3 : vector<64x16xbf16>
    %c0_4 = arith.constant 0 : index
    %c0_5 = arith.constant 0 : index
    %c0_6 = arith.constant 0 : index
    %5 = vector.load %arg2[%c0_4, %c0_5, %c0_6] : memref<9x16x16xbf16, #tpu.memory_space<vmem>>, vector<1x16x16xbf16>
    %6 = vector.shape_cast %5 : vector<1x16x16xbf16> to vector<16x16xbf16>
    %cst = arith.constant dense<0.000000e+00> : vector<64x16xf32>
    %7 = tpu.matmul %4, %6, %cst {dimension_numbers = #tpu.dot_dimension_numbers<[1], [0], [0], [1], [0, 0, 1, 1], [], []>} : vector<64x16xbf16>, vector<16x16xbf16>, vector<64x16xf32> -> vector<64x16xf32>
    %c0_7 = arith.constant 0 : index
    %c1 = arith.constant 1 : index
    %c0_8 = arith.constant 0 : index
    %8 = vector.load %arg1[%c0_7, %c1, %c0_8] : memref<1x82x16xbf16, #tpu.memory_space<vmem>>, vector<1x64x16xbf16>
    %9 = vector.shape_cast %8 : vector<1x64x16xbf16> to vector<64x16xbf16>
    %c1_9 = arith.constant 1 : index
    %c0_10 = arith.constant 0 : index
    %c0_11 = arith.constant 0 : index
    %10 = vector.load %arg2[%c1_9, %c0_10, %c0_11] : memref<9x16x16xbf16, #tpu.memory_space<vmem>>, vector<1x16x16xbf16>
    %11 = vector.shape_cast %10 : vector<1x16x16xbf16> to vector<16x16xbf16>
    %cst_12 = arith.constant dense<0.000000e+00> : vector<64x16xf32>
    %12 = tpu.matmul %9, %11, %cst_12 {dimension_numbers = #tpu.dot_dimension_numbers<[1], [0], [0], [1], [0, 0, 1, 1], [], []>} : vector<64x16xbf16>, vector<16x16xbf16>, vector<64x16xf32> -> vector<64x16xf32>
    %13 = arith.addf %7, %12 : vector<64x16xf32>
    %c0_13 = arith.constant 0 : index
    %c2 = arith.constant 2 : index
    %c0_14 = arith.constant 0 : index
    %14 = vector.load %arg1[%c0_13, %c2, %c0_14] : memref<1x82x16xbf16, #tpu.memory_space<vmem>>, vector<1x64x16xbf16>
    %15 = vector.shape_cast %14 : vector<1x64x16xbf16> to vector<64x16xbf16>
    %c0_15 = arith.constant 0 : index
    %c0_16 = arith.constant 0 : index
    %16 = vector.load %arg4[%c0_15, %c0_16] : memref<64x1xbf16, #tpu.memory_space<vmem>>, vector<64x1xbf16>
    %17 = vector.broadcast %16 : vector<64x1xbf16> to vector<64x16xbf16>
    %18 = arith.mulf %15, %17 : vector<64x16xbf16>
    %c2_17 = arith.constant 2 : index
    %c0_18 = arith.constant 0 : index
    %c0_19 = arith.constant 0 : index
    %19 = vector.load %arg2[%c2_17, %c0_18, %c0_19] : memref<9x16x16xbf16, #tpu.memory_space<vmem>>, vector<1x16x16xbf16>
    %20 = vector.shape_cast %19 : vector<1x16x16xbf16> to vector<16x16xbf16>
    %cst_20 = arith.constant dense<0.000000e+00> : vector<64x16xf32>
    %21 = tpu.matmul %18, %20, %cst_20 {dimension_numbers = #tpu.dot_dimension_numbers<[1], [0], [0], [1], [0, 0, 1, 1], [], []>} : vector<64x16xbf16>, vector<16x16xbf16>, vector<64x16xf32> -> vector<64x16xf32>
    %22 = arith.addf %13, %21 : vector<64x16xf32>
    %c0_21 = arith.constant 0 : index
    %c8 = arith.constant 8 : index
    %c0_22 = arith.constant 0 : index
    %23 = vector.load %arg1[%c0_21, %c8, %c0_22] : memref<1x82x16xbf16, #tpu.memory_space<vmem>>, vector<1x64x16xbf16>
    %24 = vector.shape_cast %23 : vector<1x64x16xbf16> to vector<64x16xbf16>
    %c0_23 = arith.constant 0 : index
    %c0_24 = arith.constant 0 : index
    %25 = vector.load %arg3[%c0_23, %c0_24] : memref<64x1xbf16, #tpu.memory_space<vmem>>, vector<64x1xbf16>
    %26 = vector.broadcast %25 : vector<64x1xbf16> to vector<64x16xbf16>
    %27 = arith.mulf %24, %26 : vector<64x16xbf16>
    %c3 = arith.constant 3 : index
    %c0_25 = arith.constant 0 : index
    %c0_26 = arith.constant 0 : index
    %28 = vector.load %arg2[%c3, %c0_25, %c0_26] : memref<9x16x16xbf16, #tpu.memory_space<vmem>>, vector<1x16x16xbf16>
    %29 = vector.shape_cast %28 : vector<1x16x16xbf16> to vector<16x16xbf16>
    %cst_27 = arith.constant dense<0.000000e+00> : vector<64x16xf32>
    %30 = tpu.matmul %27, %29, %cst_27 {dimension_numbers = #tpu.dot_dimension_numbers<[1], [0], [0], [1], [0, 0, 1, 1], [], []>} : vector<64x16xbf16>, vector<16x16xbf16>, vector<64x16xf32> -> vector<64x16xf32>
    %31 = arith.addf %22, %30 : vector<64x16xf32>
    %c0_28 = arith.constant 0 : index
    %c9 = arith.constant 9 : index
    %c0_29 = arith.constant 0 : index
    %32 = vector.load %arg1[%c0_28, %c9, %c0_29] : memref<1x82x16xbf16, #tpu.memory_space<vmem>>, vector<1x64x16xbf16>
    %33 = vector.shape_cast %32 : vector<1x64x16xbf16> to vector<64x16xbf16>
    %c4 = arith.constant 4 : index
    %c0_30 = arith.constant 0 : index
    %c0_31 = arith.constant 0 : index
    %34 = vector.load %arg2[%c4, %c0_30, %c0_31] : memref<9x16x16xbf16, #tpu.memory_space<vmem>>, vector<1x16x16xbf16>
    %35 = vector.shape_cast %34 : vector<1x16x16xbf16> to vector<16x16xbf16>
    %cst_32 = arith.constant dense<0.000000e+00> : vector<64x16xf32>
    %36 = tpu.matmul %33, %35, %cst_32 {dimension_numbers = #tpu.dot_dimension_numbers<[1], [0], [0], [1], [0, 0, 1, 1], [], []>} : vector<64x16xbf16>, vector<16x16xbf16>, vector<64x16xf32> -> vector<64x16xf32>
    %37 = arith.addf %31, %36 : vector<64x16xf32>
    %c0_33 = arith.constant 0 : index
    %c10 = arith.constant 10 : index
    %c0_34 = arith.constant 0 : index
    %38 = vector.load %arg1[%c0_33, %c10, %c0_34] : memref<1x82x16xbf16, #tpu.memory_space<vmem>>, vector<1x64x16xbf16>
    %39 = vector.shape_cast %38 : vector<1x64x16xbf16> to vector<64x16xbf16>
    %c0_35 = arith.constant 0 : index
    %c0_36 = arith.constant 0 : index
    %40 = vector.load %arg4[%c0_35, %c0_36] : memref<64x1xbf16, #tpu.memory_space<vmem>>, vector<64x1xbf16>
    %41 = vector.broadcast %40 : vector<64x1xbf16> to vector<64x16xbf16>
    %42 = arith.mulf %39, %41 : vector<64x16xbf16>
    %c5 = arith.constant 5 : index
    %c0_37 = arith.constant 0 : index
    %c0_38 = arith.constant 0 : index
    %43 = vector.load %arg2[%c5, %c0_37, %c0_38] : memref<9x16x16xbf16, #tpu.memory_space<vmem>>, vector<1x16x16xbf16>
    %44 = vector.shape_cast %43 : vector<1x16x16xbf16> to vector<16x16xbf16>
    %cst_39 = arith.constant dense<0.000000e+00> : vector<64x16xf32>
    %45 = tpu.matmul %42, %44, %cst_39 {dimension_numbers = #tpu.dot_dimension_numbers<[1], [0], [0], [1], [0, 0, 1, 1], [], []>} : vector<64x16xbf16>, vector<16x16xbf16>, vector<64x16xf32> -> vector<64x16xf32>
    %46 = arith.addf %37, %45 : vector<64x16xf32>
    %c0_40 = arith.constant 0 : index
    %c16 = arith.constant 16 : index
    %c0_41 = arith.constant 0 : index
    %47 = vector.load %arg1[%c0_40, %c16, %c0_41] : memref<1x82x16xbf16, #tpu.memory_space<vmem>>, vector<1x64x16xbf16>
    %48 = vector.shape_cast %47 : vector<1x64x16xbf16> to vector<64x16xbf16>
    %c0_42 = arith.constant 0 : index
    %c0_43 = arith.constant 0 : index
    %49 = vector.load %arg3[%c0_42, %c0_43] : memref<64x1xbf16, #tpu.memory_space<vmem>>, vector<64x1xbf16>
    %50 = vector.broadcast %49 : vector<64x1xbf16> to vector<64x16xbf16>
    %51 = arith.mulf %48, %50 : vector<64x16xbf16>
    %c6 = arith.constant 6 : index
    %c0_44 = arith.constant 0 : index
    %c0_45 = arith.constant 0 : index
    %52 = vector.load %arg2[%c6, %c0_44, %c0_45] : memref<9x16x16xbf16, #tpu.memory_space<vmem>>, vector<1x16x16xbf16>
    %53 = vector.shape_cast %52 : vector<1x16x16xbf16> to vector<16x16xbf16>
    %cst_46 = arith.constant dense<0.000000e+00> : vector<64x16xf32>
    %54 = tpu.matmul %51, %53, %cst_46 {dimension_numbers = #tpu.dot_dimension_numbers<[1], [0], [0], [1], [0, 0, 1, 1], [], []>} : vector<64x16xbf16>, vector<16x16xbf16>, vector<64x16xf32> -> vector<64x16xf32>
    %55 = arith.addf %46, %54 : vector<64x16xf32>
    %c0_47 = arith.constant 0 : index
    %c17 = arith.constant 17 : index
    %c0_48 = arith.constant 0 : index
    %56 = vector.load %arg1[%c0_47, %c17, %c0_48] : memref<1x82x16xbf16, #tpu.memory_space<vmem>>, vector<1x64x16xbf16>
    %57 = vector.shape_cast %56 : vector<1x64x16xbf16> to vector<64x16xbf16>
    %c7 = arith.constant 7 : index
    %c0_49 = arith.constant 0 : index
    %c0_50 = arith.constant 0 : index
    %58 = vector.load %arg2[%c7, %c0_49, %c0_50] : memref<9x16x16xbf16, #tpu.memory_space<vmem>>, vector<1x16x16xbf16>
    %59 = vector.shape_cast %58 : vector<1x16x16xbf16> to vector<16x16xbf16>
    %cst_51 = arith.constant dense<0.000000e+00> : vector<64x16xf32>
    %60 = tpu.matmul %57, %59, %cst_51 {dimension_numbers = #tpu.dot_dimension_numbers<[1], [0], [0], [1], [0, 0, 1, 1], [], []>} : vector<64x16xbf16>, vector<16x16xbf16>, vector<64x16xf32> -> vector<64x16xf32>
    %61 = arith.addf %55, %60 : vector<64x16xf32>
    %c0_52 = arith.constant 0 : index
    %c18 = arith.constant 18 : index
    %c0_53 = arith.constant 0 : index
    %62 = vector.load %arg1[%c0_52, %c18, %c0_53] : memref<1x82x16xbf16, #tpu.memory_space<vmem>>, vector<1x64x16xbf16>
    %63 = vector.shape_cast %62 : vector<1x64x16xbf16> to vector<64x16xbf16>
    %c0_54 = arith.constant 0 : index
    %c0_55 = arith.constant 0 : index
    %64 = vector.load %arg4[%c0_54, %c0_55] : memref<64x1xbf16, #tpu.memory_space<vmem>>, vector<64x1xbf16>
    %65 = vector.broadcast %64 : vector<64x1xbf16> to vector<64x16xbf16>
    %66 = arith.mulf %63, %65 : vector<64x16xbf16>
    %c8_56 = arith.constant 8 : index
    %c0_57 = arith.constant 0 : index
    %c0_58 = arith.constant 0 : index
    %67 = vector.load %arg2[%c8_56, %c0_57, %c0_58] : memref<9x16x16xbf16, #tpu.memory_space<vmem>>, vector<1x16x16xbf16>
    %68 = vector.shape_cast %67 : vector<1x16x16xbf16> to vector<16x16xbf16>
    %cst_59 = arith.constant dense<0.000000e+00> : vector<64x16xf32>
    %69 = tpu.matmul %66, %68, %cst_59 {dimension_numbers = #tpu.dot_dimension_numbers<[1], [0], [0], [1], [0, 0, 1, 1], [], []>} : vector<64x16xbf16>, vector<16x16xbf16>, vector<64x16xf32> -> vector<64x16xf32>
    %70 = arith.addf %61, %69 : vector<64x16xf32>
    %c0_60 = arith.constant 0 : index
    %c0_61 = arith.constant 0 : index
    %71 = vector.load %arg5[%c0_60, %c0_61] : memref<1x16xf32, #tpu.memory_space<vmem>>, vector<1x16xf32>
    %72 = vector.broadcast %71 : vector<1x16xf32> to vector<64x16xf32>
    %73 = arith.addf %70, %72 : vector<64x16xf32>
    %c0_62 = arith.constant 0 : index
    %c0_63 = arith.constant 0 : index
    %c0_64 = arith.constant 0 : index
    %74 = vector.load %arg6[%c0_62, %c0_63, %c0_64] : memref<1x64x16xf32, #tpu.memory_space<vmem>>, vector<1x64x16xf32>
    %75 = vector.shape_cast %74 : vector<1x64x16xf32> to vector<64x16xf32>
    %76 = vector.shape_cast %73 : vector<64x16xf32> to vector<1x64x16xf32>
    tpu.vector_store %arg6[%c0_62, %c0_63, %c0_64], %76 {strides = array<i32>} : memref<1x64x16xf32, #tpu.memory_space<vmem>>, vector<1x64x16xf32>,
    return
  }
  func.func @transform_0(%arg0: i32) -> (i32, i32, i32) {
    %c0_i32 = arith.constant 0 : i32
    %c0_i32_0 = arith.constant 0 : i32
    %c0_i32_1 = arith.constant 0 : i32
    return %arg0, %c0_i32, %c0_i32_0 : i32, i32, i32
  }
  func.func @transform_1(%arg0: i32) -> (i32, i32, i32) {
    %c0_i32 = arith.constant 0 : i32
    %c0_i32_0 = arith.constant 0 : i32
    %c0_i32_1 = arith.constant 0 : i32
    %c0_i32_2 = arith.constant 0 : i32
    return %c0_i32, %c0_i32_0, %c0_i32_1 : i32, i32, i32
  }
  func.func @transform_2(%arg0: i32) -> (i32, i32) {
    %c0_i32 = arith.constant 0 : i32
    %c0_i32_0 = arith.constant 0 : i32
    %c0_i32_1 = arith.constant 0 : i32
    return %c0_i32, %c0_i32_0 : i32, i32
  }
  func.func @transform_3(%arg0: i32) -> (i32, i32) {
    %c0_i32 = arith.constant 0 : i32
    %c0_i32_0 = arith.constant 0 : i32
    %c0_i32_1 = arith.constant 0 : i32
    return %c0_i32, %c0_i32_0 : i32, i32
  }
  func.func @transform_4(%arg0: i32) -> (i32, i32) {
    %c0_i32 = arith.constant 0 : i32
    %c0_i32_0 = arith.constant 0 : i32
    %c0_i32_1 = arith.constant 0 : i32
    return %c0_i32, %c0_i32_0 : i32, i32
  }
  func.func @transform_5(%arg0: i32) -> (i32, i32, i32) {
    %c0_i32 = arith.constant 0 : i32
    %c0_i32_0 = arith.constant 0 : i32
    %c0_i32_1 = arith.constant 0 : i32
    return %arg0, %c0_i32, %c0_i32_0 : i32, i32, i32
  }
}

module attributes {stable_mosaic.version = 11 : i64} {
  func.func @_mm_kernel(%arg0: i32, %arg1: memref<64x16xbf16, #tpu.memory_space<vmem>>, %arg2: memref<16x128xbf16, #tpu.memory_space<vmem>>, %arg3: memref<1x128xf32, #tpu.memory_space<vmem>>, %arg4: memref<64x128xf32, #tpu.memory_space<vmem>>) attributes {dimension_semantics = [#tpu.dimension_semantics<parallel>], iteration_bounds = array<i64: 2>, scalar_prefetch = 0 : i64, scratch_operands = 0 : i64, tpu.core_type = #tpu.core_type<tc>, window_params = [{transform_indices = @transform_0, window_bounds = array<i64: 64, 16>}, {pipeline_mode = #tpu.pipeline_mode<synchronous>, transform_indices = @transform_1, window_bounds = array<i64: 16, 128>}, {pipeline_mode = #tpu.pipeline_mode<synchronous>, transform_indices = @transform_2, window_bounds = array<i64: 1, 128>}, {transform_indices = @transform_3, window_bounds = array<i64: 64, 128>}]} {
    %c0 = arith.constant 0 : index
    %c0_0 = arith.constant 0 : index
    %0 = vector.load %arg1[%c0, %c0_0] : memref<64x16xbf16, #tpu.memory_space<vmem>>, vector<64x16xbf16>
    %c0_1 = arith.constant 0 : index
    %c0_2 = arith.constant 0 : index
    %1 = vector.load %arg2[%c0_1, %c0_2] : memref<16x128xbf16, #tpu.memory_space<vmem>>, vector<16x128xbf16>
    %cst = arith.constant dense<0.000000e+00> : vector<64x128xf32>
    %2 = tpu.matmul %0, %1, %cst {dimension_numbers = #tpu.dot_dimension_numbers<[1], [0], [0], [1], [0, 0, 1, 1], [], []>} : vector<64x16xbf16>, vector<16x128xbf16>, vector<64x128xf32> -> vector<64x128xf32>
    %c0_3 = arith.constant 0 : index
    %c0_4 = arith.constant 0 : index
    %3 = vector.load %arg3[%c0_3, %c0_4] : memref<1x128xf32, #tpu.memory_space<vmem>>, vector<1x128xf32>
    %4 = vector.broadcast %3 : vector<1x128xf32> to vector<64x128xf32>
    %5 = arith.addf %2, %4 : vector<64x128xf32>
    %c0_5 = arith.constant 0 : index
    %c0_6 = arith.constant 0 : index
    %6 = vector.load %arg4[%c0_5, %c0_6] : memref<64x128xf32, #tpu.memory_space<vmem>>, vector<64x128xf32>
    tpu.vector_store %arg4[%c0_5, %c0_6], %5 {strides = array<i32>} : memref<64x128xf32, #tpu.memory_space<vmem>>, vector<64x128xf32>,
    return
  }
  func.func @transform_0(%arg0: i32) -> (i32, i32) {
    %c0_i32 = arith.constant 0 : i32
    %c0_i32_0 = arith.constant 0 : i32
    return %arg0, %c0_i32 : i32, i32
  }
  func.func @transform_1(%arg0: i32) -> (i32, i32) {
    %c0_i32 = arith.constant 0 : i32
    %c0_i32_0 = arith.constant 0 : i32
    %c0_i32_1 = arith.constant 0 : i32
    return %c0_i32, %c0_i32_0 : i32, i32
  }
  func.func @transform_2(%arg0: i32) -> (i32, i32) {
    %c0_i32 = arith.constant 0 : i32
    %c0_i32_0 = arith.constant 0 : i32
    %c0_i32_1 = arith.constant 0 : i32
    return %c0_i32, %c0_i32_0 : i32, i32
  }
  func.func @transform_3(%arg0: i32) -> (i32, i32) {
    %c0_i32 = arith.constant 0 : i32
    %c0_i32_0 = arith.constant 0 : i32
    return %arg0, %c0_i32 : i32, i32
  }
}

module attributes {stable_mosaic.version = 11 : i64} {
  func.func @_mm_acc_kernel(%arg0: i32, %arg1: memref<64x16xbf16, #tpu.memory_space<vmem>>, %arg2: memref<16x128xbf16, #tpu.memory_space<vmem>>, %arg3: memref<1x128xf32, #tpu.memory_space<vmem>>, %arg4: memref<64x128xf32, #tpu.memory_space<vmem>>, %arg5: memref<64x128xf32, #tpu.memory_space<vmem>>) attributes {dimension_semantics = [#tpu.dimension_semantics<parallel>], iteration_bounds = array<i64: 2>, scalar_prefetch = 0 : i64, scratch_operands = 0 : i64, tpu.core_type = #tpu.core_type<tc>, window_params = [{transform_indices = @transform_0, window_bounds = array<i64: 64, 16>}, {pipeline_mode = #tpu.pipeline_mode<synchronous>, transform_indices = @transform_1, window_bounds = array<i64: 16, 128>}, {pipeline_mode = #tpu.pipeline_mode<synchronous>, transform_indices = @transform_2, window_bounds = array<i64: 1, 128>}, {transform_indices = @transform_3, window_bounds = array<i64: 64, 128>}, {transform_indices = @transform_4, window_bounds = array<i64: 64, 128>}]} {
    %c0 = arith.constant 0 : index
    %c0_0 = arith.constant 0 : index
    %0 = vector.load %arg1[%c0, %c0_0] : memref<64x16xbf16, #tpu.memory_space<vmem>>, vector<64x16xbf16>
    %c0_1 = arith.constant 0 : index
    %c0_2 = arith.constant 0 : index
    %1 = vector.load %arg2[%c0_1, %c0_2] : memref<16x128xbf16, #tpu.memory_space<vmem>>, vector<16x128xbf16>
    %cst = arith.constant dense<0.000000e+00> : vector<64x128xf32>
    %2 = tpu.matmul %0, %1, %cst {dimension_numbers = #tpu.dot_dimension_numbers<[1], [0], [0], [1], [0, 0, 1, 1], [], []>} : vector<64x16xbf16>, vector<16x128xbf16>, vector<64x128xf32> -> vector<64x128xf32>
    %c0_3 = arith.constant 0 : index
    %c0_4 = arith.constant 0 : index
    %3 = vector.load %arg3[%c0_3, %c0_4] : memref<1x128xf32, #tpu.memory_space<vmem>>, vector<1x128xf32>
    %4 = vector.broadcast %3 : vector<1x128xf32> to vector<64x128xf32>
    %5 = arith.addf %2, %4 : vector<64x128xf32>
    %c0_5 = arith.constant 0 : index
    %c0_6 = arith.constant 0 : index
    %6 = vector.load %arg4[%c0_5, %c0_6] : memref<64x128xf32, #tpu.memory_space<vmem>>, vector<64x128xf32>
    %7 = arith.addf %5, %6 : vector<64x128xf32>
    %c0_7 = arith.constant 0 : index
    %c0_8 = arith.constant 0 : index
    %8 = vector.load %arg5[%c0_7, %c0_8] : memref<64x128xf32, #tpu.memory_space<vmem>>, vector<64x128xf32>
    tpu.vector_store %arg5[%c0_7, %c0_8], %7 {strides = array<i32>} : memref<64x128xf32, #tpu.memory_space<vmem>>, vector<64x128xf32>,
    return
  }
  func.func @transform_0(%arg0: i32) -> (i32, i32) {
    %c0_i32 = arith.constant 0 : i32
    %c0_i32_0 = arith.constant 0 : i32
    return %arg0, %c0_i32 : i32, i32
  }
  func.func @transform_1(%arg0: i32) -> (i32, i32) {
    %c0_i32 = arith.constant 0 : i32
    %c0_i32_0 = arith.constant 0 : i32
    %c0_i32_1 = arith.constant 0 : i32
    return %c0_i32, %c0_i32_0 : i32, i32
  }
  func.func @transform_2(%arg0: i32) -> (i32, i32) {
    %c0_i32 = arith.constant 0 : i32
    %c0_i32_0 = arith.constant 0 : i32
    %c0_i32_1 = arith.constant 0 : i32
    return %c0_i32, %c0_i32_0 : i32, i32
  }
  func.func @transform_3(%arg0: i32) -> (i32, i32) {
    %c0_i32 = arith.constant 0 : i32
    %c0_i32_0 = arith.constant 0 : i32
    return %arg0, %c0_i32 : i32, i32
  }
  func.func @transform_4(%arg0: i32) -> (i32, i32) {
    %c0_i32 = arith.constant 0 : i32
    %c0_i32_0 = arith.constant 0 : i32
    return %arg0, %c0_i32 : i32, i32
  }
}

module attributes {stable_mosaic.version = 11 : i64} {
  func.func @_mm_bnrelu_kernel(%arg0: i32, %arg1: memref<64x128xf32, #tpu.memory_space<vmem>>, %arg2: memref<1x128xf32, #tpu.memory_space<vmem>>, %arg3: memref<1x128xf32, #tpu.memory_space<vmem>>, %arg4: memref<128x128xbf16, #tpu.memory_space<vmem>>, %arg5: memref<1x128xf32, #tpu.memory_space<vmem>>, %arg6: memref<64x128xf32, #tpu.memory_space<vmem>>) attributes {dimension_semantics = [#tpu.dimension_semantics<parallel>], iteration_bounds = array<i64: 2>, scalar_prefetch = 0 : i64, scratch_operands = 0 : i64, tpu.core_type = #tpu.core_type<tc>, window_params = [{transform_indices = @transform_0, window_bounds = array<i64: 64, 128>}, {pipeline_mode = #tpu.pipeline_mode<synchronous>, transform_indices = @transform_1, window_bounds = array<i64: 1, 128>}, {pipeline_mode = #tpu.pipeline_mode<synchronous>, transform_indices = @transform_2, window_bounds = array<i64: 1, 128>}, {pipeline_mode = #tpu.pipeline_mode<synchronous>, transform_indices = @transform_3, window_bounds = array<i64: 128, 128>}, {pipeline_mode = #tpu.pipeline_mode<synchronous>, transform_indices = @transform_4, window_bounds = array<i64: 1, 128>}, {transform_indices = @transform_5, window_bounds = array<i64: 64, 128>}]} {
    %c0 = arith.constant 0 : index
    %c0_0 = arith.constant 0 : index
    %0 = vector.load %arg1[%c0, %c0_0] : memref<64x128xf32, #tpu.memory_space<vmem>>, vector<64x128xf32>
    %c0_1 = arith.constant 0 : index
    %c0_2 = arith.constant 0 : index
    %1 = vector.load %arg2[%c0_1, %c0_2] : memref<1x128xf32, #tpu.memory_space<vmem>>, vector<1x128xf32>
    %2 = vector.broadcast %1 : vector<1x128xf32> to vector<64x128xf32>
    %3 = arith.mulf %0, %2 : vector<64x128xf32>
    %c0_3 = arith.constant 0 : index
    %c0_4 = arith.constant 0 : index
    %4 = vector.load %arg3[%c0_3, %c0_4] : memref<1x128xf32, #tpu.memory_space<vmem>>, vector<1x128xf32>
    %5 = vector.broadcast %4 : vector<1x128xf32> to vector<64x128xf32>
    %6 = arith.addf %3, %5 : vector<64x128xf32>
    %cst = arith.constant 0.000000e+00 : f32
    %7 = vector.broadcast %cst : f32 to vector<64x128xf32>
    %8 = arith.maximumf %6, %7 : vector<64x128xf32>
    %9 = arith.truncf %8 : vector<64x128xf32> to vector<64x128xbf16>
    %c0_5 = arith.constant 0 : index
    %c0_6 = arith.constant 0 : index
    %10 = vector.load %arg4[%c0_5, %c0_6] : memref<128x128xbf16, #tpu.memory_space<vmem>>, vector<128x128xbf16>
    %cst_7 = arith.constant dense<0.000000e+00> : vector<64x128xf32>
    %11 = tpu.matmul %9, %10, %cst_7 {dimension_numbers = #tpu.dot_dimension_numbers<[1], [0], [0], [1], [0, 0, 1, 1], [], []>} : vector<64x128xbf16>, vector<128x128xbf16>, vector<64x128xf32> -> vector<64x128xf32>
    %c0_8 = arith.constant 0 : index
    %c0_9 = arith.constant 0 : index
    %12 = vector.load %arg5[%c0_8, %c0_9] : memref<1x128xf32, #tpu.memory_space<vmem>>, vector<1x128xf32>
    %13 = vector.broadcast %12 : vector<1x128xf32> to vector<64x128xf32>
    %14 = arith.addf %11, %13 : vector<64x128xf32>
    %c0_10 = arith.constant 0 : index
    %c0_11 = arith.constant 0 : index
    %15 = vector.load %arg6[%c0_10, %c0_11] : memref<64x128xf32, #tpu.memory_space<vmem>>, vector<64x128xf32>
    tpu.vector_store %arg6[%c0_10, %c0_11], %14 {strides = array<i32>} : memref<64x128xf32, #tpu.memory_space<vmem>>, vector<64x128xf32>,
    return
  }
  func.func @transform_0(%arg0: i32) -> (i32, i32) {
    %c0_i32 = arith.constant 0 : i32
    %c0_i32_0 = arith.constant 0 : i32
    return %arg0, %c0_i32 : i32, i32
  }
  func.func @transform_1(%arg0: i32) -> (i32, i32) {
    %c0_i32 = arith.constant 0 : i32
    %c0_i32_0 = arith.constant 0 : i32
    %c0_i32_1 = arith.constant 0 : i32
    return %c0_i32, %c0_i32_0 : i32, i32
  }
  func.func @transform_2(%arg0: i32) -> (i32, i32) {
    %c0_i32 = arith.constant 0 : i32
    %c0_i32_0 = arith.constant 0 : i32
    %c0_i32_1 = arith.constant 0 : i32
    return %c0_i32, %c0_i32_0 : i32, i32
  }
  func.func @transform_3(%arg0: i32) -> (i32, i32) {
    %c0_i32 = arith.constant 0 : i32
    %c0_i32_0 = arith.constant 0 : i32
    %c0_i32_1 = arith.constant 0 : i32
    return %c0_i32, %c0_i32_0 : i32, i32
  }
  func.func @transform_4(%arg0: i32) -> (i32, i32) {
    %c0_i32 = arith.constant 0 : i32
    %c0_i32_0 = arith.constant 0 : i32
    %c0_i32_1 = arith.constant 0 : i32
    return %c0_i32, %c0_i32_0 : i32, i32
  }
  func.func @transform_5(%arg0: i32) -> (i32, i32) {
    %c0_i32 = arith.constant 0 : i32
    %c0_i32_0 = arith.constant 0 : i32
    return %arg0, %c0_i32 : i32, i32
  }
}

module attributes {stable_mosaic.version = 11 : i64} {
  func.func @_coupling_tail_kernel(%arg0: i32, %arg1: memref<8x256xf32, #tpu.memory_space<vmem>>, %arg2: memref<8x256xf32, #tpu.memory_space<vmem>>, %arg3: memref<8x256xf32, #tpu.memory_space<vmem>>, %arg4: memref<1x256xf32, #tpu.memory_space<vmem>>, %arg5: memref<1x256xf32, #tpu.memory_space<vmem>>, %arg6: memref<8x256xf32, #tpu.memory_space<vmem>>, %arg7: memref<8x128xf32, #tpu.memory_space<vmem>>) attributes {dimension_semantics = [#tpu.dimension_semantics<parallel>], iteration_bounds = array<i64: 1>, scalar_prefetch = 0 : i64, scratch_operands = 0 : i64, tpu.core_type = #tpu.core_type<tc>, window_params = [{transform_indices = @transform_0, window_bounds = array<i64: 8, 256>}, {transform_indices = @transform_1, window_bounds = array<i64: 8, 256>}, {transform_indices = @transform_2, window_bounds = array<i64: 8, 256>}, {pipeline_mode = #tpu.pipeline_mode<synchronous>, transform_indices = @transform_3, window_bounds = array<i64: 1, 256>}, {pipeline_mode = #tpu.pipeline_mode<synchronous>, transform_indices = @transform_4, window_bounds = array<i64: 1, 256>}, {transform_indices = @transform_5, window_bounds = array<i64: 8, 256>}, {transform_indices = @transform_6, window_bounds = array<i64: 8, 128>}]} {
    %c0 = arith.constant 0 : index
    %c0_0 = arith.constant 0 : index
    %0 = vector.load %arg4[%c0, %c0_0] : memref<1x256xf32, #tpu.memory_space<vmem>>, vector<1x256xf32>
    %c0_1 = arith.constant 0 : index
    %c0_2 = arith.constant 0 : index
    %1 = vector.load %arg2[%c0_1, %c0_2] : memref<8x256xf32, #tpu.memory_space<vmem>>, vector<8x256xf32>
    %2 = math.tanh %1 : vector<8x256xf32>
    %3 = vector.broadcast %0 : vector<1x256xf32> to vector<8x256xf32>
    %4 = arith.mulf %3, %2 : vector<8x256xf32>
    %c0_3 = arith.constant 0 : index
    %c0_4 = arith.constant 0 : index
    %5 = vector.load %arg3[%c0_3, %c0_4] : memref<8x256xf32, #tpu.memory_space<vmem>>, vector<8x256xf32>
    %c0_5 = arith.constant 0 : index
    %c0_6 = arith.constant 0 : index
    %6 = vector.load %arg5[%c0_5, %c0_6] : memref<1x256xf32, #tpu.memory_space<vmem>>, vector<1x256xf32>
    %7 = vector.broadcast %6 : vector<1x256xf32> to vector<8x256xf32>
    %8 = arith.mulf %5, %7 : vector<8x256xf32>
    %c0_7 = arith.constant 0 : index
    %c0_8 = arith.constant 0 : index
    %9 = vector.load %arg1[%c0_7, %c0_8] : memref<8x256xf32, #tpu.memory_space<vmem>>, vector<8x256xf32>
    %10 = arith.addf %9, %8 : vector<8x256xf32>
    %11 = math.exp %4 : vector<8x256xf32>
    %12 = arith.mulf %10, %11 : vector<8x256xf32>
    %c0_9 = arith.constant 0 : index
    %c0_10 = arith.constant 0 : index
    %13 = vector.load %arg6[%c0_9, %c0_10] : memref<8x256xf32, #tpu.memory_space<vmem>>, vector<8x256xf32>
    tpu.vector_store %arg6[%c0_9, %c0_10], %12 {strides = array<i32>} : memref<8x256xf32, #tpu.memory_space<vmem>>, vector<8x256xf32>,
    %14 = vector.extract_strided_slice %4 {offsets = [0, 0], sizes = [8, 128], strides = [1, 1]} : vector<8x256xf32> to vector<8x128xf32>
    %15 = vector.extract_strided_slice %4 {offsets = [0, 128], sizes = [8, 128], strides = [1, 1]} : vector<8x256xf32> to vector<8x128xf32>
    %16 = arith.addf %14, %15 : vector<8x128xf32>
    %c0_11 = arith.constant 0 : index
    %c0_12 = arith.constant 0 : index
    %17 = vector.load %arg7[%c0_11, %c0_12] : memref<8x128xf32, #tpu.memory_space<vmem>>, vector<8x128xf32>
    tpu.vector_store %arg7[%c0_11, %c0_12], %16 {strides = array<i32>} : memref<8x128xf32, #tpu.memory_space<vmem>>, vector<8x128xf32>,
    return
  }
  func.func @transform_0(%arg0: i32) -> (i32, i32) {
    %c0_i32 = arith.constant 0 : i32
    %c0_i32_0 = arith.constant 0 : i32
    return %arg0, %c0_i32 : i32, i32
  }
  func.func @transform_1(%arg0: i32) -> (i32, i32) {
    %c0_i32 = arith.constant 0 : i32
    %c0_i32_0 = arith.constant 0 : i32
    return %arg0, %c0_i32 : i32, i32
  }
  func.func @transform_2(%arg0: i32) -> (i32, i32) {
    %c0_i32 = arith.constant 0 : i32
    %c0_i32_0 = arith.constant 0 : i32
    return %arg0, %c0_i32 : i32, i32
  }
  func.func @transform_3(%arg0: i32) -> (i32, i32) {
    %c0_i32 = arith.constant 0 : i32
    %c0_i32_0 = arith.constant 0 : i32
    %c0_i32_1 = arith.constant 0 : i32
    return %c0_i32, %c0_i32_0 : i32, i32
  }
  func.func @transform_4(%arg0: i32) -> (i32, i32) {
    %c0_i32 = arith.constant 0 : i32
    %c0_i32_0 = arith.constant 0 : i32
    %c0_i32_1 = arith.constant 0 : i32
    return %c0_i32, %c0_i32_0 : i32, i32
  }
  func.func @transform_5(%arg0: i32) -> (i32, i32) {
    %c0_i32 = arith.constant 0 : i32
    %c0_i32_0 = arith.constant 0 : i32
    return %arg0, %c0_i32 : i32, i32
  }
  func.func @transform_6(%arg0: i32) -> (i32, i32) {
    %c0_i32 = arith.constant 0 : i32
    %c0_i32_0 = arith.constant 0 : i32
    return %arg0, %c0_i32 : i32, i32
  }
}

module attributes {stable_mosaic.version = 11 : i64} {
  func.func @_mm_kernel(%arg0: i32, %arg1: memref<16x32xbf16, #tpu.memory_space<vmem>>, %arg2: memref<32x128xbf16, #tpu.memory_space<vmem>>, %arg3: memref<1x128xf32, #tpu.memory_space<vmem>>, %arg4: memref<16x128xf32, #tpu.memory_space<vmem>>) attributes {dimension_semantics = [#tpu.dimension_semantics<parallel>], iteration_bounds = array<i64: 2>, scalar_prefetch = 0 : i64, scratch_operands = 0 : i64, tpu.core_type = #tpu.core_type<tc>, window_params = [{transform_indices = @transform_0, window_bounds = array<i64: 16, 32>}, {pipeline_mode = #tpu.pipeline_mode<synchronous>, transform_indices = @transform_1, window_bounds = array<i64: 32, 128>}, {pipeline_mode = #tpu.pipeline_mode<synchronous>, transform_indices = @transform_2, window_bounds = array<i64: 1, 128>}, {transform_indices = @transform_3, window_bounds = array<i64: 16, 128>}]} {
    %c0 = arith.constant 0 : index
    %c0_0 = arith.constant 0 : index
    %0 = vector.load %arg1[%c0, %c0_0] : memref<16x32xbf16, #tpu.memory_space<vmem>>, vector<16x32xbf16>
    %c0_1 = arith.constant 0 : index
    %c0_2 = arith.constant 0 : index
    %1 = vector.load %arg2[%c0_1, %c0_2] : memref<32x128xbf16, #tpu.memory_space<vmem>>, vector<32x128xbf16>
    %cst = arith.constant dense<0.000000e+00> : vector<16x128xf32>
    %2 = tpu.matmul %0, %1, %cst {dimension_numbers = #tpu.dot_dimension_numbers<[1], [0], [0], [1], [0, 0, 1, 1], [], []>} : vector<16x32xbf16>, vector<32x128xbf16>, vector<16x128xf32> -> vector<16x128xf32>
    %c0_3 = arith.constant 0 : index
    %c0_4 = arith.constant 0 : index
    %3 = vector.load %arg3[%c0_3, %c0_4] : memref<1x128xf32, #tpu.memory_space<vmem>>, vector<1x128xf32>
    %4 = vector.broadcast %3 : vector<1x128xf32> to vector<16x128xf32>
    %5 = arith.addf %2, %4 : vector<16x128xf32>
    %c0_5 = arith.constant 0 : index
    %c0_6 = arith.constant 0 : index
    %6 = vector.load %arg4[%c0_5, %c0_6] : memref<16x128xf32, #tpu.memory_space<vmem>>, vector<16x128xf32>
    tpu.vector_store %arg4[%c0_5, %c0_6], %5 {strides = array<i32>} : memref<16x128xf32, #tpu.memory_space<vmem>>, vector<16x128xf32>,
    return
  }
  func.func @transform_0(%arg0: i32) -> (i32, i32) {
    %c0_i32 = arith.constant 0 : i32
    %c0_i32_0 = arith.constant 0 : i32
    return %arg0, %c0_i32 : i32, i32
  }
  func.func @transform_1(%arg0: i32) -> (i32, i32) {
    %c0_i32 = arith.constant 0 : i32
    %c0_i32_0 = arith.constant 0 : i32
    %c0_i32_1 = arith.constant 0 : i32
    return %c0_i32, %c0_i32_0 : i32, i32
  }
  func.func @transform_2(%arg0: i32) -> (i32, i32) {
    %c0_i32 = arith.constant 0 : i32
    %c0_i32_0 = arith.constant 0 : i32
    %c0_i32_1 = arith.constant 0 : i32
    return %c0_i32, %c0_i32_0 : i32, i32
  }
  func.func @transform_3(%arg0: i32) -> (i32, i32) {
    %c0_i32 = arith.constant 0 : i32
    %c0_i32_0 = arith.constant 0 : i32
    return %arg0, %c0_i32 : i32, i32
  }
}

module attributes {stable_mosaic.version = 11 : i64} {
  func.func @_conv3x3_kernel(%arg0: i32, %arg1: memref<1x26x32xbf16, #tpu.memory_space<vmem>>, %arg2: memref<9x32x32xbf16, #tpu.memory_space<vmem>>, %arg3: memref<16x1xbf16, #tpu.memory_space<vmem>>, %arg4: memref<16x1xbf16, #tpu.memory_space<vmem>>, %arg5: memref<1x32xf32, #tpu.memory_space<vmem>>, %arg6: memref<1x16x32xf32, #tpu.memory_space<vmem>>) attributes {dimension_semantics = [#tpu.dimension_semantics<parallel>], iteration_bounds = array<i64: 2>, scalar_prefetch = 0 : i64, scratch_operands = 0 : i64, tpu.core_type = #tpu.core_type<tc>, window_params = [{transform_indices = @transform_0, window_bounds = array<i64: 1, 26, 32>}, {pipeline_mode = #tpu.pipeline_mode<synchronous>, transform_indices = @transform_1, window_bounds = array<i64: 9, 32, 32>}, {pipeline_mode = #tpu.pipeline_mode<synchronous>, transform_indices = @transform_2, window_bounds = array<i64: 16, 1>}, {pipeline_mode = #tpu.pipeline_mode<synchronous>, transform_indices = @transform_3, window_bounds = array<i64: 16, 1>}, {pipeline_mode = #tpu.pipeline_mode<synchronous>, transform_indices = @transform_4, window_bounds = array<i64: 1, 32>}, {transform_indices = @transform_5, window_bounds = array<i64: 1, 16, 32>}]} {
    %c0 = arith.constant 0 : index
    %c0_0 = arith.constant 0 : index
    %c0_1 = arith.constant 0 : index
    %0 = vector.load %arg1[%c0, %c0_0, %c0_1] : memref<1x26x32xbf16, #tpu.memory_space<vmem>>, vector<1x16x32xbf16>
    %1 = vector.shape_cast %0 : vector<1x16x32xbf16> to vector<16x32xbf16>
    %c0_2 = arith.constant 0 : index
    %c0_3 = arith.constant 0 : index
    %2 = vector.load %arg3[%c0_2, %c0_3] : memref<16x1xbf16, #tpu.memory_space<vmem>>, vector<16x1xbf16>
    %3 = vector.broadcast %2 : vector<16x1xbf16> to vector<16x32xbf16>
    %4 = arith.mulf %1, %3 : vector<16x32xbf16>
    %c0_4 = arith.constant 0 : index
    %c0_5 = arith.constant 0 : index
    %c0_6 = arith.constant 0 : index
    %5 = vector.load %arg2[%c0_4, %c0_5, %c0_6] : memref<9x32x32xbf16, #tpu.memory_space<vmem>>, vector<1x32x32xbf16>
    %6 = vector.shape_cast %5 : vector<1x32x32xbf16> to vector<32x32xbf16>
    %cst = arith.constant dense<0.000000e+00> : vector<16x32xf32>
    %7 = tpu.matmul %4, %6, %cst {dimension_numbers = #tpu.dot_dimension_numbers<[1], [0], [0], [1], [0, 0, 1, 1], [], []>} : vector<16x32xbf16>, vector<32x32xbf16>, vector<16x32xf32> -> vector<16x32xf32>
    %c0_7 = arith.constant 0 : index
    %c1 = arith.constant 1 : index
    %c0_8 = arith.constant 0 : index
    %8 = vector.load %arg1[%c0_7, %c1, %c0_8] : memref<1x26x32xbf16, #tpu.memory_space<vmem>>, vector<1x16x32xbf16>
    %9 = vector.shape_cast %8 : vector<1x16x32xbf16> to vector<16x32xbf16>
    %c1_9 = arith.constant 1 : index
    %c0_10 = arith.constant 0 : index
    %c0_11 = arith.constant 0 : index
    %10 = vector.load %arg2[%c1_9, %c0_10, %c0_11] : memref<9x32x32xbf16, #tpu.memory_space<vmem>>, vector<1x32x32xbf16>
    %11 = vector.shape_cast %10 : vector<1x32x32xbf16> to vector<32x32xbf16>
    %cst_12 = arith.constant dense<0.000000e+00> : vector<16x32xf32>
    %12 = tpu.matmul %9, %11, %cst_12 {dimension_numbers = #tpu.dot_dimension_numbers<[1], [0], [0], [1], [0, 0, 1, 1], [], []>} : vector<16x32xbf16>, vector<32x32xbf16>, vector<16x32xf32> -> vector<16x32xf32>
    %13 = arith.addf %7, %12 : vector<16x32xf32>
    %c0_13 = arith.constant 0 : index
    %c2 = arith.constant 2 : index
    %c0_14 = arith.constant 0 : index
    %14 = vector.load %arg1[%c0_13, %c2, %c0_14] : memref<1x26x32xbf16, #tpu.memory_space<vmem>>, vector<1x16x32xbf16>
    %15 = vector.shape_cast %14 : vector<1x16x32xbf16> to vector<16x32xbf16>
    %c0_15 = arith.constant 0 : index
    %c0_16 = arith.constant 0 : index
    %16 = vector.load %arg4[%c0_15, %c0_16] : memref<16x1xbf16, #tpu.memory_space<vmem>>, vector<16x1xbf16>
    %17 = vector.broadcast %16 : vector<16x1xbf16> to vector<16x32xbf16>
    %18 = arith.mulf %15, %17 : vector<16x32xbf16>
    %c2_17 = arith.constant 2 : index
    %c0_18 = arith.constant 0 : index
    %c0_19 = arith.constant 0 : index
    %19 = vector.load %arg2[%c2_17, %c0_18, %c0_19] : memref<9x32x32xbf16, #tpu.memory_space<vmem>>, vector<1x32x32xbf16>
    %20 = vector.shape_cast %19 : vector<1x32x32xbf16> to vector<32x32xbf16>
    %cst_20 = arith.constant dense<0.000000e+00> : vector<16x32xf32>
    %21 = tpu.matmul %18, %20, %cst_20 {dimension_numbers = #tpu.dot_dimension_numbers<[1], [0], [0], [1], [0, 0, 1, 1], [], []>} : vector<16x32xbf16>, vector<32x32xbf16>, vector<16x32xf32> -> vector<16x32xf32>
    %22 = arith.addf %13, %21 : vector<16x32xf32>
    %c0_21 = arith.constant 0 : index
    %c4 = arith.constant 4 : index
    %c0_22 = arith.constant 0 : index
    %23 = vector.load %arg1[%c0_21, %c4, %c0_22] : memref<1x26x32xbf16, #tpu.memory_space<vmem>>, vector<1x16x32xbf16>
    %24 = vector.shape_cast %23 : vector<1x16x32xbf16> to vector<16x32xbf16>
    %c0_23 = arith.constant 0 : index
    %c0_24 = arith.constant 0 : index
    %25 = vector.load %arg3[%c0_23, %c0_24] : memref<16x1xbf16, #tpu.memory_space<vmem>>, vector<16x1xbf16>
    %26 = vector.broadcast %25 : vector<16x1xbf16> to vector<16x32xbf16>
    %27 = arith.mulf %24, %26 : vector<16x32xbf16>
    %c3 = arith.constant 3 : index
    %c0_25 = arith.constant 0 : index
    %c0_26 = arith.constant 0 : index
    %28 = vector.load %arg2[%c3, %c0_25, %c0_26] : memref<9x32x32xbf16, #tpu.memory_space<vmem>>, vector<1x32x32xbf16>
    %29 = vector.shape_cast %28 : vector<1x32x32xbf16> to vector<32x32xbf16>
    %cst_27 = arith.constant dense<0.000000e+00> : vector<16x32xf32>
    %30 = tpu.matmul %27, %29, %cst_27 {dimension_numbers = #tpu.dot_dimension_numbers<[1], [0], [0], [1], [0, 0, 1, 1], [], []>} : vector<16x32xbf16>, vector<32x32xbf16>, vector<16x32xf32> -> vector<16x32xf32>
    %31 = arith.addf %22, %30 : vector<16x32xf32>
    %c0_28 = arith.constant 0 : index
    %c5 = arith.constant 5 : index
    %c0_29 = arith.constant 0 : index
    %32 = vector.load %arg1[%c0_28, %c5, %c0_29] : memref<1x26x32xbf16, #tpu.memory_space<vmem>>, vector<1x16x32xbf16>
    %33 = vector.shape_cast %32 : vector<1x16x32xbf16> to vector<16x32xbf16>
    %c4_30 = arith.constant 4 : index
    %c0_31 = arith.constant 0 : index
    %c0_32 = arith.constant 0 : index
    %34 = vector.load %arg2[%c4_30, %c0_31, %c0_32] : memref<9x32x32xbf16, #tpu.memory_space<vmem>>, vector<1x32x32xbf16>
    %35 = vector.shape_cast %34 : vector<1x32x32xbf16> to vector<32x32xbf16>
    %cst_33 = arith.constant dense<0.000000e+00> : vector<16x32xf32>
    %36 = tpu.matmul %33, %35, %cst_33 {dimension_numbers = #tpu.dot_dimension_numbers<[1], [0], [0], [1], [0, 0, 1, 1], [], []>} : vector<16x32xbf16>, vector<32x32xbf16>, vector<16x32xf32> -> vector<16x32xf32>
    %37 = arith.addf %31, %36 : vector<16x32xf32>
    %c0_34 = arith.constant 0 : index
    %c6 = arith.constant 6 : index
    %c0_35 = arith.constant 0 : index
    %38 = vector.load %arg1[%c0_34, %c6, %c0_35] : memref<1x26x32xbf16, #tpu.memory_space<vmem>>, vector<1x16x32xbf16>
    %39 = vector.shape_cast %38 : vector<1x16x32xbf16> to vector<16x32xbf16>
    %c0_36 = arith.constant 0 : index
    %c0_37 = arith.constant 0 : index
    %40 = vector.load %arg4[%c0_36, %c0_37] : memref<16x1xbf16, #tpu.memory_space<vmem>>, vector<16x1xbf16>
    %41 = vector.broadcast %40 : vector<16x1xbf16> to vector<16x32xbf16>
    %42 = arith.mulf %39, %41 : vector<16x32xbf16>
    %c5_38 = arith.constant 5 : index
    %c0_39 = arith.constant 0 : index
    %c0_40 = arith.constant 0 : index
    %43 = vector.load %arg2[%c5_38, %c0_39, %c0_40] : memref<9x32x32xbf16, #tpu.memory_space<vmem>>, vector<1x32x32xbf16>
    %44 = vector.shape_cast %43 : vector<1x32x32xbf16> to vector<32x32xbf16>
    %cst_41 = arith.constant dense<0.000000e+00> : vector<16x32xf32>
    %45 = tpu.matmul %42, %44, %cst_41 {dimension_numbers = #tpu.dot_dimension_numbers<[1], [0], [0], [1], [0, 0, 1, 1], [], []>} : vector<16x32xbf16>, vector<32x32xbf16>, vector<16x32xf32> -> vector<16x32xf32>
    %46 = arith.addf %37, %45 : vector<16x32xf32>
    %c0_42 = arith.constant 0 : index
    %c8 = arith.constant 8 : index
    %c0_43 = arith.constant 0 : index
    %47 = vector.load %arg1[%c0_42, %c8, %c0_43] : memref<1x26x32xbf16, #tpu.memory_space<vmem>>, vector<1x16x32xbf16>
    %48 = vector.shape_cast %47 : vector<1x16x32xbf16> to vector<16x32xbf16>
    %c0_44 = arith.constant 0 : index
    %c0_45 = arith.constant 0 : index
    %49 = vector.load %arg3[%c0_44, %c0_45] : memref<16x1xbf16, #tpu.memory_space<vmem>>, vector<16x1xbf16>
    %50 = vector.broadcast %49 : vector<16x1xbf16> to vector<16x32xbf16>
    %51 = arith.mulf %48, %50 : vector<16x32xbf16>
    %c6_46 = arith.constant 6 : index
    %c0_47 = arith.constant 0 : index
    %c0_48 = arith.constant 0 : index
    %52 = vector.load %arg2[%c6_46, %c0_47, %c0_48] : memref<9x32x32xbf16, #tpu.memory_space<vmem>>, vector<1x32x32xbf16>
    %53 = vector.shape_cast %52 : vector<1x32x32xbf16> to vector<32x32xbf16>
    %cst_49 = arith.constant dense<0.000000e+00> : vector<16x32xf32>
    %54 = tpu.matmul %51, %53, %cst_49 {dimension_numbers = #tpu.dot_dimension_numbers<[1], [0], [0], [1], [0, 0, 1, 1], [], []>} : vector<16x32xbf16>, vector<32x32xbf16>, vector<16x32xf32> -> vector<16x32xf32>
    %55 = arith.addf %46, %54 : vector<16x32xf32>
    %c0_50 = arith.constant 0 : index
    %c9 = arith.constant 9 : index
    %c0_51 = arith.constant 0 : index
    %56 = vector.load %arg1[%c0_50, %c9, %c0_51] : memref<1x26x32xbf16, #tpu.memory_space<vmem>>, vector<1x16x32xbf16>
    %57 = vector.shape_cast %56 : vector<1x16x32xbf16> to vector<16x32xbf16>
    %c7 = arith.constant 7 : index
    %c0_52 = arith.constant 0 : index
    %c0_53 = arith.constant 0 : index
    %58 = vector.load %arg2[%c7, %c0_52, %c0_53] : memref<9x32x32xbf16, #tpu.memory_space<vmem>>, vector<1x32x32xbf16>
    %59 = vector.shape_cast %58 : vector<1x32x32xbf16> to vector<32x32xbf16>
    %cst_54 = arith.constant dense<0.000000e+00> : vector<16x32xf32>
    %60 = tpu.matmul %57, %59, %cst_54 {dimension_numbers = #tpu.dot_dimension_numbers<[1], [0], [0], [1], [0, 0, 1, 1], [], []>} : vector<16x32xbf16>, vector<32x32xbf16>, vector<16x32xf32> -> vector<16x32xf32>
    %61 = arith.addf %55, %60 : vector<16x32xf32>
    %c0_55 = arith.constant 0 : index
    %c10 = arith.constant 10 : index
    %c0_56 = arith.constant 0 : index
    %62 = vector.load %arg1[%c0_55, %c10, %c0_56] : memref<1x26x32xbf16, #tpu.memory_space<vmem>>, vector<1x16x32xbf16>
    %63 = vector.shape_cast %62 : vector<1x16x32xbf16> to vector<16x32xbf16>
    %c0_57 = arith.constant 0 : index
    %c0_58 = arith.constant 0 : index
    %64 = vector.load %arg4[%c0_57, %c0_58] : memref<16x1xbf16, #tpu.memory_space<vmem>>, vector<16x1xbf16>
    %65 = vector.broadcast %64 : vector<16x1xbf16> to vector<16x32xbf16>
    %66 = arith.mulf %63, %65 : vector<16x32xbf16>
    %c8_59 = arith.constant 8 : index
    %c0_60 = arith.constant 0 : index
    %c0_61 = arith.constant 0 : index
    %67 = vector.load %arg2[%c8_59, %c0_60, %c0_61] : memref<9x32x32xbf16, #tpu.memory_space<vmem>>, vector<1x32x32xbf16>
    %68 = vector.shape_cast %67 : vector<1x32x32xbf16> to vector<32x32xbf16>
    %cst_62 = arith.constant dense<0.000000e+00> : vector<16x32xf32>
    %69 = tpu.matmul %66, %68, %cst_62 {dimension_numbers = #tpu.dot_dimension_numbers<[1], [0], [0], [1], [0, 0, 1, 1], [], []>} : vector<16x32xbf16>, vector<32x32xbf16>, vector<16x32xf32> -> vector<16x32xf32>
    %70 = arith.addf %61, %69 : vector<16x32xf32>
    %c0_63 = arith.constant 0 : index
    %c0_64 = arith.constant 0 : index
    %71 = vector.load %arg5[%c0_63, %c0_64] : memref<1x32xf32, #tpu.memory_space<vmem>>, vector<1x32xf32>
    %72 = vector.broadcast %71 : vector<1x32xf32> to vector<16x32xf32>
    %73 = arith.addf %70, %72 : vector<16x32xf32>
    %c0_65 = arith.constant 0 : index
    %c0_66 = arith.constant 0 : index
    %c0_67 = arith.constant 0 : index
    %74 = vector.load %arg6[%c0_65, %c0_66, %c0_67] : memref<1x16x32xf32, #tpu.memory_space<vmem>>, vector<1x16x32xf32>
    %75 = vector.shape_cast %74 : vector<1x16x32xf32> to vector<16x32xf32>
    %76 = vector.shape_cast %73 : vector<16x32xf32> to vector<1x16x32xf32>
    tpu.vector_store %arg6[%c0_65, %c0_66, %c0_67], %76 {strides = array<i32>} : memref<1x16x32xf32, #tpu.memory_space<vmem>>, vector<1x16x32xf32>,
    return
  }
  func.func @transform_0(%arg0: i32) -> (i32, i32, i32) {
    %c0_i32 = arith.constant 0 : i32
    %c0_i32_0 = arith.constant 0 : i32
    %c0_i32_1 = arith.constant 0 : i32
    return %arg0, %c0_i32, %c0_i32_0 : i32, i32, i32
  }
  func.func @transform_1(%arg0: i32) -> (i32, i32, i32) {
    %c0_i32 = arith.constant 0 : i32
    %c0_i32_0 = arith.constant 0 : i32
    %c0_i32_1 = arith.constant 0 : i32
    %c0_i32_2 = arith.constant 0 : i32
    return %c0_i32, %c0_i32_0, %c0_i32_1 : i32, i32, i32
  }
  func.func @transform_2(%arg0: i32) -> (i32, i32) {
    %c0_i32 = arith.constant 0 : i32
    %c0_i32_0 = arith.constant 0 : i32
    %c0_i32_1 = arith.constant 0 : i32
    return %c0_i32, %c0_i32_0 : i32, i32
  }
  func.func @transform_3(%arg0: i32) -> (i32, i32) {
    %c0_i32 = arith.constant 0 : i32
    %c0_i32_0 = arith.constant 0 : i32
    %c0_i32_1 = arith.constant 0 : i32
    return %c0_i32, %c0_i32_0 : i32, i32
  }
  func.func @transform_4(%arg0: i32) -> (i32, i32) {
    %c0_i32 = arith.constant 0 : i32
    %c0_i32_0 = arith.constant 0 : i32
    %c0_i32_1 = arith.constant 0 : i32
    return %c0_i32, %c0_i32_0 : i32, i32
  }
  func.func @transform_5(%arg0: i32) -> (i32, i32, i32) {
    %c0_i32 = arith.constant 0 : i32
    %c0_i32_0 = arith.constant 0 : i32
    %c0_i32_1 = arith.constant 0 : i32
    return %arg0, %c0_i32, %c0_i32_0 : i32, i32, i32
  }
}

module attributes {stable_mosaic.version = 11 : i64} {
  func.func @_conv3x3_kernel(%arg0: i32, %arg1: memref<1x26x12xbf16, #tpu.memory_space<vmem>>, %arg2: memref<9x12x32xbf16, #tpu.memory_space<vmem>>, %arg3: memref<16x1xbf16, #tpu.memory_space<vmem>>, %arg4: memref<16x1xbf16, #tpu.memory_space<vmem>>, %arg5: memref<1x32xf32, #tpu.memory_space<vmem>>, %arg6: memref<1x16x32xf32, #tpu.memory_space<vmem>>) attributes {dimension_semantics = [#tpu.dimension_semantics<parallel>], iteration_bounds = array<i64: 2>, scalar_prefetch = 0 : i64, scratch_operands = 0 : i64, tpu.core_type = #tpu.core_type<tc>, window_params = [{transform_indices = @transform_0, window_bounds = array<i64: 1, 26, 12>}, {pipeline_mode = #tpu.pipeline_mode<synchronous>, transform_indices = @transform_1, window_bounds = array<i64: 9, 12, 32>}, {pipeline_mode = #tpu.pipeline_mode<synchronous>, transform_indices = @transform_2, window_bounds = array<i64: 16, 1>}, {pipeline_mode = #tpu.pipeline_mode<synchronous>, transform_indices = @transform_3, window_bounds = array<i64: 16, 1>}, {pipeline_mode = #tpu.pipeline_mode<synchronous>, transform_indices = @transform_4, window_bounds = array<i64: 1, 32>}, {transform_indices = @transform_5, window_bounds = array<i64: 1, 16, 32>}]} {
    %c0 = arith.constant 0 : index
    %c0_0 = arith.constant 0 : index
    %c0_1 = arith.constant 0 : index
    %0 = vector.load %arg1[%c0, %c0_0, %c0_1] : memref<1x26x12xbf16, #tpu.memory_space<vmem>>, vector<1x16x12xbf16>
    %1 = vector.shape_cast %0 : vector<1x16x12xbf16> to vector<16x12xbf16>
    %c0_2 = arith.constant 0 : index
    %c0_3 = arith.constant 0 : index
    %2 = vector.load %arg3[%c0_2, %c0_3] : memref<16x1xbf16, #tpu.memory_space<vmem>>, vector<16x1xbf16>
    %3 = vector.broadcast %2 : vector<16x1xbf16> to vector<16x12xbf16>
    %4 = arith.mulf %1, %3 : vector<16x12xbf16>
    %c0_4 = arith.constant 0 : index
    %c0_5 = arith.constant 0 : index
    %c0_6 = arith.constant 0 : index
    %5 = vector.load %arg2[%c0_4, %c0_5, %c0_6] : memref<9x12x32xbf16, #tpu.memory_space<vmem>>, vector<1x12x32xbf16>
    %6 = vector.shape_cast %5 : vector<1x12x32xbf16> to vector<12x32xbf16>
    %cst = arith.constant dense<0.000000e+00> : vector<16x32xf32>
    %7 = tpu.matmul %4, %6, %cst {dimension_numbers = #tpu.dot_dimension_numbers<[1], [0], [0], [1], [0, 0, 1, 1], [], []>} : vector<16x12xbf16>, vector<12x32xbf16>, vector<16x32xf32> -> vector<16x32xf32>
    %c0_7 = arith.constant 0 : index
    %c1 = arith.constant 1 : index
    %c0_8 = arith.constant 0 : index
    %8 = vector.load %arg1[%c0_7, %c1, %c0_8] : memref<1x26x12xbf16, #tpu.memory_space<vmem>>, vector<1x16x12xbf16>
    %9 = vector.shape_cast %8 : vector<1x16x12xbf16> to vector<16x12xbf16>
    %c1_9 = arith.constant 1 : index
    %c0_10 = arith.constant 0 : index
    %c0_11 = arith.constant 0 : index
    %10 = vector.load %arg2[%c1_9, %c0_10, %c0_11] : memref<9x12x32xbf16, #tpu.memory_space<vmem>>, vector<1x12x32xbf16>
    %11 = vector.shape_cast %10 : vector<1x12x32xbf16> to vector<12x32xbf16>
    %cst_12 = arith.constant dense<0.000000e+00> : vector<16x32xf32>
    %12 = tpu.matmul %9, %11, %cst_12 {dimension_numbers = #tpu.dot_dimension_numbers<[1], [0], [0], [1], [0, 0, 1, 1], [], []>} : vector<16x12xbf16>, vector<12x32xbf16>, vector<16x32xf32> -> vector<16x32xf32>
    %13 = arith.addf %7, %12 : vector<16x32xf32>
    %c0_13 = arith.constant 0 : index
    %c2 = arith.constant 2 : index
    %c0_14 = arith.constant 0 : index
    %14 = vector.load %arg1[%c0_13, %c2, %c0_14] : memref<1x26x12xbf16, #tpu.memory_space<vmem>>, vector<1x16x12xbf16>
    %15 = vector.shape_cast %14 : vector<1x16x12xbf16> to vector<16x12xbf16>
    %c0_15 = arith.constant 0 : index
    %c0_16 = arith.constant 0 : index
    %16 = vector.load %arg4[%c0_15, %c0_16] : memref<16x1xbf16, #tpu.memory_space<vmem>>, vector<16x1xbf16>
    %17 = vector.broadcast %16 : vector<16x1xbf16> to vector<16x12xbf16>
    %18 = arith.mulf %15, %17 : vector<16x12xbf16>
    %c2_17 = arith.constant 2 : index
    %c0_18 = arith.constant 0 : index
    %c0_19 = arith.constant 0 : index
    %19 = vector.load %arg2[%c2_17, %c0_18, %c0_19] : memref<9x12x32xbf16, #tpu.memory_space<vmem>>, vector<1x12x32xbf16>
    %20 = vector.shape_cast %19 : vector<1x12x32xbf16> to vector<12x32xbf16>
    %cst_20 = arith.constant dense<0.000000e+00> : vector<16x32xf32>
    %21 = tpu.matmul %18, %20, %cst_20 {dimension_numbers = #tpu.dot_dimension_numbers<[1], [0], [0], [1], [0, 0, 1, 1], [], []>} : vector<16x12xbf16>, vector<12x32xbf16>, vector<16x32xf32> -> vector<16x32xf32>
    %22 = arith.addf %13, %21 : vector<16x32xf32>
    %c0_21 = arith.constant 0 : index
    %c4 = arith.constant 4 : index
    %c0_22 = arith.constant 0 : index
    %23 = vector.load %arg1[%c0_21, %c4, %c0_22] : memref<1x26x12xbf16, #tpu.memory_space<vmem>>, vector<1x16x12xbf16>
    %24 = vector.shape_cast %23 : vector<1x16x12xbf16> to vector<16x12xbf16>
    %c0_23 = arith.constant 0 : index
    %c0_24 = arith.constant 0 : index
    %25 = vector.load %arg3[%c0_23, %c0_24] : memref<16x1xbf16, #tpu.memory_space<vmem>>, vector<16x1xbf16>
    %26 = vector.broadcast %25 : vector<16x1xbf16> to vector<16x12xbf16>
    %27 = arith.mulf %24, %26 : vector<16x12xbf16>
    %c3 = arith.constant 3 : index
    %c0_25 = arith.constant 0 : index
    %c0_26 = arith.constant 0 : index
    %28 = vector.load %arg2[%c3, %c0_25, %c0_26] : memref<9x12x32xbf16, #tpu.memory_space<vmem>>, vector<1x12x32xbf16>
    %29 = vector.shape_cast %28 : vector<1x12x32xbf16> to vector<12x32xbf16>
    %cst_27 = arith.constant dense<0.000000e+00> : vector<16x32xf32>
    %30 = tpu.matmul %27, %29, %cst_27 {dimension_numbers = #tpu.dot_dimension_numbers<[1], [0], [0], [1], [0, 0, 1, 1], [], []>} : vector<16x12xbf16>, vector<12x32xbf16>, vector<16x32xf32> -> vector<16x32xf32>
    %31 = arith.addf %22, %30 : vector<16x32xf32>
    %c0_28 = arith.constant 0 : index
    %c5 = arith.constant 5 : index
    %c0_29 = arith.constant 0 : index
    %32 = vector.load %arg1[%c0_28, %c5, %c0_29] : memref<1x26x12xbf16, #tpu.memory_space<vmem>>, vector<1x16x12xbf16>
    %33 = vector.shape_cast %32 : vector<1x16x12xbf16> to vector<16x12xbf16>
    %c4_30 = arith.constant 4 : index
    %c0_31 = arith.constant 0 : index
    %c0_32 = arith.constant 0 : index
    %34 = vector.load %arg2[%c4_30, %c0_31, %c0_32] : memref<9x12x32xbf16, #tpu.memory_space<vmem>>, vector<1x12x32xbf16>
    %35 = vector.shape_cast %34 : vector<1x12x32xbf16> to vector<12x32xbf16>
    %cst_33 = arith.constant dense<0.000000e+00> : vector<16x32xf32>
    %36 = tpu.matmul %33, %35, %cst_33 {dimension_numbers = #tpu.dot_dimension_numbers<[1], [0], [0], [1], [0, 0, 1, 1], [], []>} : vector<16x12xbf16>, vector<12x32xbf16>, vector<16x32xf32> -> vector<16x32xf32>
    %37 = arith.addf %31, %36 : vector<16x32xf32>
    %c0_34 = arith.constant 0 : index
    %c6 = arith.constant 6 : index
    %c0_35 = arith.constant 0 : index
    %38 = vector.load %arg1[%c0_34, %c6, %c0_35] : memref<1x26x12xbf16, #tpu.memory_space<vmem>>, vector<1x16x12xbf16>
    %39 = vector.shape_cast %38 : vector<1x16x12xbf16> to vector<16x12xbf16>
    %c0_36 = arith.constant 0 : index
    %c0_37 = arith.constant 0 : index
    %40 = vector.load %arg4[%c0_36, %c0_37] : memref<16x1xbf16, #tpu.memory_space<vmem>>, vector<16x1xbf16>
    %41 = vector.broadcast %40 : vector<16x1xbf16> to vector<16x12xbf16>
    %42 = arith.mulf %39, %41 : vector<16x12xbf16>
    %c5_38 = arith.constant 5 : index
    %c0_39 = arith.constant 0 : index
    %c0_40 = arith.constant 0 : index
    %43 = vector.load %arg2[%c5_38, %c0_39, %c0_40] : memref<9x12x32xbf16, #tpu.memory_space<vmem>>, vector<1x12x32xbf16>
    %44 = vector.shape_cast %43 : vector<1x12x32xbf16> to vector<12x32xbf16>
    %cst_41 = arith.constant dense<0.000000e+00> : vector<16x32xf32>
    %45 = tpu.matmul %42, %44, %cst_41 {dimension_numbers = #tpu.dot_dimension_numbers<[1], [0], [0], [1], [0, 0, 1, 1], [], []>} : vector<16x12xbf16>, vector<12x32xbf16>, vector<16x32xf32> -> vector<16x32xf32>
    %46 = arith.addf %37, %45 : vector<16x32xf32>
    %c0_42 = arith.constant 0 : index
    %c8 = arith.constant 8 : index
    %c0_43 = arith.constant 0 : index
    %47 = vector.load %arg1[%c0_42, %c8, %c0_43] : memref<1x26x12xbf16, #tpu.memory_space<vmem>>, vector<1x16x12xbf16>
    %48 = vector.shape_cast %47 : vector<1x16x12xbf16> to vector<16x12xbf16>
    %c0_44 = arith.constant 0 : index
    %c0_45 = arith.constant 0 : index
    %49 = vector.load %arg3[%c0_44, %c0_45] : memref<16x1xbf16, #tpu.memory_space<vmem>>, vector<16x1xbf16>
    %50 = vector.broadcast %49 : vector<16x1xbf16> to vector<16x12xbf16>
    %51 = arith.mulf %48, %50 : vector<16x12xbf16>
    %c6_46 = arith.constant 6 : index
    %c0_47 = arith.constant 0 : index
    %c0_48 = arith.constant 0 : index
    %52 = vector.load %arg2[%c6_46, %c0_47, %c0_48] : memref<9x12x32xbf16, #tpu.memory_space<vmem>>, vector<1x12x32xbf16>
    %53 = vector.shape_cast %52 : vector<1x12x32xbf16> to vector<12x32xbf16>
    %cst_49 = arith.constant dense<0.000000e+00> : vector<16x32xf32>
    %54 = tpu.matmul %51, %53, %cst_49 {dimension_numbers = #tpu.dot_dimension_numbers<[1], [0], [0], [1], [0, 0, 1, 1], [], []>} : vector<16x12xbf16>, vector<12x32xbf16>, vector<16x32xf32> -> vector<16x32xf32>
    %55 = arith.addf %46, %54 : vector<16x32xf32>
    %c0_50 = arith.constant 0 : index
    %c9 = arith.constant 9 : index
    %c0_51 = arith.constant 0 : index
    %56 = vector.load %arg1[%c0_50, %c9, %c0_51] : memref<1x26x12xbf16, #tpu.memory_space<vmem>>, vector<1x16x12xbf16>
    %57 = vector.shape_cast %56 : vector<1x16x12xbf16> to vector<16x12xbf16>
    %c7 = arith.constant 7 : index
    %c0_52 = arith.constant 0 : index
    %c0_53 = arith.constant 0 : index
    %58 = vector.load %arg2[%c7, %c0_52, %c0_53] : memref<9x12x32xbf16, #tpu.memory_space<vmem>>, vector<1x12x32xbf16>
    %59 = vector.shape_cast %58 : vector<1x12x32xbf16> to vector<12x32xbf16>
    %cst_54 = arith.constant dense<0.000000e+00> : vector<16x32xf32>
    %60 = tpu.matmul %57, %59, %cst_54 {dimension_numbers = #tpu.dot_dimension_numbers<[1], [0], [0], [1], [0, 0, 1, 1], [], []>} : vector<16x12xbf16>, vector<12x32xbf16>, vector<16x32xf32> -> vector<16x32xf32>
    %61 = arith.addf %55, %60 : vector<16x32xf32>
    %c0_55 = arith.constant 0 : index
    %c10 = arith.constant 10 : index
    %c0_56 = arith.constant 0 : index
    %62 = vector.load %arg1[%c0_55, %c10, %c0_56] : memref<1x26x12xbf16, #tpu.memory_space<vmem>>, vector<1x16x12xbf16>
    %63 = vector.shape_cast %62 : vector<1x16x12xbf16> to vector<16x12xbf16>
    %c0_57 = arith.constant 0 : index
    %c0_58 = arith.constant 0 : index
    %64 = vector.load %arg4[%c0_57, %c0_58] : memref<16x1xbf16, #tpu.memory_space<vmem>>, vector<16x1xbf16>
    %65 = vector.broadcast %64 : vector<16x1xbf16> to vector<16x12xbf16>
    %66 = arith.mulf %63, %65 : vector<16x12xbf16>
    %c8_59 = arith.constant 8 : index
    %c0_60 = arith.constant 0 : index
    %c0_61 = arith.constant 0 : index
    %67 = vector.load %arg2[%c8_59, %c0_60, %c0_61] : memref<9x12x32xbf16, #tpu.memory_space<vmem>>, vector<1x12x32xbf16>
    %68 = vector.shape_cast %67 : vector<1x12x32xbf16> to vector<12x32xbf16>
    %cst_62 = arith.constant dense<0.000000e+00> : vector<16x32xf32>
    %69 = tpu.matmul %66, %68, %cst_62 {dimension_numbers = #tpu.dot_dimension_numbers<[1], [0], [0], [1], [0, 0, 1, 1], [], []>} : vector<16x12xbf16>, vector<12x32xbf16>, vector<16x32xf32> -> vector<16x32xf32>
    %70 = arith.addf %61, %69 : vector<16x32xf32>
    %c0_63 = arith.constant 0 : index
    %c0_64 = arith.constant 0 : index
    %71 = vector.load %arg5[%c0_63, %c0_64] : memref<1x32xf32, #tpu.memory_space<vmem>>, vector<1x32xf32>
    %72 = vector.broadcast %71 : vector<1x32xf32> to vector<16x32xf32>
    %73 = arith.addf %70, %72 : vector<16x32xf32>
    %c0_65 = arith.constant 0 : index
    %c0_66 = arith.constant 0 : index
    %c0_67 = arith.constant 0 : index
    %74 = vector.load %arg6[%c0_65, %c0_66, %c0_67] : memref<1x16x32xf32, #tpu.memory_space<vmem>>, vector<1x16x32xf32>
    %75 = vector.shape_cast %74 : vector<1x16x32xf32> to vector<16x32xf32>
    %76 = vector.shape_cast %73 : vector<16x32xf32> to vector<1x16x32xf32>
    tpu.vector_store %arg6[%c0_65, %c0_66, %c0_67], %76 {strides = array<i32>} : memref<1x16x32xf32, #tpu.memory_space<vmem>>, vector<1x16x32xf32>,
    return
  }
  func.func @transform_0(%arg0: i32) -> (i32, i32, i32) {
    %c0_i32 = arith.constant 0 : i32
    %c0_i32_0 = arith.constant 0 : i32
    %c0_i32_1 = arith.constant 0 : i32
    return %arg0, %c0_i32, %c0_i32_0 : i32, i32, i32
  }
  func.func @transform_1(%arg0: i32) -> (i32, i32, i32) {
    %c0_i32 = arith.constant 0 : i32
    %c0_i32_0 = arith.constant 0 : i32
    %c0_i32_1 = arith.constant 0 : i32
    %c0_i32_2 = arith.constant 0 : i32
    return %c0_i32, %c0_i32_0, %c0_i32_1 : i32, i32, i32
  }
  func.func @transform_2(%arg0: i32) -> (i32, i32) {
    %c0_i32 = arith.constant 0 : i32
    %c0_i32_0 = arith.constant 0 : i32
    %c0_i32_1 = arith.constant 0 : i32
    return %c0_i32, %c0_i32_0 : i32, i32
  }
  func.func @transform_3(%arg0: i32) -> (i32, i32) {
    %c0_i32 = arith.constant 0 : i32
    %c0_i32_0 = arith.constant 0 : i32
    %c0_i32_1 = arith.constant 0 : i32
    return %c0_i32, %c0_i32_0 : i32, i32
  }
  func.func @transform_4(%arg0: i32) -> (i32, i32) {
    %c0_i32 = arith.constant 0 : i32
    %c0_i32_0 = arith.constant 0 : i32
    %c0_i32_1 = arith.constant 0 : i32
    return %c0_i32, %c0_i32_0 : i32, i32
  }
  func.func @transform_5(%arg0: i32) -> (i32, i32, i32) {
    %c0_i32 = arith.constant 0 : i32
    %c0_i32_0 = arith.constant 0 : i32
    %c0_i32_1 = arith.constant 0 : i32
    return %arg0, %c0_i32, %c0_i32_0 : i32, i32, i32
  }
}

module attributes {stable_mosaic.version = 11 : i64} {
  func.func @_mm_acc_kernel(%arg0: i32, %arg1: memref<16x32xbf16, #tpu.memory_space<vmem>>, %arg2: memref<32x128xbf16, #tpu.memory_space<vmem>>, %arg3: memref<1x128xf32, #tpu.memory_space<vmem>>, %arg4: memref<16x128xf32, #tpu.memory_space<vmem>>, %arg5: memref<16x128xf32, #tpu.memory_space<vmem>>) attributes {dimension_semantics = [#tpu.dimension_semantics<parallel>], iteration_bounds = array<i64: 2>, scalar_prefetch = 0 : i64, scratch_operands = 0 : i64, tpu.core_type = #tpu.core_type<tc>, window_params = [{transform_indices = @transform_0, window_bounds = array<i64: 16, 32>}, {pipeline_mode = #tpu.pipeline_mode<synchronous>, transform_indices = @transform_1, window_bounds = array<i64: 32, 128>}, {pipeline_mode = #tpu.pipeline_mode<synchronous>, transform_indices = @transform_2, window_bounds = array<i64: 1, 128>}, {transform_indices = @transform_3, window_bounds = array<i64: 16, 128>}, {transform_indices = @transform_4, window_bounds = array<i64: 16, 128>}]} {
    %c0 = arith.constant 0 : index
    %c0_0 = arith.constant 0 : index
    %0 = vector.load %arg1[%c0, %c0_0] : memref<16x32xbf16, #tpu.memory_space<vmem>>, vector<16x32xbf16>
    %c0_1 = arith.constant 0 : index
    %c0_2 = arith.constant 0 : index
    %1 = vector.load %arg2[%c0_1, %c0_2] : memref<32x128xbf16, #tpu.memory_space<vmem>>, vector<32x128xbf16>
    %cst = arith.constant dense<0.000000e+00> : vector<16x128xf32>
    %2 = tpu.matmul %0, %1, %cst {dimension_numbers = #tpu.dot_dimension_numbers<[1], [0], [0], [1], [0, 0, 1, 1], [], []>} : vector<16x32xbf16>, vector<32x128xbf16>, vector<16x128xf32> -> vector<16x128xf32>
    %c0_3 = arith.constant 0 : index
    %c0_4 = arith.constant 0 : index
    %3 = vector.load %arg3[%c0_3, %c0_4] : memref<1x128xf32, #tpu.memory_space<vmem>>, vector<1x128xf32>
    %4 = vector.broadcast %3 : vector<1x128xf32> to vector<16x128xf32>
    %5 = arith.addf %2, %4 : vector<16x128xf32>
    %c0_5 = arith.constant 0 : index
    %c0_6 = arith.constant 0 : index
    %6 = vector.load %arg4[%c0_5, %c0_6] : memref<16x128xf32, #tpu.memory_space<vmem>>, vector<16x128xf32>
    %7 = arith.addf %5, %6 : vector<16x128xf32>
    %c0_7 = arith.constant 0 : index
    %c0_8 = arith.constant 0 : index
    %8 = vector.load %arg5[%c0_7, %c0_8] : memref<16x128xf32, #tpu.memory_space<vmem>>, vector<16x128xf32>
    tpu.vector_store %arg5[%c0_7, %c0_8], %7 {strides = array<i32>} : memref<16x128xf32, #tpu.memory_space<vmem>>, vector<16x128xf32>,
    return
  }
  func.func @transform_0(%arg0: i32) -> (i32, i32) {
    %c0_i32 = arith.constant 0 : i32
    %c0_i32_0 = arith.constant 0 : i32
    return %arg0, %c0_i32 : i32, i32
  }
  func.func @transform_1(%arg0: i32) -> (i32, i32) {
    %c0_i32 = arith.constant 0 : i32
    %c0_i32_0 = arith.constant 0 : i32
    %c0_i32_1 = arith.constant 0 : i32
    return %c0_i32, %c0_i32_0 : i32, i32
  }
  func.func @transform_2(%arg0: i32) -> (i32, i32) {
    %c0_i32 = arith.constant 0 : i32
    %c0_i32_0 = arith.constant 0 : i32
    %c0_i32_1 = arith.constant 0 : i32
    return %c0_i32, %c0_i32_0 : i32, i32
  }
  func.func @transform_3(%arg0: i32) -> (i32, i32) {
    %c0_i32 = arith.constant 0 : i32
    %c0_i32_0 = arith.constant 0 : i32
    return %arg0, %c0_i32 : i32, i32
  }
  func.func @transform_4(%arg0: i32) -> (i32, i32) {
    %c0_i32 = arith.constant 0 : i32
    %c0_i32_0 = arith.constant 0 : i32
    return %arg0, %c0_i32 : i32, i32
  }
}

module attributes {stable_mosaic.version = 11 : i64} {
  func.func @_mm_bnrelu_kernel(%arg0: i32, %arg1: memref<16x128xf32, #tpu.memory_space<vmem>>, %arg2: memref<1x128xf32, #tpu.memory_space<vmem>>, %arg3: memref<1x128xf32, #tpu.memory_space<vmem>>, %arg4: memref<128x128xbf16, #tpu.memory_space<vmem>>, %arg5: memref<1x128xf32, #tpu.memory_space<vmem>>, %arg6: memref<16x128xf32, #tpu.memory_space<vmem>>) attributes {dimension_semantics = [#tpu.dimension_semantics<parallel>], iteration_bounds = array<i64: 2>, scalar_prefetch = 0 : i64, scratch_operands = 0 : i64, tpu.core_type = #tpu.core_type<tc>, window_params = [{transform_indices = @transform_0, window_bounds = array<i64: 16, 128>}, {pipeline_mode = #tpu.pipeline_mode<synchronous>, transform_indices = @transform_1, window_bounds = array<i64: 1, 128>}, {pipeline_mode = #tpu.pipeline_mode<synchronous>, transform_indices = @transform_2, window_bounds = array<i64: 1, 128>}, {pipeline_mode = #tpu.pipeline_mode<synchronous>, transform_indices = @transform_3, window_bounds = array<i64: 128, 128>}, {pipeline_mode = #tpu.pipeline_mode<synchronous>, transform_indices = @transform_4, window_bounds = array<i64: 1, 128>}, {transform_indices = @transform_5, window_bounds = array<i64: 16, 128>}]} {
    %c0 = arith.constant 0 : index
    %c0_0 = arith.constant 0 : index
    %0 = vector.load %arg1[%c0, %c0_0] : memref<16x128xf32, #tpu.memory_space<vmem>>, vector<16x128xf32>
    %c0_1 = arith.constant 0 : index
    %c0_2 = arith.constant 0 : index
    %1 = vector.load %arg2[%c0_1, %c0_2] : memref<1x128xf32, #tpu.memory_space<vmem>>, vector<1x128xf32>
    %2 = vector.broadcast %1 : vector<1x128xf32> to vector<16x128xf32>
    %3 = arith.mulf %0, %2 : vector<16x128xf32>
    %c0_3 = arith.constant 0 : index
    %c0_4 = arith.constant 0 : index
    %4 = vector.load %arg3[%c0_3, %c0_4] : memref<1x128xf32, #tpu.memory_space<vmem>>, vector<1x128xf32>
    %5 = vector.broadcast %4 : vector<1x128xf32> to vector<16x128xf32>
    %6 = arith.addf %3, %5 : vector<16x128xf32>
    %cst = arith.constant 0.000000e+00 : f32
    %7 = vector.broadcast %cst : f32 to vector<16x128xf32>
    %8 = arith.maximumf %6, %7 : vector<16x128xf32>
    %9 = arith.truncf %8 : vector<16x128xf32> to vector<16x128xbf16>
    %c0_5 = arith.constant 0 : index
    %c0_6 = arith.constant 0 : index
    %10 = vector.load %arg4[%c0_5, %c0_6] : memref<128x128xbf16, #tpu.memory_space<vmem>>, vector<128x128xbf16>
    %cst_7 = arith.constant dense<0.000000e+00> : vector<16x128xf32>
    %11 = tpu.matmul %9, %10, %cst_7 {dimension_numbers = #tpu.dot_dimension_numbers<[1], [0], [0], [1], [0, 0, 1, 1], [], []>} : vector<16x128xbf16>, vector<128x128xbf16>, vector<16x128xf32> -> vector<16x128xf32>
    %c0_8 = arith.constant 0 : index
    %c0_9 = arith.constant 0 : index
    %12 = vector.load %arg5[%c0_8, %c0_9] : memref<1x128xf32, #tpu.memory_space<vmem>>, vector<1x128xf32>
    %13 = vector.broadcast %12 : vector<1x128xf32> to vector<16x128xf32>
    %14 = arith.addf %11, %13 : vector<16x128xf32>
    %c0_10 = arith.constant 0 : index
    %c0_11 = arith.constant 0 : index
    %15 = vector.load %arg6[%c0_10, %c0_11] : memref<16x128xf32, #tpu.memory_space<vmem>>, vector<16x128xf32>
    tpu.vector_store %arg6[%c0_10, %c0_11], %14 {strides = array<i32>} : memref<16x128xf32, #tpu.memory_space<vmem>>, vector<16x128xf32>,
    return
  }
  func.func @transform_0(%arg0: i32) -> (i32, i32) {
    %c0_i32 = arith.constant 0 : i32
    %c0_i32_0 = arith.constant 0 : i32
    return %arg0, %c0_i32 : i32, i32
  }
  func.func @transform_1(%arg0: i32) -> (i32, i32) {
    %c0_i32 = arith.constant 0 : i32
    %c0_i32_0 = arith.constant 0 : i32
    %c0_i32_1 = arith.constant 0 : i32
    return %c0_i32, %c0_i32_0 : i32, i32
  }
  func.func @transform_2(%arg0: i32) -> (i32, i32) {
    %c0_i32 = arith.constant 0 : i32
    %c0_i32_0 = arith.constant 0 : i32
    %c0_i32_1 = arith.constant 0 : i32
    return %c0_i32, %c0_i32_0 : i32, i32
  }
  func.func @transform_3(%arg0: i32) -> (i32, i32) {
    %c0_i32 = arith.constant 0 : i32
    %c0_i32_0 = arith.constant 0 : i32
    %c0_i32_1 = arith.constant 0 : i32
    return %c0_i32, %c0_i32_0 : i32, i32
  }
  func.func @transform_4(%arg0: i32) -> (i32, i32) {
    %c0_i32 = arith.constant 0 : i32
    %c0_i32_0 = arith.constant 0 : i32
    %c0_i32_1 = arith.constant 0 : i32
    return %c0_i32, %c0_i32_0 : i32, i32
  }
  func.func @transform_5(%arg0: i32) -> (i32, i32) {
    %c0_i32 = arith.constant 0 : i32
    %c0_i32_0 = arith.constant 0 : i32
    return %arg0, %c0_i32 : i32, i32
  }
}

module attributes {stable_mosaic.version = 11 : i64} {
  func.func @_coupling_tail_kernel(%arg0: i32, %arg1: memref<8x128xf32, #tpu.memory_space<vmem>>, %arg2: memref<8x128xf32, #tpu.memory_space<vmem>>, %arg3: memref<8x128xf32, #tpu.memory_space<vmem>>, %arg4: memref<1x128xf32, #tpu.memory_space<vmem>>, %arg5: memref<1x128xf32, #tpu.memory_space<vmem>>, %arg6: memref<8x128xf32, #tpu.memory_space<vmem>>, %arg7: memref<8x128xf32, #tpu.memory_space<vmem>>) attributes {dimension_semantics = [#tpu.dimension_semantics<parallel>], iteration_bounds = array<i64: 1>, scalar_prefetch = 0 : i64, scratch_operands = 0 : i64, tpu.core_type = #tpu.core_type<tc>, window_params = [{transform_indices = @transform_0, window_bounds = array<i64: 8, 128>}, {transform_indices = @transform_1, window_bounds = array<i64: 8, 128>}, {transform_indices = @transform_2, window_bounds = array<i64: 8, 128>}, {pipeline_mode = #tpu.pipeline_mode<synchronous>, transform_indices = @transform_3, window_bounds = array<i64: 1, 128>}, {pipeline_mode = #tpu.pipeline_mode<synchronous>, transform_indices = @transform_4, window_bounds = array<i64: 1, 128>}, {transform_indices = @transform_5, window_bounds = array<i64: 8, 128>}, {transform_indices = @transform_6, window_bounds = array<i64: 8, 128>}]} {
    %c0 = arith.constant 0 : index
    %c0_0 = arith.constant 0 : index
    %0 = vector.load %arg4[%c0, %c0_0] : memref<1x128xf32, #tpu.memory_space<vmem>>, vector<1x128xf32>
    %c0_1 = arith.constant 0 : index
    %c0_2 = arith.constant 0 : index
    %1 = vector.load %arg2[%c0_1, %c0_2] : memref<8x128xf32, #tpu.memory_space<vmem>>, vector<8x128xf32>
    %2 = math.tanh %1 : vector<8x128xf32>
    %3 = vector.broadcast %0 : vector<1x128xf32> to vector<8x128xf32>
    %4 = arith.mulf %3, %2 : vector<8x128xf32>
    %c0_3 = arith.constant 0 : index
    %c0_4 = arith.constant 0 : index
    %5 = vector.load %arg3[%c0_3, %c0_4] : memref<8x128xf32, #tpu.memory_space<vmem>>, vector<8x128xf32>
    %c0_5 = arith.constant 0 : index
    %c0_6 = arith.constant 0 : index
    %6 = vector.load %arg5[%c0_5, %c0_6] : memref<1x128xf32, #tpu.memory_space<vmem>>, vector<1x128xf32>
    %7 = vector.broadcast %6 : vector<1x128xf32> to vector<8x128xf32>
    %8 = arith.mulf %5, %7 : vector<8x128xf32>
    %c0_7 = arith.constant 0 : index
    %c0_8 = arith.constant 0 : index
    %9 = vector.load %arg1[%c0_7, %c0_8] : memref<8x128xf32, #tpu.memory_space<vmem>>, vector<8x128xf32>
    %10 = arith.addf %9, %8 : vector<8x128xf32>
    %11 = math.exp %4 : vector<8x128xf32>
    %12 = arith.mulf %10, %11 : vector<8x128xf32>
    %c0_9 = arith.constant 0 : index
    %c0_10 = arith.constant 0 : index
    %13 = vector.load %arg6[%c0_9, %c0_10] : memref<8x128xf32, #tpu.memory_space<vmem>>, vector<8x128xf32>
    tpu.vector_store %arg6[%c0_9, %c0_10], %12 {strides = array<i32>} : memref<8x128xf32, #tpu.memory_space<vmem>>, vector<8x128xf32>,
    %c0_11 = arith.constant 0 : index
    %c0_12 = arith.constant 0 : index
    %14 = vector.load %arg7[%c0_11, %c0_12] : memref<8x128xf32, #tpu.memory_space<vmem>>, vector<8x128xf32>
    tpu.vector_store %arg7[%c0_11, %c0_12], %4 {strides = array<i32>} : memref<8x128xf32, #tpu.memory_space<vmem>>, vector<8x128xf32>,
    return
  }
  func.func @transform_0(%arg0: i32) -> (i32, i32) {
    %c0_i32 = arith.constant 0 : i32
    %c0_i32_0 = arith.constant 0 : i32
    return %arg0, %c0_i32 : i32, i32
  }
  func.func @transform_1(%arg0: i32) -> (i32, i32) {
    %c0_i32 = arith.constant 0 : i32
    %c0_i32_0 = arith.constant 0 : i32
    return %arg0, %c0_i32 : i32, i32
  }
  func.func @transform_2(%arg0: i32) -> (i32, i32) {
    %c0_i32 = arith.constant 0 : i32
    %c0_i32_0 = arith.constant 0 : i32
    return %arg0, %c0_i32 : i32, i32
  }
  func.func @transform_3(%arg0: i32) -> (i32, i32) {
    %c0_i32 = arith.constant 0 : i32
    %c0_i32_0 = arith.constant 0 : i32
    %c0_i32_1 = arith.constant 0 : i32
    return %c0_i32, %c0_i32_0 : i32, i32
  }
  func.func @transform_4(%arg0: i32) -> (i32, i32) {
    %c0_i32 = arith.constant 0 : i32
    %c0_i32_0 = arith.constant 0 : i32
    %c0_i32_1 = arith.constant 0 : i32
    return %c0_i32, %c0_i32_0 : i32, i32
  }
  func.func @transform_5(%arg0: i32) -> (i32, i32) {
    %c0_i32 = arith.constant 0 : i32
    %c0_i32_0 = arith.constant 0 : i32
    return %arg0, %c0_i32 : i32, i32
  }
  func.func @transform_6(%arg0: i32) -> (i32, i32) {
    %c0_i32 = arith.constant 0 : i32
    %c0_i32_0 = arith.constant 0 : i32
    return %arg0, %c0_i32 : i32, i32
  }
}

</mosaic_0001>

<bundles_post_ra>
// kernel: realnvp_forward.101
= control target key start
LH: loop header
LB: loop body
LE: loop exit
PB: predicated region body
PF: predicated region fallthrough
CT: control target
= control target key end

     0   :  { %v66_v30 = vlaneseq  ;;  %v107_v55 = vmov 0.0   ;;  %s149_s0 = inlined_call_operand.vmem [shape: f32[8,256], index: 0, kind: input, shape index: {}]   ;;  %s150_s1 = inlined_call_operand.vmem [shape: f32[8,256], index: 1, kind: input, shape index: {}]   ;;  %s151_s2 = inlined_call_operand.vmem [shape: f32[8,256], index: 2, kind: output, shape index: {0}]   ;;  %s152_s3 = inlined_call_operand.vmem [shape: f32[8,128], index: 3, kind: output, shape index: {1}]  }
   0x1   :  { %v13_v0 = vld [vmem:[%s149_s0] sm:$0xff]  ;;  %v14_v1 = vld [vmem:[%s149_s0 + $0x8] sm:$0xff] }
   0x2   :  { %v15_v2 = vmul.f32 0.5, %v13_v0  ;;  %v16_v3 = vmul.f32 0.5, %v14_v1  ;;  %v21_v6 = vld [vmem:[%s150_s1] sm:$0xff]  ;;  %v22_v7 = vld [vmem:[%s150_s1 + $0x8] sm:$0xff]  ;;  %v67_v34 = vand.u32 127, %v66_v30 }
   0x4   :  { %v17_v4 = vadd.f32 0.5, %v15_v2  ;;  %v18_v5 = vadd.f32 0.5, %v16_v3  ;;  %v68_v42 = vadd.s32 128, %v67_v34 }
   0x6   :  { %v19_v8 = vmul.f32 255.0, %v17_v4  ;;  %v20_v9 = vmul.f32 255.0, %v18_v5  ;;  %vm70_vm2 = vcmp.lt.s32.totalorder %v68_v42, 192 }
   0x7   :  { %v95_v56 = vsel %vm70_vm2, 1.0, %v107_v55 }
   0x8   :  { %v23_v10 = vadd.f32 %v21_v6, %v19_v8  ;;  %v24_v11 = vadd.f32 %v22_v7, %v20_v9 }
   0xa   :  { %v26_v12 = vmul.f32 0.00390625, %v23_v10  ;;  %v27_v13 = vmul.f32 0.00390625, %v24_v11 }
   0xc   :  { %v28_v14 = vmul.f32 2.0, %v26_v12  ;;  %v29_v15 = vmul.f32 2.0, %v27_v13 }
   0xe   :  { %v93_v16 = vadd.f32 -1.0, %v28_v14  ;;  %v94_v17 = vadd.f32 -1.0, %v29_v15 }
  0x10   :  { %v32_v18 = vmul.f32 0.9, %v93_v16  ;;  %v33_v19 = vmul.f32 0.9, %v94_v17 }
  0x12   :  { %v34_v20 = vadd.f32 1.0, %v32_v18  ;;  %v35_v21 = vadd.f32 1.0, %v33_v19 }
  0x14   :  { %v36_v22 = vmul.f32 0.5, %v34_v20  ;;  %v37_v23 = vmul.f32 0.5, %v35_v21 }
  0x16   :  { %v42_v24 = vsub.f32 0.0, %v36_v22  ;;  %v43_v25 = vsub.f32 0.0, %v37_v23  ;;  %99 = vlog2.f32 %v36_v22 }
  0x17   :  { %101 = vlog2.f32 %v37_v23 }
  0x18   :  { %v44_v26 = vadd.f32 1.0, %v42_v24  ;;  %v53_v27 = vadd.f32 1.0, %v43_v25  ;;  %v47_v28 = vmul.f32 -0.5, %v42_v24  ;;  %v56_v29 = vmul.f32 -0.5, %v43_v25 }
  0x19   :  { %v50_v32 = vand.u32 2147483647, %v42_v24  ;;  %v59_v36 = vand.u32 2147483647, %v43_v25 }
  0x1a   :  { %103 = vlog2.f32 %v44_v26  ;;  %v48_v31 = vadd.f32 1.0, %v47_v28  ;;  %v57_v33 = vadd.f32 1.0, %v56_v29 }
  0x1b   :  { %105 = vlog2.f32 %v53_v27  ;;  %vm51_vm0 = vcmp.lt.f32.partialorder %v50_v32, 0.0004427343  ;;  %vm60_vm1 = vcmp.lt.f32.partialorder %v59_v36, 0.0004427343 }
  0x1c   :  { %v49_v38 = vmul.f32 %v48_v31, %v42_v24  ;;  %v58_v41 = vmul.f32 %v57_v33, %v43_v25 }
  0x20   :  { %v100_v35 = vpop.eup %99 }
  0x21   :  { %v102_v37 = vpop.eup %101  ;;  %v39_v40 = vmul.f32 0.6931472, %v100_v35 }
  0x22   :  { %v41_v45 = vmul.f32 0.6931472, %v102_v37 }
  0x24   :  { %v104_v39 = vpop.eup %103 }
  0x25   :  { %v106_v43 = vpop.eup %105  ;;  %v46_v44 = vmul.f32 0.6931472, %v104_v39 }
  0x26   :  { %v55_v46 = vmul.f32 0.6931472, %v106_v43 }
  0x27   :  { %v52_v47 = vsel %vm51_vm0, %v49_v38, %v46_v44 }
  0x28   :  { %v62_v48 = vsub.f32 %v39_v40, %v52_v47  ;;  %v75_v49 = vadd.f32 %v52_v47, %v39_v40  ;;  %v61_v50 = vsel %vm60_vm1, %v58_v41, %v55_v46 }
  0x29   :  { %v63_v51 = vsub.f32 %v41_v45, %v61_v50  ;;  %v76_v52 = vadd.f32 %v61_v50, %v41_v45 }
  0x2a   :  { %64 = vst [vmem:[%s151_s2] sm:$0xff] %v62_v48  ;;  %v77_v53 = vsub.f32 0.0, %v75_v49 }
  0x2b   :  { %65 = vst [vmem:[%s151_s2 + $0x8] sm:$0xff] %v63_v51  ;;  %v78_v54 = vsub.f32 0.0, %v76_v52 }
  0x2c   :  { %v96_v58 = vadd.f32 -0.105360515, %v77_v53 }
  0x2d   :  { %v97_v57 = vadd.f32 -0.105360515, %v78_v54 }
  0x2f   :  { %v82_v59 = vmul.f32 %v97_v57, %v95_v56 }
  0x31   :  { %v83_v60 = vadd.f32 %v96_v58, %v82_v59 }
  0x33   :  { %84 = vst [vmem:[%s152_s3] sm:$0xff] %v83_v60 }

// kernel: realnvp_forward.103
= control target key start
LH: loop header
LB: loop body
LE: loop exit
PB: predicated region body
PF: predicated region fallthrough
CT: control target
= control target key end

     0   :  { %s439_s12 = smov 0   ;;  %s462_s0 = inlined_call_operand.vmem [shape: bf16[128,16], index: 0, kind: input, shape index: {}]   ;;  %s463_s1 = inlined_call_operand.vmem [shape: bf16[16,128], index: 1, kind: input, shape index: {}]   ;;  %s464_s2 = inlined_call_operand.vmem [shape: f32[1,128], index: 2, kind: input, shape index: {}]   ;;  %s465_s3 = inlined_call_operand.vmem [shape: f32[128,128], index: 3, kind: output, shape index: {}]  }
   0x1 LB: > { %s360_s13 = sadd.s32 4294967295, %s417_s12   ;;  %p364_p0 = scmp.ge.s32.totalorder %s417_s12, 1  ;;  %s417_s12 = sphi %s439_s12, %s13_s12  }
   0x2   : > { %p138_p1 = scmp.lt.s32.totalorder %s417_s12, 3 }
   0x4   : > { %p139_p2 = pnand %p364_p0, %p138_p1 }
   0x5   : > { %v406_v0 = vld [vmem:[%s463_s1] sm:$0xff] (!%p139_p2)   ;;  %s365_s16 = sshll.u32 (!%p139_p2), %s360_s13, 3  ;;  %vm218_vm0 = vcmask (!%p139_p2), 130048  }
   0x6   : > { %142 = sbr.rel (%p139_p2) target bundleno = 236 (0xec), region = 32  ;;  %p163_p3 = scmp.lt.s32.totalorder (!%p139_p2), %s365_s16, 15  ;;  %386 = vmatprep.subr.bf16.mxu0 (!%p139_p2), %v406_v0  ;;  %396 = vmatprep.subr.bf16.mxu1 (!%p139_p2), %v406_v0  ;;  %v369_v5 = vld [vmem:[%s464_s2] ss:$0 sm:$0xff] (!%p139_p2) }
   0x7   : > { %387 = vmatpush3.bf16.msra.mxu0 (!%p139_p2), %v406_v0  ;;  %397 = vmatpush3.bf16.msra.mxu1 (!%p139_p2), %v406_v0 }
   0xd   : > { %s467_s16 = smov (!%p163_p3, %s365_s16), 15 }
   0xe   : > { %s366_s17 = sshll.u32 %s467_s16, 2  ;;  %s368_s21 = sshll.u32 %s467_s16, 3 }
   0xf   : > { %s166_s20 = scalar_lea.vmem %s462_s0, %s366_s17  ;;  %s172_s26 = scalar_lea.vmem %s465_s3, %s368_s21 }
  0x10   : > { %v407_v1 = vld [vmem:[%s166_s20] sm:$0xff]   ;;  %v408_v2 = vld [vmem:[%s166_s20 + $0x10] sm:$0xff]   ;;  %v409_v3 = vld [vmem:[%s166_s20 + $0x8] sm:$0xff]  }
  0x11   : > { %388 = vmatprep.mubr.msk.bf16.mxu0 %vm218_vm0, %v407_v1  ;;  %392 = vmatprep.mubr.msk.bf16.mxu1 %vm218_vm0, %v408_v2  ;;  %v410_v4 = vld [vmem:[%s166_s20 + $0x18] sm:$0xff]  }
  0x12   : > { %389 = vmatmul.mubr.msk.bf16.vlgmr.msra.gmra.mrb[0].mxu0 %vm218_vm0, %v409_v3  ;;  %393 = vmatmul.mubr.msk.bf16.vlgmr.msra.gmra.mrb[0].mxu1 %vm218_vm0, %v410_v4 }
  0xe5   : > { %v390_v6 = vpop.f32.mrb[0].mxu0  ;;  %v394_v8 = vpop.f32.mrb[0].mxu1 }
  0xe6   : > { %v274_v7 = vadd.f32 %v390_v6, %v369_v5  ;;  %v265_v9 = vpop.f32.mrb[1].mxu0  ;;  %v290_v10 = vadd.f32 %v394_v8, %v369_v5  ;;  %v281_v12 = vpop.f32.mrb[1].mxu1 }
  0xe7   : > { %v266_v11 = vadd.f32 %v369_v5, %v265_v9  ;;  %v391_v13 = vpop.f32.mrb[2].mxu0  ;;  %v282_v14 = vadd.f32 %v369_v5, %v281_v12  ;;  %v395_v16 = vpop.f32.mrb[2].mxu1 }
  0xe8   : > { %298 = vst [vmem:[%s172_s26 + $0x10] sm:$0xff] %v274_v7  ;;  %v277_v15 = vadd.f32 %v391_v13, %v369_v5  ;;  %v268_v17 = vpop.f32.mrb[3].mxu0  ;;  %302 = vst [vmem:[%s172_s26 + $0x30] sm:$0xff] %v290_v10  ;;  %v293_v18 = vadd.f32 %v395_v16, %v369_v5  ;;  %v284_v20 = vpop.f32.mrb[3].mxu1 }
  0xe9   : > { %296 = vst [vmem:[%s172_s26] sm:$0xff] %v266_v11  ;;  %v269_v19 = vadd.f32 %v369_v5, %v268_v17  ;;  %300 = vst [vmem:[%s172_s26 + $0x20] sm:$0xff] %v282_v14  ;;  %v285_v21 = vadd.f32 %v369_v5, %v284_v20 }
  0xea   : > { %299 = vst [vmem:[%s172_s26 + $0x18] sm:$0xff] %v277_v15  ;;  %303 = vst [vmem:[%s172_s26 + $0x38] sm:$0xff] %v293_v18 }
  0xeb   : > { %297 = vst [vmem:[%s172_s26 + $0x8] sm:$0xff] %v269_v19  ;;  %301 = vst [vmem:[%s172_s26 + $0x28] sm:$0xff] %v285_v21 }
  0xec PF: > { %s13_s12 = sadd.s32 1, %s417_s12  }
  0xed   : > { %p10_p4 = scmp.ge.s32.totalorder %s13_s12, 4  }
  0xef   :  { %12 = sbr.rel (!%p10_p4) target bundleno = 1 (0x1), region = 62 }

// kernel: realnvp_forward.106
= control target key start
LH: loop header
LB: loop body
LE: loop exit
PB: predicated region body
PF: predicated region fallthrough
CT: control target
= control target key end

     0   :  { %s523_s15 = smov 0   ;;  %s559_s0 = inlined_call_operand.vmem [shape: bf16[128,16], index: 0, kind: input, shape index: {}]   ;;  %s560_s1 = inlined_call_operand.vmem [shape: bf16[16,128], index: 1, kind: input, shape index: {}]   ;;  %s561_s2 = inlined_call_operand.vmem [shape: f32[1,128], index: 2, kind: input, shape index: {}]   ;;  %s562_s3 = inlined_call_operand.vmem [shape: f32[128,128], index: 3, kind: input, shape index: {}, may-alias: {3,4}]   ;;  %s563_s4 = inlined_call_operand.vmem [shape: f32[128,128], index: 4, kind: output, shape index: {}, may-alias: {3,4}]  }
   0x1 LB: > { %s437_s16 = sadd.s32 4294967295, %s496_s15   ;;  %p441_p0 = scmp.ge.s32.totalorder %s496_s15, 1  ;;  %s496_s15 = sphi %s523_s15, %s14_s15  }
   0x2   : > { %p174_p1 = scmp.lt.s32.totalorder %s496_s15, 3 }
   0x4   : > { %p175_p2 = pnand %p441_p0, %p174_p1 }
   0x5   : > { %v485_v0 = vld [vmem:[%s560_s1] sm:$0xff] (!%p175_p2)   ;;  %s442_s19 = sshll.u32 (!%p175_p2), %s437_s16, 3  ;;  %vm267_vm0 = vcmask (!%p175_p2), 130048  }
   0x6   : > { %178 = sbr.rel (%p175_p2) target bundleno = 238 (0xee), region = 36  ;;  %p206_p3 = scmp.lt.s32.totalorder (!%p175_p2), %s442_s19, 15  ;;  %465 = vmatprep.subr.bf16.mxu0 (!%p175_p2), %v485_v0  ;;  %475 = vmatprep.subr.bf16.mxu1 (!%p175_p2), %v485_v0  ;;  %v448_v5 = vld [vmem:[%s561_s2] ss:$0 sm:$0xff] (!%p175_p2) }
   0x7   : > { %466 = vmatpush3.bf16.msra.mxu0 (!%p175_p2), %v485_v0  ;;  %476 = vmatpush3.bf16.msra.mxu1 (!%p175_p2), %v485_v0 }
   0xd   : > { %s565_s19 = smov (!%p206_p3, %s442_s19), 15 }
   0xe   : > { %s443_s20 = sshll.u32 %s565_s19, 2  ;;  %s445_s24 = sshll.u32 %s565_s19, 3 }
   0xf   : > { %s209_s23 = scalar_lea.vmem %s559_s0, %s443_s20  ;;  %s215_s27 = scalar_lea.vmem %s562_s3, %s445_s24 }
  0x10   : > { %v486_v1 = vld [vmem:[%s209_s23] sm:$0xff]   ;;  %v487_v2 = vld [vmem:[%s209_s23 + $0x10] sm:$0xff]   ;;  %v488_v3 = vld [vmem:[%s209_s23 + $0x8] sm:$0xff]   ;;  %s546_s6 = scalar_lea.vmem %s563_s4, %s445_s24 }
  0x11   : > { %467 = vmatprep.mubr.msk.bf16.mxu0 %vm267_vm0, %v486_v1  ;;  %471 = vmatprep.mubr.msk.bf16.mxu1 %vm267_vm0, %v487_v2  ;;  %v489_v4 = vld [vmem:[%s209_s23 + $0x18] sm:$0xff]   ;;  %v347_v7 = vld [vmem:[%s215_s27 + $0x10] sm:$0xff]  ;;  %v345_v12 = vld [vmem:[%s215_s27] sm:$0xff] }
  0x12   : > { %468 = vmatmul.mubr.msk.bf16.vlgmr.msra.gmra.mrb[0].mxu0 %vm267_vm0, %v488_v3  ;;  %472 = vmatmul.mubr.msk.bf16.vlgmr.msra.gmra.mrb[0].mxu1 %vm267_vm0, %v489_v4  ;;  %v351_v8 = vld [vmem:[%s215_s27 + $0x30] sm:$0xff]  ;;  %v349_v13 = vld [vmem:[%s215_s27 + $0x20] sm:$0xff]  ;;  %v348_v14 = vld [vmem:[%s215_s27 + $0x18] sm:$0xff] }
  0x13   : > { %v352_v19 = vld [vmem:[%s215_s27 + $0x38] sm:$0xff]  ;;  %v346_v20 = vld [vmem:[%s215_s27 + $0x8] sm:$0xff] }
  0x14   : > { %v350_v21 = vld [vmem:[%s215_s27 + $0x28] sm:$0xff] }
  0xe5   : > { %v469_v6 = vpop.f32.mrb[0].mxu0  ;;  %v473_v10 = vpop.f32.mrb[0].mxu1 }
  0xe6   : > { %v323_v9 = vadd.f32 %v469_v6, %v448_v5  ;;  %v314_v11 = vpop.f32.mrb[1].mxu0  ;;  %v339_v15 = vadd.f32 %v473_v10, %v448_v5  ;;  %v330_v17 = vpop.f32.mrb[1].mxu1 }
  0xe7   : > { %v315_v16 = vadd.f32 %v448_v5, %v314_v11  ;;  %v470_v18 = vpop.f32.mrb[2].mxu0  ;;  %v331_v23 = vadd.f32 %v448_v5, %v330_v17  ;;  %v474_v25 = vpop.f32.mrb[2].mxu1 }
  0xe8   : > { %v355_v22 = vadd.f32 %v347_v7, %v323_v9  ;;  %v326_v24 = vadd.f32 %v470_v18, %v448_v5  ;;  %v317_v26 = vpop.f32.mrb[3].mxu0  ;;  %v359_v27 = vadd.f32 %v351_v8, %v339_v15  ;;  %v342_v29 = vadd.f32 %v474_v25, %v448_v5  ;;  %v333_v31 = vpop.f32.mrb[3].mxu1 }
  0xe9   : > { %v353_v28 = vadd.f32 %v345_v12, %v315_v16  ;;  %v318_v30 = vadd.f32 %v448_v5, %v317_v26  ;;  %v357_v32 = vadd.f32 %v349_v13, %v331_v23  ;;  %v334_v34 = vadd.f32 %v448_v5, %v333_v31 }
  0xea   : > { %v356_v33 = vadd.f32 %v348_v14, %v326_v24  ;;  %363 = vst [vmem:[%s546_s6 + $0x10] sm:$0xff] %v355_v22  ;;  %v360_v35 = vadd.f32 %v352_v19, %v342_v29  ;;  %367 = vst [vmem:[%s546_s6 + $0x30] sm:$0xff] %v359_v27 }
  0xeb   : > { %v354_v36 = vadd.f32 %v346_v20, %v318_v30  ;;  %361 = vst [vmem:[%s546_s6] sm:$0xff] %v353_v28  ;;  %v358_v37 = vadd.f32 %v350_v21, %v334_v34  ;;  %365 = vst [vmem:[%s546_s6 + $0x20] sm:$0xff] %v357_v32 }
  0xec   : > { %364 = vst [vmem:[%s546_s6 + $0x18] sm:$0xff] %v356_v33  ;;  %368 = vst [vmem:[%s546_s6 + $0x38] sm:$0xff] %v360_v35 }
  0xed   : > { %362 = vst [vmem:[%s546_s6 + $0x8] sm:$0xff] %v354_v36  ;;  %366 = vst [vmem:[%s546_s6 + $0x28] sm:$0xff] %v358_v37 }
  0xee PF: > { %s14_s15 = sadd.s32 1, %s496_s15  }
  0xef   : > { %p11_p4 = scmp.ge.s32.totalorder %s14_s15, 4  }
  0xf1   :  { %13 = sbr.rel (!%p11_p4) target bundleno = 1 (0x1), region = 69 }

// kernel: realnvp_forward.102
= control target key start
LH: loop header
LB: loop body
LE: loop exit
PB: predicated region body
PF: predicated region fallthrough
CT: control target
= control target key end

     0   :  { %s2154_s18 = smov 0   ;;  %s2673_s0 = inlined_call_operand.vmem [shape: bf16[2,82,6], index: 0, kind: input, shape index: {}]   ;;  %s2674_s1 = inlined_call_operand.vmem [shape: bf16[9,6,16], index: 1, kind: input, shape index: {}]   ;;  %s2675_s2 = inlined_call_operand.vmem [shape: bf16[64,1], index: 2, kind: input, shape index: {}]   ;;  %s2676_s3 = inlined_call_operand.vmem [shape: bf16[64,1], index: 3, kind: input, shape index: {}]   ;;  %s2677_s4 = inlined_call_operand.vmem [shape: f32[1,16], index: 4, kind: input, shape index: {}]   ;;  %s2678_s5 = inlined_call_operand.vmem [shape: f32[2,64,16], index: 5, kind: output, shape index: {}]  }
   0x1 LB: > { %s1777_s19 = sadd.s32 4294967295, %s2120_s18   ;;  %p1781_p0 = scmp.ge.s32.totalorder %s2120_s18, 1  ;;  %s2120_s18 = sphi %s2154_s18, %s15_s18  }
   0x2   : > { %p187_p1 = scmp.lt.s32.totalorder %s2120_s18, 3 }
   0x4   : > { %p188_p2 = pnand %p1781_p0, %p187_p1 }
   0x6   : > { %191 = sbr.rel (%p188_p2) target bundleno = 444 (0x1bc), region = 40 }
   0xd   : > { %v603_v0 = vld [vmem:[%s2676_s3 + $0x8] sm:$0xf]  ;;  %v601_v1 = vld [vmem:[%s2676_s3] sm:$0xf]  ;;  %v2122_v2 = vmov 0   ;;  %p215_p3 = scmp.lt.s32.totalorder %s1777_s19, 1 }
   0xe   : > { %2098 = vset.pattern.permute.xlu1 %v2122_v2  ;;  %2097 = vset.pattern.permute.xlu0 %v2122_v2  ;;  %v604_v3 = vld [vmem:[%s2676_s3 + $0xc] sm:$0xf]  ;;  %v602_v4 = vld [vmem:[%s2676_s3 + $0x4] sm:$0xf]  ;;  %v606_v5 = vld [vmem:[%s2676_s3 + $0x14] sm:$0xf] }
   0xf   : > { %635 = vperm.xlu1 %2098, %v603_v0   ;;  %611 = vperm.xlu0 %2097, %v601_v1   ;;  %s2708_s19 = smov (!%p215_p3, %s1777_s19), 1  ;;  %v605_v6 = vld [vmem:[%s2676_s3 + $0x10] sm:$0xf]  ;;  %v1785_v7 = vld [vmem:[%s2674_s1 + $0x4] sm:$0x7]  ;;  %vm431_vm0 = vcmask 1042432  }
  0x10   : > { %s2086_s7 = smul.u32 44, %s2708_s19  ;;  %v2189_v8 = vld [vmem:[%s2674_s1 + $0x10] sm:$0x7]  ;;  %v433_v9 = vsel %vm431_vm0, %v1785_v7, 0  ;;  %v608_v11 = vld [vmem:[%s2676_s3 + $0x1c] sm:$0xf]  ;;  %2076 = vmatprep.subr.msk.bf16.mxu1 %vm431_vm0, %v1785_v7 }
  0x11   : > { %v2199_v10 = vsel %vm431_vm0, %v2189_v8, 0  ;;  %v607_v12 = vld [vmem:[%s2676_s3 + $0x18] sm:$0xf]  ;;  %2080 = vmatprep.subr.msk.bf16.mxu0 %vm431_vm0, %v2189_v8  ;;  %1921 = vmatpush3.bf16.msra.mxu1 %v433_v9  ;;  %v235_v16 = vld [vmem:[%s2675_s2 + $0x4] sm:$0xf]  ;;  %vm418_vm2 = vcmask 48128  }
  0x12   : > { %s2194_s14 = scalar_lea.vmem %s2673_s0, %s2086_s7  ;;  %2685 = vst [vmem:[#allocation2_spill] sm:$0xff] %v2199_v10  ;;  %1961 = vmatpush3.bf16.msra.mxu0 %v2199_v10  ;;  %v234_v17 = vld [vmem:[%s2675_s2] sm:$0xf]  ;;  %v237_v28 = vld [vmem:[%s2675_s2 + $0xc] sm:$0xf]  ;;  %vm713_vm3 = vcmask 1040384  }
  0x13   : > { %647 = vperm.xlu1 %2098, %v604_v3   ;;  %623 = vperm.xlu0 %2097, %v602_v4   ;;  %v2211_v13 = vld [vmem:[%s2194_s14 + $0xc] sm:$0xf]  ;;  %v2214_v14 = vld [vmem:[%s2194_s14 + $0x10] sm:$0xf]  ;;  %v2218_v15 = vld [vmem:[%s2194_s14 + $0x8] sm:$0xf] }
  0x14   : > { %v2227_v18 = vld [vmem:[%s2194_s14 + $0xc] sm:$0xf]  ;;  %v1787_v19 = vcombine.low %v2218_v15, %v2211_v13  ;;  %v2232_v20 = vld [vmem:[%s2194_s14 + $0x4] sm:$0xf]  ;;  %v2235_v21 = vld [vmem:[%s2194_s14 + $0x10] sm:$0xf] }
  0x15   : > { %v2238_v22 = vld [vmem:[%s2194_s14 + $0x14] sm:$0xf]  ;;  %v1824_v23 = vcombine.low %v2227_v18, %v2214_v14  ;;  %v2246_v25 = vld [vmem:[%s2194_s14 + $0x18] sm:$0xf]  ;;  %v2254_v29 = vld [vmem:[%s2194_s14 + $0x8] sm:$0xf] }
  0x16   : > { %v2243_v24 = vld [vmem:[%s2194_s14 + $0x14] sm:$0xf]  ;;  %v390_v26 = vshll.u32 %v1787_v19, 16  ;;  %v1788_v27 = vcombine.low %v2235_v21, %v2238_v22  ;;  %v347_v30 = vld [vmem:[%s2194_s14] sm:$0xf]  ;;  %v394_v35 = vshrl.u32 %v1787_v19, 16 }
  0x17   : > { %671 = vperm.xlu1 %2098, %v606_v5   ;;  %659 = vperm.xlu0 %2097, %v605_v6   ;;  %v2259_v31 = vcombine.low %v2243_v24, %v2246_v25  ;;  %v236_v32 = vld [vmem:[%s2675_s2 + $0x8] sm:$0xf]  ;;  %v1786_v33 = vcombine.low %v347_v30, %v2232_v20  ;;  %vm381_vm1 = vsmask.f32 7424  ;;  %v999_v36 = vld [vmem:[%s2194_s14 + $0x4] sm:$0xf] }
  0x18   : > { %v392_v34 = vrot.slane %v390_v26, 1  ;;  %v1041_v37 = vshll.u32 %v1824_v23, 16  ;;  %v398_v38 = vshll.u32 %v1788_v27, 16  ;;  %v1823_v42 = vcombine.low %v999_v36, %v2254_v29  ;;  %v239_v44 = vld [vmem:[%s2675_s2 + $0x14] sm:$0xf] }
  0x19   : > { %v1049_v39 = vshll.u32 %v2259_v31, 16  ;;  %v383_v40 = vshrl.u32 %v1786_v33, 16  ;;  %v385_v41 = vshll.u32 %v1786_v33, 16  ;;  %v1045_v43 = vshrl.u32 %v1824_v23, 16  ;;  %v1832_v47 = vld [vmem:[%s2674_s1 + $0x14] sm:$0x7] }
  0x1a   : > { %v396_v45 = vor.u32 %v394_v35, %v392_v34  ;;  %v1043_v46 = vrot.slane %v1041_v37, 1  ;;  %v400_v48 = vrot.slane %v398_v38, 1  ;;  %v2275_v49 = vld [vmem:[%s2194_s14 + $0x18] sm:$0xf]  ;;  %v238_v50 = vld [vmem:[%s2675_s2 + $0x10] sm:$0xf]  ;;  %2082 = vmatprep.subr.msk.bf16.mxu0 %vm431_vm0, %v1832_v47 }
  0x1b   : > { %695 = vperm.xlu1 %2098, %v608_v11   ;;  %683 = vperm.xlu0 %2097, %v607_v12   ;;  %v387_v51 = vrot.slane %v385_v41, 1  ;;  %v1034_v52 = vshrl.u32 %v1823_v42, 16  ;;  %v1036_v53 = vshll.u32 %v1823_v42, 16  ;;  %v402_v54 = vshrl.u32 %v1788_v27, 16  ;;  %v346_v55 = vld [vmem:[%s2674_s1] sm:$0x7] }
  0x1c   : > { %v2284_v56 = vrot.slane %v1049_v39, 1  ;;  %v2287_v57 = vld [vmem:[%s2194_s14 + $0x1c] sm:$0xf]  ;;  %2077 = vmatprep.subr.msk.bf16.mxu1 %vm431_vm0, %v346_v55  ;;  %v1047_v60 = vor.u32 %v1045_v43, %v1043_v46  ;;  %v2291_v61 = vld [vmem:[%s2194_s14 + $0x20] sm:$0x1]  ;;  %v401_v63 = vsel %vm381_vm1, %v396_v45, %v400_v48  ;;  %v533_v0 = vsel %vm431_vm0, %v346_v55, 0 }
  0x1d   : > { %v388_v58 = vor.u32 %v387_v51, %v383_v40  ;;  %v1038_v59 = vrot.slane %v1036_v53, 1  ;;  %v1789_v62 = vcombine.low %v2275_v49, %v2287_v57  ;;  %v404_v3 = vor.u32 %v402_v54, %v400_v48  ;;  %v241_v5 = vld [vmem:[%s2675_s2 + $0x1c] sm:$0xf]  ;;  %v240_v6 = vld [vmem:[%s2675_s2 + $0x18] sm:$0xf] }
  0x1e   : > { %v1790_v7 = vcombine.low %v2291_v61, %v2291_v61  ;;  %v1052_v12 = vsel %vm381_vm1, %v1047_v60, %v2284_v56  ;;  %v1408_v33 = vld [vmem:[%s2194_s14 + $0x8] sm:$0xf]  ;;  %v2337_v35 = vld [vmem:[%s2194_s14 + $0x1c] sm:$0xf]  ;;  %v2342_v37 = vld [vmem:[%s2194_s14 + $0x10] sm:$0xf] }
  0x1f   : > { %256 = vperm.xlu1 %2098, %v235_v16   ;;  %244 = vperm.xlu0 %2097, %v234_v17   ;;  %v393_v1 = vsel %vm381_vm1, %v388_v58, %v392_v34  ;;  %v1039_v2 = vor.u32 %v1038_v59, %v1034_v52  ;;  %v406_v4 = vshll.u32 %v1789_v62, 16  ;;  %v410_v9 = vshrl.u32 %v1789_v62, 16  ;;  %v2334_v34 = vld [vmem:[%s2194_s14 + $0x18] sm:$0xf]  ;;  %2687 = vst [vmem:[#allocation4_spill] sm:$0xff] %v2337_v35 }
  0x20   : > { %1922 = vmatprep.mubr.msk.bf16.mxu1 %vm418_vm2, %v393_v1  ;;  %v1214_v17 = vsel %vm431_vm0, %v1832_v47, 0  ;;  %v414_v19 = vshll.u32 %v1790_v7, 16  ;;  %2686 = vst [vmem:[#allocation3_spill] sm:$0xff] %v2334_v34  ;;  %v1854_v36 = vcombine.low %v2334_v34, %v2337_v35  ;;  %v2345_v38 = vld [vmem:[%s2194_s14 + $0x14] sm:$0xf]  ;;  %vm714_vm4 = vcmask 1044484  }
  0x21   : > { %v1044_v11 = vsel %vm381_vm1, %v1039_v2, %v1043_v46  ;;  %1923 = vmatmul.mubr.msk.bf16.vlgmr.msra.gmra.mrb[0].mxu1 %vm418_vm2, %v401_v63  ;;  %v408_v16 = vrot.slane %v406_v4, 1  ;;  %v2348_v39 = vld [vmem:[%s2194_s14 + $0xc] sm:$0xf]  ;;  %v1853_v40 = vcombine.low %v2342_v37, %v2345_v38  ;;  %v2354_v51 = vld [vmem:[%s2194_s14 + $0x20] sm:$0xf]  ;;  %vm2408_vm5 = vmor %vm713_vm3, %vm714_vm4  ;;  %vm782_vm6 = vcmask 1046528  }
  0x22   : > { %1962 = vmatprep.mubr.msk.bf16.mxu0 %vm418_vm2, %v1044_v11  ;;  %1931 = vmatpush3.bf16.msra.mxu1 %v533_v0  ;;  %v416_v27 = vrot.slane %v414_v19, 1  ;;  %v1852_v41 = vcombine.low %v1408_v33, %v2348_v39  ;;  %v1458_v42 = vshll.u32 %v1854_v36, 16  ;;  %2688 = vst [vmem:[#allocation5_spill] sm:$0xff] %v2354_v51  ;;  %v2357_v52 = vld [vmem:[%s2194_s14 + $0x24] sm:$0xf]  ;;  %v1462_v62 = vshrl.u32 %v1854_v36, 16 }
  0x23   : > { %280 = vperm.xlu1 %2098, %v237_v28   ;;  %268 = vperm.xlu0 %2097, %v236_v32   ;;  %v409_v23 = vsel %vm381_vm1, %v404_v3, %v408_v16  ;;  %v412_v26 = vor.u32 %v410_v9, %v408_v16  ;;  %v2319_v28 = vld [vmem:[%s2674_s1 + $0x18] sm:$0x7]  ;;  %v2327_v32 = vld [vmem:[%s2674_s1 + $0x8] sm:$0x7]  ;;  %v1454_v43 = vshrl.u32 %v1853_v40, 16  ;;  %v1450_v46 = vshll.u32 %v1853_v40, 16 }
  0x24   : > { %1963 = vmatmul.mubr.msk.bf16.vlgmr.msra.gmra.mrb[0].mxu0 %vm418_vm2, %v1052_v12  ;;  %1926 = vmatprep.mubr.msk.bf16.mxu1 %vm418_vm2, %v409_v23  ;;  %v1445_v45 = vshll.u32 %v1852_v41, 16  ;;  %v1460_v47 = vrot.slane %v1458_v42, 1  ;;  %2689 = vst [vmem:[#allocation6_spill] sm:$0xff] %v2357_v52  ;;  %v1855_v53 = vcombine.low %v2354_v51, %v2357_v52  ;;  %v2368_v60 = vld [vmem:[%s2194_s14 + $0x28] sm:$0x1]  ;;  %vm1713_vm7 = vcmask 130048  }
  0x25   : > { %1971 = vmatpush3.bf16.msra.mxu0 %v1214_v17  ;;  %v417_v30 = vsel %vm381_vm1, %v412_v26, %v416_v27  ;;  %2078 = vmatprep.subr.msk.bf16.mxu1 %vm431_vm0, %v2327_v32  ;;  %2690 = vst [vmem:[#allocation7_spill] sm:$0xff] %v2368_v60  ;;  %v1856_v0 = vcombine.low %v2368_v60, %v2368_v60  ;;  %v2379_v11 = vld [vmem:[%s2194_s14 + $0x24] sm:$0x1]  ;;  %v2384_v16 = vld [vmem:[%s2194_s14 + $0x20] sm:$0xf]  ;;  %v1053_v27 = vshrl.u32 %v2259_v31, 16 }
  0x26   : > { %2083 = vmatprep.subr.msk.bf16.mxu0 %vm431_vm0, %v2319_v28  ;;  %v1447_v48 = vrot.slane %v1445_v45, 1  ;;  %v1466_v63 = vshll.u32 %v1855_v53, 16  ;;  %v1470_v1 = vshrl.u32 %v1855_v53, 16  ;;  %v1464_v2 = vor.u32 %v1462_v62, %v1460_v47  ;;  %v2387_v17 = vld [vmem:[%s2194_s14 + $0x1c] sm:$0xf] }
  0x27   : > { %304 = vperm.xlu1 %2098, %v239_v44   ;;  %292 = vperm.xlu0 %2097, %v238_v50   ;;  %v1443_v44 = vshrl.u32 %v1852_v41, 16  ;;  %v1452_v50 = vrot.slane %v1450_v46, 1  ;;  %v1474_v4 = vshll.u32 %v1856_v0, 16  ;;  %v1827_v12 = vcombine.low %v2379_v11, %v2379_v11  ;;  %v229_v60 = vld [vmem:[%s2194_s14 + $0xc] sm:$0xf] }
  0x28   : > { %v1468_v3 = vrot.slane %v1466_v63, 1  ;;  %v1826_v19 = vcombine.low %v2387_v17, %v2384_v16  ;;  %v1055_v36 = vor.u32 %v1053_v27, %v2284_v56  ;;  %v250_v46 = vlaneseq }
  0x29   : > { %1927 = vmatmul.mubr.msk.bf16.gmra.mrb[4].mxu1 %vm418_vm2, %v417_v30  ;;  %v1448_v54 = vor.u32 %v1447_v48, %v1443_v44  ;;  %v1456_v55 = vor.u32 %v1454_v43, %v1452_v50  ;;  %v1476_v7 = vrot.slane %v1474_v4, 1  ;;  %v1065_v23 = vshll.u32 %v1827_v12, 16 }
  0x2a   : > { %v1061_v26 = vshrl.u32 %v1826_v19, 16  ;;  %v1057_v30 = vshll.u32 %v1826_v19, 16  ;;  %v2123_v44 = vmov 839922192   ;;  %v251_v48 = vshrl.u32 %v250_v46, 7 }
  0x2b   : > { %328 = vperm.xlu1 %2098, %v241_v5   ;;  %316 = vperm.xlu0 %2097, %v240_v6   ;;  %v2362_v58 = vsel %vm381_vm1, %v1448_v54, %v1452_v50  ;;  %v2365_v59 = vsel %vm381_vm1, %v1456_v55, %v1460_v47  ;;  %v2373_v5 = vsel %vm381_vm1, %v1464_v2, %v1468_v3  ;;  %v1067_v33 = vrot.slane %v1065_v23, 1 }
  0x2c   : > { %2691 = vst [vmem:[#allocation8_spill] sm:$0xff] %v2373_v5  ;;  %v1472_v6 = vor.u32 %v1470_v1, %v1468_v3  ;;  %v1059_v40 = vrot.slane %v1057_v30, 1  ;;  %v248_v45 = vunpack.c.l.s4 %v2123_v44 }
  0x2e   : > { %v2376_v9 = vsel %vm381_vm1, %v1472_v6, %v1476_v7  ;;  %v2394_v41 = vsel %vm381_vm1, %v1055_v36, %v1059_v40  ;;  %v1063_v42 = vor.u32 %v1061_v26, %v1059_v40  ;;  %v249_v47 = vunpack.c.0.s8 %v248_v45 }
  0x2f   : > { %2692 = vst [vmem:[#allocation9_spill] sm:$0xff] %v2376_v9  ;;  %2693 = vst [vmem:[#allocation10_spill] sm:$0xff] %v2394_v41 }
  0x30   : > { %v2397_v43 = vsel %vm381_vm1, %v1063_v42, %v1067_v33  ;;  %v2399_v50 = vsub.s32 %v249_v47, %v251_v48 }
  0x31   : > { %2694 = vst [vmem:[#allocation11_spill] sm:$0xff] %v2397_v43 }
  0x8e   : > { %v636_v31 = vpop.permute.xlu1 %635  ;;  %v612_v53 = vpop.permute.xlu0 %611 }
  0x8f   : > { %v620_v54 = vrot.slane %v612_v53, %v2399_v50  ;;  %v644_v62 = vrot.slane %v636_v31, %v2399_v50  ;;  %v1157_v53 = vld [vmem:[%s2194_s14 + $0x4] sm:$0xe] }
  0x91   : > { %v2404_v0 = vrot.slane %v620_v54, 7  ;;  %v721_v7 = vrot.slane %v644_v62, 7 }
  0x92   : > { %v648_v56 = vpop.permute.xlu1 %647  ;;  %v624_v55 = vpop.permute.xlu0 %623 }
  0x93   : > { %v632_v63 = vrot.slane %v624_v55, %v2399_v50  ;;  %v656_v1 = vrot.slane %v648_v56, %v2399_v50  ;;  %v717_v23 = vrot.slane %v2404_v0, 4  ;;  %v723_v42 = vrot.slane %v721_v7, 4 }
  0x95   : > { %v718_v2 = vrot.slane %v632_v63, 7  ;;  %v724_v26 = vrot.slane %v656_v1, 7 }
  0x96   : > { %v672_v3 = vpop.permute.xlu1 %671  ;;  %v660_v4 = vpop.permute.xlu0 %659 }
  0x97   : > { %v668_v6 = vrot.slane %v660_v4, %v2399_v50  ;;  %v720_v19 = vrot.slane %v718_v2, 4  ;;  %v680_v27 = vrot.slane %v672_v3, %v2399_v50  ;;  %v2416_v36 = vsel %vm2408_vm5, %v717_v23, %v718_v2 }
  0x98   : > { %v726_v47 = vrot.slane %v724_v26, 4  ;;  %v2427_v54 = vsel %vm2408_vm5, %v723_v42, %v724_v26  ;;  %v1159_v56 = vmul.bf16 %v2254_v29, %v2416_v36  ;;  %v227_v26 = vld [vmem:[%s2194_s14 + $0x4] sm:$0xf] }
  0x99   : > { %v727_v40 = vrot.slane %v668_v6, 7  ;;  %v2420_v44 = vsel %vm2408_vm5, %v720_v19, %v721_v7  ;;  %v730_v48 = vrot.slane %v680_v27, 7  ;;  %v1158_v19 = vmul.bf16 %v1157_v53, %v2404_v0 }
  0x9a   : > { %v696_v30 = vpop.permute.xlu1 %695  ;;  %v684_v33 = vpop.permute.xlu0 %683  ;;  %v1160_v63 = vmul.bf16 %v2227_v18, %v2420_v44  ;;  %v1161_v23 = vmul.bf16 %v2214_v14, %v2427_v54 }
  0x9b   : > { %v704_v45 = vrot.slane %v696_v30, %v2399_v50  ;;  %v692_v46 = vrot.slane %v684_v33, %v2399_v50  ;;  %v729_v31 = vrot.slane %v727_v40, 4  ;;  %v2435_v1 = vsel %vm2408_vm5, %v726_v47, %v727_v40 }
  0x9c   : > { %v1162_v27 = vmul.bf16 %v2243_v24, %v2435_v1  ;;  %v1834_v47 = vcombine.low %v1160_v63, %v1161_v23  ;;  %v732_v43 = vrot.slane %v730_v48, 4 }
  0x9d   : > { %v2439_v2 = vsel %vm2408_vm5, %v729_v31, %v730_v48  ;;  %v733_v3 = vrot.slane %v692_v46, 7  ;;  %v736_v6 = vrot.slane %v704_v45, 7  ;;  %v226_v45 = vld [vmem:[%s2194_s14] sm:$0xf]  ;;  %v1833_v46 = vcombine.low %v1158_v19, %v1159_v56  ;;  %v228_v19 = vld [vmem:[%s2194_s14 + $0x8] sm:$0xf] }
  0x9e   : > { %v257_v55 = vpop.permute.xlu1 %256  ;;  %v245_v62 = vpop.permute.xlu0 %244  ;;  %v1163_v4 = vmul.bf16 %v2246_v25, %v2439_v2  ;;  %v1193_v63 = vrot.slane %v1834_v47, 1 }
  0x9f   : > { %v2444_v7 = vrot.slane %v257_v55, %v2399_v50  ;;  %v2453_v30 = vrot.slane %v245_v62, %v2399_v50  ;;  %v735_v42 = vrot.slane %v733_v3, 4  ;;  %v2458_v53 = vrot.slane %v736_v6, 4 }
  0xa0   : > { %v2456_v31 = vcombine.low %v1162_v27, %v1163_v4  ;;  %v1192_v56 = vrot.slane %v1833_v46, 1  ;;  %v230_v46 = vld [vmem:[%s2194_s14 + $0x10] sm:$0xf] }
  0xa1   : > { %v339_v55 = vmul.bf16 %v2444_v7, %v227_v26  ;;  %v338_v41 = vmul.bf16 %v2453_v30, %v226_v45  ;;  %v2465_v51 = vsel %vm2408_vm5, %v735_v42, %v736_v6  ;;  %v1166_v48 = vmul.bf16 %v2379_v11, %v2458_v53 }
  0xa2   : > { %v281_v33 = vpop.permute.xlu1 %280  ;;  %v269_v40 = vpop.permute.xlu0 %268  ;;  %v1195_v27 = vrot.slane %v2456_v31, 1  ;;  %v2479_v6 = vsel %vm2408_vm5, %v732_v43, %v733_v3  ;;  %v1194_v42 = vsel %vm782_vm6, %v1192_v56, %v1193_v63  ;;  %v1165_v45 = vmul.bf16 %v2384_v16, %v2465_v51  ;;  %v600_v3 = vld [vmem:[%s2194_s14] sm:$0xe] }
  0xa3   : > { %v2468_v4 = vrot.slane %v281_v33, %v2399_v50  ;;  %v1795_v23 = vcombine.low %v338_v41, %v339_v55  ;;  %v2474_v26 = vrot.slane %v269_v40, %v2399_v50  ;;  %1972 = vmatprep.mubr.msk.bf16.mxu0 %vm418_vm2, %v1194_v42  ;;  %v1333_v41 = vsel %vm431_vm0, %v2319_v28, 0  ;;  %v231_v40 = vld [vmem:[%s2194_s14 + $0x14] sm:$0xf] }
  0xa4   : > { %v805_v43 = vsel %vm431_vm0, %v2327_v32, 0  ;;  %v1196_v47 = vsel %vm782_vm6, %v1193_v63, %v1195_v27  ;;  %v1837_v28 = vcombine.low %v1166_v48, %v1166_v48  ;;  %v1164_v32 = vmul.bf16 %v2387_v17, %v2479_v6  ;;  %v1851_v48 = vld [vmem:[%s2674_s1 + $0x1c] sm:$0x7] }
  0xa5   : > { %v341_v33 = vmul.bf16 %v2468_v4, %v229_v60  ;;  %v340_v11 = vmul.bf16 %v2474_v26, %v228_v19  ;;  %v749_v60 = vmul.bf16 %v2416_v36, %v2232_v20  ;;  %1932 = vmatprep.mubr.msk.bf16.mxu1 %vm418_vm2, %v1795_v23  ;;  %1973 = vmatmul.mubr.msk.bf16.vlgmr.msra.gmra.mrb[0].mxu0 %vm418_vm2, %v1196_v47  ;;  %v233_v19 = vld [vmem:[%s2194_s14 + $0x1c] sm:$0xf] }
  0xa6   : > { %v305_v62 = vpop.permute.xlu1 %304  ;;  %v293_v9 = vpop.permute.xlu0 %292  ;;  %1981 = vmatpush3.bf16.msra.mxu0 %v1333_v41  ;;  %v1291_v41 = vmul.bf16 %v2227_v18, %v2444_v7  ;;  %v1290_v47 = vmul.bf16 %v2254_v29, %v2453_v30  ;;  %v1199_v35 = vrot.slane %v1837_v28, 1  ;;  %v753_v18 = vmul.bf16 %v2439_v2, %v2238_v22 }
  0xa7   : > { %v2499_v31 = vrot.slane %v305_v62, %v2399_v50  ;;  %v2502_v55 = vrot.slane %v293_v9, %v2399_v50  ;;  %v1796_v56 = vcombine.low %v340_v11, %v341_v33  ;;  %v750_v62 = vmul.bf16 %v2420_v44, %v2218_v15  ;;  %v1813_v33 = vld [vmem:[%s2674_s1 + $0xc] sm:$0x7]  ;;  %2084 = vmatprep.subr.msk.bf16.mxu0 %vm431_vm0, %v1851_v48 }
  0xa8   : > { %v748_v11 = vmul.bf16 %v2404_v0, %v600_v3  ;;  %v1843_v28 = vcombine.low %v1290_v47, %v1291_v41  ;;  %v1861_v47 = vld [vmem:[%s2674_s1 + $0x20] sm:$0x7] }
  0xa9   : > { %v343_v9 = vmul.bf16 %v2499_v31, %v231_v40  ;;  %v342_v63 = vmul.bf16 %v2502_v55, %v230_v46  ;;  %1933 = vmatmul.mubr.msk.bf16.vlgmr.msra.gmra.mrb[0].mxu1 %vm418_vm2, %v1796_v56  ;;  %v1836_v40 = vcombine.low %v1164_v32, %v1165_v45  ;;  %v232_v46 = vld [vmem:[%s2194_s14 + $0x18] sm:$0xf] }
  0xaa   : > { %v329_v12 = vpop.permute.xlu1 %328  ;;  %v317_v23 = vpop.permute.xlu0 %316  ;;  %1941 = vmatpush3.bf16.msra.mxu1 %v805_v43  ;;  %v1804_v5 = vcombine.low %v748_v11, %v749_v60  ;;  %v752_v43 = vmul.bf16 %v2435_v1, %v2235_v21 }
  0xab   : > { %v2509_v42 = vrot.slane %v329_v12, %v2399_v50  ;;  %v751_v12 = vmul.bf16 %v2427_v54, %v2211_v13  ;;  %v1797_v34 = vcombine.low %v342_v63, %v343_v9  ;;  %v2532_v10 = vrot.slane %v317_v23, %v2399_v50  ;;  %2079 = vmatprep.subr.msk.bf16.mxu1 %vm431_vm0, %v1813_v33 }
  0xac   : > { %v1197_v3 = vrot.slane %v1836_v40, 1  ;;  %v755_v50 = vmul.bf16 %v2465_v51, %v2287_v57  ;;  %v754_v23 = vmul.bf16 %v2479_v6, %v2275_v49  ;;  %v1292_v9 = vmul.bf16 %v2214_v14, %v2474_v26 }
  0xad   : > { %v345_v52 = vmul.bf16 %v2509_v42, %v233_v19  ;;  %v344_v45 = vmul.bf16 %v2532_v10, %v232_v46  ;;  %1936 = vmatprep.mubr.msk.bf16.mxu1 %vm418_vm2, %v1797_v34  ;;  %v1805_v29 = vcombine.low %v750_v62, %v751_v12  ;;  %v783_v34 = vrot.slane %v1804_v5, 1  ;;  %v1289_v46 = vld [vmem:[%s2194_s14 + $0x24] sm:$0xf] }
  0xae   : > { %v1198_v60 = vsel %vm782_vm6, %v1195_v27, %v1197_v3  ;;  %v1200_v32 = vsel %vm782_vm6, %v1197_v3, %v1199_v35  ;;  %v1806_v62 = vcombine.low %v752_v43, %v753_v18  ;;  %v1293_v27 = vmul.bf16 %v2243_v24, %v2468_v4 }
  0xaf   : > { %1976 = vmatprep.mubr.msk.bf16.mxu0 %vm418_vm2, %v1198_v60  ;;  %v1798_v56 = vcombine.low %v344_v45, %v345_v52  ;;  %v784_v19 = vrot.slane %v1805_v29, 1  ;;  %v1807_v52 = vcombine.low %v754_v23, %v755_v50  ;;  %v1295_v63 = vmul.bf16 %v2387_v17, %v2499_v31 }
  0xb0   : > { %1977 = vmatmul.mubr.msk.bf16.gmra.mrb[4].mxu0 %vm418_vm2, %v1200_v32  ;;  %v1294_v5 = vmul.bf16 %v2246_v25, %v2502_v55  ;;  %v786_v11 = vrot.slane %v1806_v62, 1  ;;  %v756_v24 = vmul.bf16 %v2458_v53, %v2291_v61  ;;  %v1844_v12 = vcombine.low %v1292_v9, %v1293_v27  ;;  %v2703_v27 = vld [vmem:[#allocation9_spill] sm:$0xff] }
  0xb1   : > { %1982 = vmatprep.mubr.msk.bf16.mxu0 %vm418_vm2, %v1843_v28  ;;  %1937 = vmatmul.mubr.msk.bf16.gmra.mrb[4].mxu1 %vm418_vm2, %v1798_v56  ;;  %v785_v35 = vsel %vm782_vm6, %v783_v34, %v784_v19  ;;  %v1491_v14 = vsel %vm431_vm0, %v1851_v48, 0  ;;  %v788_v41 = vrot.slane %v1807_v52, 1  ;;  %v924_v25 = vsel %vm431_vm0, %v1813_v33, 0  ;;  %v2701_v56 = vld [vmem:[#allocation3_spill] sm:$0xff] }
  0xb2   : > { %1942 = vmatprep.mubr.msk.bf16.mxu1 %vm418_vm2, %v785_v35  ;;  %v1845_v40 = vcombine.low %v1294_v5, %v1295_v63  ;;  %v1808_v17 = vcombine.low %v756_v24, %v756_v24  ;;  %v787_v61 = vsel %vm782_vm6, %v784_v19, %v786_v11  ;;  %v1297_v3 = vmul.bf16 %v1289_v46, %v2509_v42  ;;  %v2702_v19 = vld [vmem:[#allocation5_spill] sm:$0xff]  ;;  %v1871_v46 = vld [vmem:[%s2677_s4] ss:$0 sm:$0xff] }
  0xb3   : > { %v1296_v48 = vmul.bf16 %v2384_v16, %v2532_v10  ;;  %v789_v18 = vsel %vm782_vm6, %v786_v11, %v788_v41  ;;  %v882_v33 = vmul.bf16 %v2218_v15, %v2444_v7  ;;  %v881_v45 = vmul.bf16 %v2232_v20, %v2453_v30  ;;  %v1566_v7 = vld [vmem:[%s2194_s14 + $0x8] sm:$0xe] }
  0xb4   : > { %v790_v16 = vrot.slane %v1808_v17, 1  ;;  %v884_v15 = vmul.bf16 %v2235_v21, %v2468_v4  ;;  %v883_v20 = vmul.bf16 %v2211_v13, %v2474_v26  ;;  %v886_v30 = vmul.bf16 %v2275_v49, %v2499_v31  ;;  %v880_v49 = vld [vmem:[%s2194_s14 + $0x20] sm:$0xf]  ;;  %v2697_v26 = vld [vmem:[#allocation8_spill] sm:$0xff]  ;;  %v2706_v11 = vld [vmem:[#allocation11_spill] sm:$0xff]  ;;  %s1874_s14 = sshll.u32 %s2708_s19, 6 }
  0xb5   : > { %v1846_v29 = vcombine.low %v1296_v48, %v1297_v3  ;;  %v1814_v43 = vcombine.low %v881_v45, %v882_v33  ;;  %v1570_v60 = vmul.bf16 %v2345_v38, %v2427_v54  ;;  %v1568_v28 = vmul.bf16 %v2348_v39, %v2416_v36  ;;  %v2698_v38 = vld [vmem:[#allocation4_spill] sm:$0xff]  ;;  %v2699_v36 = vld [vmem:[#allocation2_spill] sm:$0xff]  ;;  %s2652_s8 = scalar_lea.vmem %s2678_s5, %s1874_s14 }
  0xb6   : > { %v791_v50 = vsel %vm782_vm6, %v788_v41, %v790_v16  ;;  %v1567_v21 = vmul.bf16 %v1566_v7, %v2404_v0  ;;  %v1572_v39 = vmul.bf16 %v2698_v38, %v2439_v2  ;;  %v2700_v0 = vld [vmem:[#allocation6_spill] sm:$0xff]  ;;  %v888_v54 = vmul.bf16 %v880_v49, %v2509_v42 }
  0xb7   : > { %v887_v31 = vmul.bf16 %v2287_v57, %v2532_v10  ;;  %v1571_v32 = vmul.bf16 %v2701_v56, %v2435_v1  ;;  %v1573_v23 = vmul.bf16 %v2702_v19, %v2479_v6  ;;  %v2704_v57 = vld [vmem:[#allocation7_spill] sm:$0xff]  ;;  %v2705_v42 = vld [vmem:[#allocation10_spill] sm:$0xff] }
  0xb8   : > { %1983 = vmatmul.mubr.msk.bf16.vlgmr.msra.gmra.mrb[0].mxu0 %vm418_vm2, %v1844_v12  ;;  %v1575_v1 = vmul.bf16 %v2704_v57, %v2458_v53 }
  0xb9   : > { %1991 = vmatpush3.bf16.msra.mxu0 %v1491_v14  ;;  %1986 = vmatprep.mubr.msk.bf16.mxu0 %vm418_vm2, %v1845_v40  ;;  %v1864_v34 = vcombine.low %v1571_v32, %v1572_v39  ;;  %v1817_v62 = vcombine.low %v887_v31, %v888_v54 }
  0xba   : > { %1943 = vmatmul.mubr.msk.bf16.vlgmr.msra.gmra.mrb[0].mxu1 %vm418_vm2, %v787_v61  ;;  %2085 = vmatprep.subr.msk.bf16.mxu0 %vm431_vm0, %v1861_v47  ;;  %v1866_v35 = vcombine.low %v1575_v1, %v1575_v1 }
  0xbb   : > { %1951 = vmatpush3.bf16.msra.mxu1 %v924_v25  ;;  %1946 = vmatprep.mubr.msk.bf16.mxu1 %vm418_vm2, %v789_v18  ;;  %v1604_v10 = vrot.slane %v1864_v34, 1 }
  0xbc   : > { %2081 = vmatprep.subr.msk.bf16.mxu1 %vm431_vm0, %v2189_v8  ;;  %v1569_v8 = vmul.bf16 %v2342_v37, %v2420_v44  ;;  %v1623_v37 = vsel %vm431_vm0, %v1861_v47, 0  ;;  %v1815_v44 = vcombine.low %v883_v20, %v884_v15  ;;  %v1608_v5 = vrot.slane %v1866_v35, 1 }
  0xbe   : > { %v1863_v13 = vcombine.low %v1569_v8, %v1570_v60 }
  0xc0   : > { %1987 = vmatmul.mubr.msk.bf16.gmra.mrb[4].mxu0 %vm418_vm2, %v1846_v29 }
  0xc1   : > { %1992 = vmatprep.mubr.msk.bf16.mxu0 %vm418_vm2, %v2362_v58  ;;  %v885_v58 = vmul.bf16 %v2238_v22, %v2502_v55  ;;  %v1862_v22 = vcombine.low %v1567_v21, %v1568_v28  ;;  %v1602_v55 = vrot.slane %v1863_v13, 1 }
  0xc2   : > { %1947 = vmatmul.mubr.msk.bf16.gmra.mrb[4].mxu1 %vm418_vm2, %v791_v50 }
  0xc3   : > { %1952 = vmatprep.mubr.msk.bf16.mxu1 %vm418_vm2, %v1814_v43  ;;  %v1816_v4 = vcombine.low %v885_v58, %v886_v30  ;;  %v1601_v2 = vrot.slane %v1862_v22, 1  ;;  %v1605_v52 = vsel %vm782_vm6, %v1602_v55, %v1604_v10 }
  0xc8   : > { %1993 = vmatmul.mubr.msk.bf16.vlgmr.msra.gmra.mrb[0].mxu0 %vm418_vm2, %v2365_v59  ;;  %v1574_v59 = vmul.bf16 %v2700_v0, %v2465_v51  ;;  %v1603_v51 = vsel %vm782_vm6, %v1601_v2, %v1602_v55 }
  0xc9   : > { %2001 = vmatpush3.bf16.msra.mxu0 %v1623_v37  ;;  %1996 = vmatprep.mubr.msk.bf16.mxu0 %vm418_vm2, %v2697_v26 }
  0xca   : > { %1953 = vmatmul.mubr.msk.bf16.vlgmr.msra.gmra.mrb[0].mxu1 %vm418_vm2, %v1815_v44  ;;  %v1865_v9 = vcombine.low %v1573_v23, %v1574_v59 }
  0xcb   : > { %2011 = vmatpush3.bf16.msra.mxu1 %v2699_v36  ;;  %1956 = vmatprep.mubr.msk.bf16.mxu1 %vm418_vm2, %v1816_v4 }
  0xcc   : > { %v1606_v6 = vrot.slane %v1865_v9, 1 }
  0xce   : > { %v1607_v63 = vsel %vm782_vm6, %v1604_v10, %v1606_v6  ;;  %v1609_v53 = vsel %vm782_vm6, %v1606_v6, %v1608_v5 }
  0xd0   : > { %1997 = vmatmul.mubr.msk.bf16.gmra.mrb[4].mxu0 %vm418_vm2, %v2703_v27 }
  0xd1   : > { %2002 = vmatprep.mubr.msk.bf16.mxu0 %vm418_vm2, %v1603_v51 }
  0xd2   : > { %1957 = vmatmul.mubr.msk.bf16.gmra.mrb[4].mxu1 %vm418_vm2, %v1817_v62 }
  0xd3   : > { %1966 = vmatprep.mubr.msk.bf16.mxu1 %vm418_vm2, %v2705_v42 }
  0xd8   : > { %2003 = vmatmul.mubr.msk.bf16.vlgmr.msra.gmra.mrb[0].mxu0 %vm418_vm2, %v1605_v52 }
  0xd9   : > { %2006 = vmatprep.mubr.msk.bf16.mxu0 %vm418_vm2, %v1607_v63 }
  0xde   : > { %1967 = vmatmul.mubr.msk.bf16.vlgmr.msra.gmra.mrb[4].mxu1 %vm418_vm2, %v2706_v11 }
  0xe0   : > { %2007 = vmatmul.mubr.msk.bf16.gmra.mrb[4].mxu0 %vm418_vm2, %v1609_v53 }
 0x19d   : > { %v1954_v24 = vpop.f32.mrb[0].mxu1 }
 0x19e   : > { %v960_v12 = vpop.f32.mrb[1].mxu1 }
 0x19f   : > { %v1955_v14 = vpop.f32.mrb[2].mxu1 }
 0x1a0   : > { %v963_v41 = vpop.f32.mrb[3].mxu1 }
 0x1ab   : > { %v2004_v40 = vpop.f32.mrb[0].mxu0 }
 0x1ac   : > { %v2012_v47 = vadd.f32 %v2004_v40, %v1954_v24  ;;  %v1659_v25 = vpop.f32.mrb[1].mxu0 }
 0x1ad   : > { %v2013_v17 = vadd.f32 %v1659_v25, %v960_v12  ;;  %v2005_v61 = vpop.f32.mrb[2].mxu0 }
 0x1ae   : > { %v1707_v3 = vadd.f32 %v2012_v47, %v1871_v46  ;;  %v2014_v48 = vadd.f32 %v2005_v61, %v1955_v14  ;;  %v1662_v18 = vpop.f32.mrb[3].mxu0 }
 0x1af   : > { %v1705_v33 = vadd.f32 %v2013_v17, %v1871_v46  ;;  %v2015_v45 = vadd.f32 %v1662_v18, %v963_v41 }
 0x1b0   : > { %1716 = vst.msk [vmem:[%s2652_s8 + $0x10] sm:$0xff] %vm1713_vm7, %v1707_v3  ;;  %v1708_v16 = vadd.f32 %v2014_v48, %v1871_v46 }
 0x1b1   : > { %1714 = vst.msk [vmem:[%s2652_s8] sm:$0xff] %vm1713_vm7, %v1705_v33  ;;  %v1706_v29 = vadd.f32 %v2015_v45, %v1871_v46  ;;  %v1968_v43 = vpop.f32.mrb[4].mxu1 }
 0x1b2   : > { %1717 = vst.msk [vmem:[%s2652_s8 + $0x18] sm:$0xff] %vm1713_vm7, %v1708_v16  ;;  %v1134_v50 = vpop.f32.mrb[5].mxu1 }
 0x1b3   : > { %1715 = vst.msk [vmem:[%s2652_s8 + $0x8] sm:$0xff] %vm1713_vm7, %v1706_v29  ;;  %v2008_v8 = vpop.f32.mrb[4].mxu0  ;;  %v1969_v15 = vpop.f32.mrb[6].mxu1 }
 0x1b4   : > { %v2016_v20 = vadd.f32 %v2008_v8, %v1968_v43  ;;  %v1675_v7 = vpop.f32.mrb[5].mxu0  ;;  %v1137_v30 = vpop.f32.mrb[7].mxu1 }
 0x1b5   : > { %v2017_v58 = vadd.f32 %v1675_v7, %v1134_v50  ;;  %v2009_v60 = vpop.f32.mrb[6].mxu0 }
 0x1b6   : > { %v1711_v28 = vadd.f32 %v2016_v20, %v1871_v46  ;;  %v2018_v37 = vadd.f32 %v2009_v60, %v1969_v15  ;;  %v1678_v21 = vpop.f32.mrb[7].mxu0 }
 0x1b7   : > { %v1709_v44 = vadd.f32 %v2017_v58, %v1871_v46  ;;  %v2019_v13 = vadd.f32 %v1678_v21, %v1137_v30 }
 0x1b8   : > { %1720 = vst.msk [vmem:[%s2652_s8 + $0x30] sm:$0xff] %vm1713_vm7, %v1711_v28  ;;  %v1712_v4 = vadd.f32 %v2018_v37, %v1871_v46 }
 0x1b9   : > { %1718 = vst.msk [vmem:[%s2652_s8 + $0x20] sm:$0xff] %vm1713_vm7, %v1709_v44  ;;  %v1710_v49 = vadd.f32 %v2019_v13, %v1871_v46 }
 0x1ba   : > { %1721 = vst.msk [vmem:[%s2652_s8 + $0x38] sm:$0xff] %vm1713_vm7, %v1712_v4 }
 0x1bb   : > { %1719 = vst.msk [vmem:[%s2652_s8 + $0x28] sm:$0xff] %vm1713_vm7, %v1710_v49 }
 0x1bc PF: > { %s15_s18 = sadd.s32 1, %s2120_s18  }
 0x1bd   : > { %p12_p4 = scmp.ge.s32.totalorder %s15_s18, 4  }
 0x1bf   :  { %14 = sbr.rel (!%p12_p4) target bundleno = 1 (0x1), region = 78 }

// kernel: realnvp_forward.104
= control target key start
LH: loop header
LB: loop body
LE: loop exit
PB: predicated region body
PF: predicated region fallthrough
CT: control target
= control target key end

     0   :  { %s2204_s18 = smov 0   ;;  %s2705_s0 = inlined_call_operand.vmem [shape: bf16[2,82,16], index: 0, kind: input, shape index: {}]   ;;  %s2706_s1 = inlined_call_operand.vmem [shape: bf16[9,16,16], index: 1, kind: input, shape index: {}]   ;;  %s2707_s2 = inlined_call_operand.vmem [shape: bf16[64,1], index: 2, kind: input, shape index: {}]   ;;  %s2708_s3 = inlined_call_operand.vmem [shape: bf16[64,1], index: 3, kind: input, shape index: {}]   ;;  %s2709_s4 = inlined_call_operand.vmem [shape: f32[1,16], index: 4, kind: input, shape index: {}]   ;;  %s2710_s5 = inlined_call_operand.vmem [shape: f32[2,64,16], index: 5, kind: output, shape index: {}]  }
   0x1 LB: > { %s1811_s19 = sadd.s32 4294967295, %s2170_s18   ;;  %p1815_p0 = scmp.ge.s32.totalorder %s2170_s18, 1  ;;  %s2170_s18 = sphi %s2204_s18, %s15_s18  }
   0x2   : > { %p187_p1 = scmp.lt.s32.totalorder %s2170_s18, 3 }
   0x4   : > { %p188_p2 = pnand %p1815_p0, %p187_p1 }
   0x6   : > { %191 = sbr.rel (%p188_p2) target bundleno = 442 (0x1ba), region = 40 }
   0xd   : > { %v610_v0 = vld [vmem:[%s2708_s3 + $0x8] sm:$0xf]  ;;  %v608_v1 = vld [vmem:[%s2708_s3] sm:$0xf]  ;;  %v2172_v2 = vmov 0   ;;  %p215_p3 = scmp.lt.s32.totalorder %s1811_s19, 1 }
   0xe   : > { %2139 = vset.pattern.permute.xlu1 %v2172_v2  ;;  %2138 = vset.pattern.permute.xlu0 %v2172_v2  ;;  %v611_v3 = vld [vmem:[%s2708_s3 + $0xc] sm:$0xf]  ;;  %v609_v4 = vld [vmem:[%s2708_s3 + $0x4] sm:$0xf]  ;;  %v613_v5 = vld [vmem:[%s2708_s3 + $0x14] sm:$0xf] }
   0xf   : > { %642 = vperm.xlu1 %2139, %v610_v0   ;;  %618 = vperm.xlu0 %2138, %v608_v1   ;;  %s2737_s19 = smov (!%p215_p3, %s1811_s19), 1  ;;  %v612_v6 = vld [vmem:[%s2708_s3 + $0x10] sm:$0xf]  ;;  %v2142_v7 = vld [vmem:[%s2706_s1 + $0x8] sm:$0xff]   ;;  %v2239_v8 = vld [vmem:[%s2706_s1 + $0x20] sm:$0xff]   ;;  %vm426_vm1 = vcmask 130048  }
  0x10   : > { %s2127_s7 = smul.u32 44, %s2737_s19  ;;  %v615_v9 = vld [vmem:[%s2708_s3 + $0x1c] sm:$0xf]  ;;  %v614_v10 = vld [vmem:[%s2708_s3 + $0x18] sm:$0xf]  ;;  %1971 = vmatprep.subr.bf16.mxu1 %v2142_v7  ;;  %2011 = vmatprep.subr.bf16.mxu0 %v2239_v8  ;;  %v2150_v42 = vld [vmem:[%s2706_s1 + $0x28] sm:$0xff]  }
  0x11   : > { %1972 = vmatpush3.bf16.msra.mxu1 %v2142_v7  ;;  %2012 = vmatpush3.bf16.msra.mxu0 %v2239_v8  ;;  %v235_v14 = vld [vmem:[%s2707_s2 + $0x4] sm:$0xf]  ;;  %v234_v15 = vld [vmem:[%s2707_s2] sm:$0xf]  ;;  %v237_v26 = vld [vmem:[%s2707_s2 + $0xc] sm:$0xf] }
  0x12   : > { %s2244_s14 = scalar_lea.vmem %s2705_s0, %s2127_s7  ;;  %v236_v30 = vld [vmem:[%s2707_s2 + $0x8] sm:$0xf]  ;;  %vm383_vm0 = vsmask.f32 7424  ;;  %v239_v44 = vld [vmem:[%s2707_s2 + $0x14] sm:$0xf]  ;;  %2021 = vmatprep.subr.bf16.mxu0 %v2150_v42 }
  0x13   : > { %654 = vperm.xlu1 %2139, %v611_v3   ;;  %630 = vperm.xlu0 %2138, %v609_v4   ;;  %v2254_v11 = vld [vmem:[%s2244_s14 + $0xc] sm:$0xf]  ;;  %v2257_v12 = vld [vmem:[%s2244_s14 + $0x10] sm:$0xf]  ;;  %v2261_v13 = vld [vmem:[%s2244_s14 + $0x8] sm:$0xf] }
  0x14   : > { %v2270_v16 = vld [vmem:[%s2244_s14 + $0xc] sm:$0xf]  ;;  %v1822_v17 = vcombine.low %v2261_v13, %v2254_v11  ;;  %v2275_v18 = vld [vmem:[%s2244_s14 + $0x4] sm:$0xf]  ;;  %v2278_v19 = vld [vmem:[%s2244_s14 + $0x10] sm:$0xf] }
  0x15   : > { %v2281_v20 = vld [vmem:[%s2244_s14 + $0x14] sm:$0xf]  ;;  %v1866_v21 = vcombine.low %v2270_v16, %v2257_v12  ;;  %v2289_v23 = vld [vmem:[%s2244_s14 + $0x18] sm:$0xf]  ;;  %v2297_v27 = vld [vmem:[%s2244_s14 + $0x8] sm:$0xf] }
  0x16   : > { %v2286_v22 = vld [vmem:[%s2244_s14 + $0x14] sm:$0xf]  ;;  %v392_v24 = vshll.u32 %v1822_v17, 16  ;;  %v1823_v25 = vcombine.low %v2278_v19, %v2281_v20  ;;  %v348_v28 = vld [vmem:[%s2244_s14] sm:$0xf]  ;;  %v396_v33 = vshrl.u32 %v1822_v17, 16 }
  0x17   : > { %678 = vperm.xlu1 %2139, %v613_v5   ;;  %666 = vperm.xlu0 %2138, %v612_v6   ;;  %v2302_v29 = vcombine.low %v2286_v22, %v2289_v23  ;;  %v1821_v31 = vcombine.low %v348_v28, %v2275_v18  ;;  %v1014_v34 = vld [vmem:[%s2244_s14 + $0x4] sm:$0xf]  ;;  %v1057_v35 = vshll.u32 %v1866_v21, 16  ;;  %v1061_v41 = vshrl.u32 %v1866_v21, 16  ;;  %v2315_v43 = vld [vmem:[%s2244_s14 + $0x20] sm:$0x1] }
  0x18   : > { %v394_v32 = vrot.slane %v392_v24, 1  ;;  %v400_v36 = vshll.u32 %v1823_v25, 16  ;;  %v1865_v40 = vcombine.low %v1014_v34, %v2297_v27  ;;  %v238_v48 = vld [vmem:[%s2707_s2 + $0x10] sm:$0xf]  ;;  %v404_v52 = vshrl.u32 %v1823_v25, 16  ;;  %v2147_v53 = vld [vmem:[%s2706_s1] sm:$0xff]  }
  0x19   : > { %v1065_v37 = vshll.u32 %v2302_v29, 16  ;;  %v385_v38 = vshrl.u32 %v1821_v31, 16  ;;  %v387_v39 = vshll.u32 %v1821_v31, 16  ;;  %v1059_v46 = vrot.slane %v1057_v35, 1  ;;  %v2329_v55 = vld [vmem:[%s2244_s14 + $0x18] sm:$0xf]  ;;  %1981 = vmatprep.subr.bf16.mxu1 %v2147_v53 }
  0x1a   : > { %v398_v45 = vor.u32 %v396_v33, %v394_v32  ;;  %v402_v47 = vrot.slane %v400_v36, 1  ;;  %v1050_v50 = vshrl.u32 %v1865_v40, 16  ;;  %v1052_v51 = vshll.u32 %v1865_v40, 16  ;;  %v2332_v56 = vld [vmem:[%s2244_s14 + $0x1c] sm:$0xf]  ;;  %v2358_v21 = vld [vmem:[%s2706_s1 + $0x30] sm:$0xff]  }
  0x1b   : > { %702 = vperm.xlu1 %2139, %v615_v9   ;;  %690 = vperm.xlu0 %2138, %v614_v10   ;;  %v389_v49 = vrot.slane %v387_v39, 1  ;;  %v2326_v54 = vrot.slane %v1065_v37, 1  ;;  %v1825_v57 = vcombine.low %v2315_v43, %v2315_v43  ;;  %v1063_v60 = vor.u32 %v1061_v41, %v1059_v46  ;;  %v241_v63 = vld [vmem:[%s2707_s2 + $0x1c] sm:$0xf]  ;;  %v240_v4 = vld [vmem:[%s2707_s2 + $0x18] sm:$0xf] }
  0x1c   : > { %v1054_v59 = vrot.slane %v1052_v51, 1  ;;  %v1824_v61 = vcombine.low %v2329_v55, %v2332_v56  ;;  %v403_v62 = vsel %vm383_vm0, %v398_v45, %v402_v47  ;;  %v406_v2 = vor.u32 %v404_v52, %v402_v47  ;;  %v2365_v25 = vld [vmem:[%s2706_s1 + $0x10] sm:$0xff]   ;;  %v2371_v28 = vld [vmem:[%s2244_s14 + $0x18] sm:$0xf]  ;;  %v2385_v34 = vld [vmem:[%s2244_s14 + $0xc] sm:$0xf] }
  0x1d   : > { %v390_v58 = vor.u32 %v389_v49, %v385_v38  ;;  %v416_v6 = vshll.u32 %v1825_v57, 16  ;;  %v1068_v9 = vsel %vm383_vm0, %v1063_v60, %v2326_v54  ;;  %2716 = vst [vmem:[#allocation2_spill] sm:$0xff] %v2371_v28  ;;  %v2382_v33 = vld [vmem:[%s2244_s14 + $0x14] sm:$0xf]  ;;  %v2394_v47 = vld [vmem:[%s2244_s14 + $0x24] sm:$0xf] }
  0x1e   : > { %v1055_v1 = vor.u32 %v1054_v59, %v1050_v50  ;;  %v408_v3 = vshll.u32 %v1824_v61, 16  ;;  %v412_v5 = vshrl.u32 %v1824_v61, 16  ;;  %2719 = vst [vmem:[#allocation5_spill] sm:$0xff] %v2394_v47  ;;  %vm720_vm2 = vcmask 1040384  }
  0x1f   : > { %256 = vperm.xlu1 %2139, %v235_v14   ;;  %244 = vperm.xlu0 %2138, %v234_v15   ;;  %v395_v0 = vsel %vm383_vm0, %v390_v58, %v394_v32  ;;  %v418_v14 = vrot.slane %v416_v6, 1  ;;  %v2379_v32 = vld [vmem:[%s2244_s14 + $0x10] sm:$0xf]  ;;  %v2421_v6 = vld [vmem:[%s2244_s14 + $0x20] sm:$0xf]  ;;  %vm721_vm3 = vcmask 1044484  }
  0x20   : > { %1973 = vmatprep.mubr.msk.bf16.mxu1 %vm426_vm1, %v395_v0  ;;  %v1060_v7 = vsel %vm383_vm0, %v1055_v1, %v1059_v46  ;;  %v410_v10 = vrot.slane %v408_v3, 1  ;;  %v1901_v35 = vcombine.low %v2379_v32, %v2382_v33  ;;  %v2391_v46 = vld [vmem:[%s2244_s14 + $0x20] sm:$0xf]  ;;  %vm2445_vm4 = vmor %vm720_vm2, %vm721_vm3  ;;  %vm790_vm5 = vcmask 1046528  }
  0x21   : > { %1974 = vmatmul.mubr.msk.bf16.vlgmr.msra.gmra.mrb[0].mxu1 %vm426_vm1, %v403_v62  ;;  %2013 = vmatprep.mubr.msk.bf16.mxu0 %vm426_vm1, %v1060_v7  ;;  %2718 = vst [vmem:[#allocation4_spill] sm:$0xff] %v2391_v46  ;;  %v2424_v7 = vld [vmem:[%s2244_s14 + $0x1c] sm:$0xf] }
  0x22   : > { %1982 = vmatpush3.bf16.msra.mxu1 %v2147_v53  ;;  %v411_v15 = vsel %vm383_vm0, %v406_v2, %v410_v10  ;;  %v414_v17 = vor.u32 %v412_v5, %v410_v10  ;;  %2014 = vmatmul.mubr.msk.bf16.vlgmr.msra.gmra.mrb[0].mxu0 %vm426_vm1, %v1068_v9  ;;  %v1482_v38 = vshrl.u32 %v1901_v35, 16  ;;  %v1478_v41 = vshll.u32 %v1901_v35, 16  ;;  %v2405_v53 = vld [vmem:[%s2244_s14 + $0x28] sm:$0x1] }
  0x23   : > { %280 = vperm.xlu1 %2139, %v237_v26   ;;  %268 = vperm.xlu0 %2138, %v236_v30   ;;  %v1435_v26 = vld [vmem:[%s2244_s14 + $0x8] sm:$0xf]  ;;  %v2374_v30 = vld [vmem:[%s2244_s14 + $0x1c] sm:$0xf]  ;;  %2720 = vst [vmem:[#allocation6_spill] sm:$0xff] %v2405_v53  ;;  %v1904_v59 = vcombine.low %v2405_v53, %v2405_v53  ;;  %v1868_v9 = vcombine.low %v2424_v7, %v2421_v6 }
  0x24   : > { %1977 = vmatprep.mubr.msk.bf16.mxu1 %vm426_vm1, %v411_v15  ;;  %2022 = vmatpush3.bf16.msra.mxu0 %v2150_v42  ;;  %v419_v24 = vsel %vm383_vm0, %v414_v17, %v418_v14  ;;  %2717 = vst [vmem:[#allocation3_spill] sm:$0xff] %v2374_v30  ;;  %v1902_v31 = vcombine.low %v2371_v28, %v2374_v30  ;;  %v1480_v45 = vrot.slane %v1478_v41, 1  ;;  %v1069_v15 = vshrl.u32 %v2302_v29, 16  ;;  %v232_v28 = vld [vmem:[%s2244_s14 + $0x18] sm:$0xf] }
  0x25   : > { %2031 = vmatprep.subr.bf16.mxu0 %v2358_v21  ;;  %1991 = vmatprep.subr.bf16.mxu1 %v2365_v25  ;;  %v1900_v36 = vcombine.low %v1435_v26, %v2385_v34  ;;  %v1077_v14 = vshrl.u32 %v1868_v9, 16  ;;  %v1073_v17 = vshll.u32 %v1868_v9, 16 }
  0x26   : > { %v1486_v37 = vshll.u32 %v1902_v31, 16  ;;  %v1484_v50 = vor.u32 %v1482_v38, %v1480_v45  ;;  %v1490_v57 = vshrl.u32 %v1902_v31, 16  ;;  %v1071_v26 = vor.u32 %v1069_v15, %v2326_v54 }
  0x27   : > { %304 = vperm.xlu1 %2139, %v239_v44   ;;  %292 = vperm.xlu0 %2138, %v238_v48   ;;  %v1471_v39 = vshrl.u32 %v1900_v36, 16  ;;  %v1473_v40 = vshll.u32 %v1900_v36, 16  ;;  %v1903_v48 = vcombine.low %v2391_v46, %v2394_v47  ;;  %v1075_v31 = vrot.slane %v1073_v17, 1 }
  0x28   : > { %v1488_v42 = vrot.slane %v1486_v37, 1  ;;  %v2173_v38 = vmov 839922192  }
  0x29   : > { %1978 = vmatmul.mubr.msk.bf16.gmra.mrb[4].mxu1 %vm426_vm1, %v419_v24  ;;  %v1475_v44 = vrot.slane %v1473_v40, 1  ;;  %v1494_v58 = vshll.u32 %v1903_v48, 16  ;;  %v1498_v60 = vshrl.u32 %v1903_v48, 16  ;;  %v2431_v35 = vsel %vm383_vm0, %v1071_v26, %v1075_v31 }
  0x2a   : > { %v2402_v52 = vsel %vm383_vm0, %v1484_v50, %v1488_v42  ;;  %v1492_v61 = vor.u32 %v1490_v57, %v1488_v42  ;;  %2723 = vst [vmem:[#allocation9_spill] sm:$0xff] %v2431_v35  ;;  %v1079_v36 = vor.u32 %v1077_v14, %v1075_v31  ;;  %v250_v40 = vlaneseq  ;;  %v229_v35 = vld [vmem:[%s2244_s14 + $0xc] sm:$0xf] }
  0x2b   : > { %328 = vperm.xlu1 %2139, %v241_v63   ;;  %316 = vperm.xlu0 %2138, %v240_v4   ;;  %v1476_v49 = vor.u32 %v1475_v44, %v1471_v39  ;;  %v1496_v62 = vrot.slane %v1494_v58, 1  ;;  %v1502_v63 = vshll.u32 %v1904_v59, 16  ;;  %v2416_v4 = vld [vmem:[%s2244_s14 + $0x24] sm:$0x1]  ;;  %v248_v39 = vunpack.c.l.s4 %v2173_v38 }
  0x2c   : > { %v1869_v5 = vcombine.low %v2416_v4, %v2416_v4  ;;  %v251_v42 = vshrl.u32 %v250_v40, 7 }
  0x2d   : > { %v2399_v51 = vsel %vm383_vm0, %v1476_v49, %v1480_v45  ;;  %v2410_v0 = vsel %vm383_vm0, %v1492_v61, %v1496_v62  ;;  %v1500_v1 = vor.u32 %v1498_v60, %v1496_v62  ;;  %v1504_v2 = vrot.slane %v1502_v63, 1 }
  0x2e   : > { %2721 = vst [vmem:[#allocation7_spill] sm:$0xff] %v2410_v0  ;;  %v1081_v10 = vshll.u32 %v1869_v5, 16  ;;  %v249_v41 = vunpack.c.0.s8 %v248_v39 }
  0x2f   : > { %v2413_v3 = vsel %vm383_vm0, %v1500_v1, %v1504_v2 }
  0x30   : > { %2722 = vst [vmem:[#allocation8_spill] sm:$0xff] %v2413_v3  ;;  %v1083_v24 = vrot.slane %v1081_v10, 1  ;;  %v2436_v44 = vsub.s32 %v249_v41, %v251_v42 }
  0x32   : > { %v2434_v37 = vsel %vm383_vm0, %v1079_v36, %v1083_v24 }
  0x33   : > { %2724 = vst [vmem:[#allocation10_spill] sm:$0xff] %v2434_v37 }
  0x8e   : > { %v643_v29 = vpop.permute.xlu1 %642  ;;  %v619_v45 = vpop.permute.xlu0 %618 }
  0x8f   : > { %v627_v48 = vrot.slane %v619_v45, %v2436_v44  ;;  %v651_v50 = vrot.slane %v643_v29, %v2436_v44  ;;  %v1176_v29 = vld [vmem:[%s2244_s14 + $0x4] sm:$0xe] }
  0x91   : > { %v2441_v58 = vrot.slane %v627_v48, 7  ;;  %v728_v1 = vrot.slane %v651_v50, 7 }
  0x92   : > { %v655_v54 = vpop.permute.xlu1 %654  ;;  %v631_v49 = vpop.permute.xlu0 %630 }
  0x93   : > { %v639_v57 = vrot.slane %v631_v49, %v2436_v44  ;;  %v663_v59 = vrot.slane %v655_v54, %v2436_v44  ;;  %v724_v9 = vrot.slane %v2441_v58, 4  ;;  %v730_v31 = vrot.slane %v728_v1, 4 }
  0x95   : > { %v725_v60 = vrot.slane %v639_v57, 7  ;;  %v731_v10 = vrot.slane %v663_v59, 7 }
  0x96   : > { %v679_v61 = vpop.permute.xlu1 %678  ;;  %v667_v62 = vpop.permute.xlu0 %666 }
  0x97   : > { %v675_v63 = vrot.slane %v667_v62, %v2436_v44  ;;  %v727_v5 = vrot.slane %v725_v60, 4  ;;  %v687_v14 = vrot.slane %v679_v61, %v2436_v44  ;;  %v2453_v24 = vsel %vm2445_vm4, %v724_v9, %v725_v60  ;;  %v227_v9 = vld [vmem:[%s2244_s14 + $0x4] sm:$0xf] }
  0x98   : > { %v733_v40 = vrot.slane %v731_v10, 4  ;;  %v2464_v45 = vsel %vm2445_vm4, %v730_v31, %v731_v10  ;;  %v1178_v48 = vmul.bf16 %v2297_v27, %v2453_v24  ;;  %v226_v31 = vld [vmem:[%s2244_s14] sm:$0xf]  ;;  %v756_v2 = vmul.bf16 %v2453_v24, %v2275_v18 }
  0x99   : > { %v734_v26 = vrot.slane %v675_v63, 7  ;;  %v2457_v36 = vsel %vm2445_vm4, %v727_v5, %v728_v1  ;;  %v737_v41 = vrot.slane %v687_v14, 7  ;;  %v1177_v1 = vmul.bf16 %v1176_v29, %v2441_v58 }
  0x9a   : > { %v703_v15 = vpop.permute.xlu1 %702  ;;  %v691_v17 = vpop.permute.xlu0 %690  ;;  %v1179_v50 = vmul.bf16 %v2270_v16, %v2457_v36  ;;  %v1180_v5 = vmul.bf16 %v2257_v12, %v2464_v45 }
  0x9b   : > { %v711_v38 = vrot.slane %v703_v15, %v2436_v44  ;;  %v699_v39 = vrot.slane %v691_v17, %v2436_v44  ;;  %v736_v42 = vrot.slane %v734_v26, 4  ;;  %v2472_v57 = vsel %vm2445_vm4, %v733_v40, %v734_v26 }
  0x9c   : > { %v1181_v10 = vmul.bf16 %v2286_v22, %v2472_v57 }
  0x9d   : > { %v2476_v59 = vsel %vm2445_vm4, %v736_v42, %v737_v41  ;;  %v740_v60 = vrot.slane %v699_v39, 7  ;;  %v743_v62 = vrot.slane %v711_v38, 7  ;;  %v1877_v38 = vcombine.low %v1177_v1, %v1178_v48  ;;  %v228_v1 = vld [vmem:[%s2244_s14 + $0x8] sm:$0xf] }
  0x9e   : > { %v257_v54 = vpop.permute.xlu1 %256  ;;  %v245_v49 = vpop.permute.xlu0 %244  ;;  %v1182_v61 = vmul.bf16 %v2289_v23, %v2476_v59  ;;  %v1878_v39 = vcombine.low %v1179_v50, %v1180_v5 }
  0x9f   : > { %v2481_v63 = vrot.slane %v257_v54, %v2436_v44  ;;  %v2490_v14 = vrot.slane %v245_v49, %v2436_v44  ;;  %v742_v26 = vrot.slane %v740_v60, 4  ;;  %v2495_v42 = vrot.slane %v743_v62, 4 }
  0xa0   : > { %v2493_v40 = vcombine.low %v1181_v10, %v1182_v61  ;;  %v739_v54 = vrot.slane %v737_v41, 4  ;;  %v1212_v48 = vrot.slane %v1877_v38, 1  ;;  %v1213_v50 = vrot.slane %v1878_v39, 1  ;;  %v607_v39 = vld [vmem:[%s2244_s14] sm:$0xe] }
  0xa1   : > { %v339_v29 = vmul.bf16 %v2481_v63, %v227_v9  ;;  %v338_v37 = vmul.bf16 %v2490_v14, %v226_v31  ;;  %v2502_v3 = vsel %vm2445_vm4, %v742_v26, %v743_v62  ;;  %v1185_v41 = vmul.bf16 %v2416_v4, %v2495_v42 }
  0xa2   : > { %v281_v15 = vpop.permute.xlu1 %280  ;;  %v269_v17 = vpop.permute.xlu0 %268  ;;  %v1215_v10 = vrot.slane %v2493_v40, 1  ;;  %v2516_v62 = vsel %vm2445_vm4, %v739_v54, %v740_v60  ;;  %v1214_v26 = vsel %vm790_vm5, %v1212_v48, %v1213_v50  ;;  %v1313_v47 = vmul.bf16 %v2297_v27, %v2490_v14 }
  0xa3   : > { %v2505_v61 = vrot.slane %v281_v15, %v2436_v44  ;;  %v1831_v5 = vcombine.low %v338_v37, %v339_v29  ;;  %v2511_v9 = vrot.slane %v269_v17, %v2436_v44  ;;  %v1184_v15 = vmul.bf16 %v2421_v6, %v2502_v3  ;;  %2023 = vmatprep.mubr.msk.bf16.mxu0 %vm426_vm1, %v1214_v26  ;;  %v231_v37 = vld [vmem:[%s2244_s14 + $0x14] sm:$0xf]  ;;  %v230_v17 = vld [vmem:[%s2244_s14 + $0x10] sm:$0xf] }
  0xa4   : > { %v1216_v60 = vsel %vm790_vm5, %v1213_v50, %v1215_v10  ;;  %v1881_v29 = vcombine.low %v1185_v41, %v1185_v41  ;;  %v1183_v48 = vmul.bf16 %v2424_v7, %v2516_v62  ;;  %v757_v50 = vmul.bf16 %v2457_v36, %v2261_v13 }
  0xa5   : > { %v341_v31 = vmul.bf16 %v2505_v61, %v229_v35  ;;  %v340_v4 = vmul.bf16 %v2511_v9, %v228_v1  ;;  %1983 = vmatprep.mubr.msk.bf16.mxu1 %vm426_vm1, %v1831_v5  ;;  %2024 = vmatmul.mubr.msk.bf16.vlgmr.msra.gmra.mrb[0].mxu0 %vm426_vm1, %v1216_v60  ;;  %v233_v1 = vld [vmem:[%s2244_s14 + $0x1c] sm:$0xf]  ;;  %v1314_v60 = vmul.bf16 %v2270_v16, %v2481_v63 }
  0xa6   : > { %v305_v49 = vpop.permute.xlu1 %304  ;;  %v293_v53 = vpop.permute.xlu0 %292  ;;  %2032 = vmatpush3.bf16.msra.mxu0 %v2358_v21  ;;  %v1880_v46 = vcombine.low %v1183_v48, %v1184_v15  ;;  %v1219_v30 = vrot.slane %v1881_v29, 1  ;;  %v760_v16 = vmul.bf16 %v2476_v59, %v2281_v20 }
  0xa7   : > { %v2532_v35 = vrot.slane %v305_v49, %v2436_v44  ;;  %v2535_v40 = vrot.slane %v293_v53, %v2436_v44  ;;  %v1832_v54 = vcombine.low %v340_v4, %v341_v31  ;;  %v2160_v49 = vld [vmem:[%s2706_s1 + $0x38] sm:$0xff]   ;;  %v755_v4 = vmul.bf16 %v2441_v58, %v607_v39 }
  0xa8   : > { %v2550_v53 = vld [vmem:[%s2706_s1 + $0x18] sm:$0xff]   ;;  %v1217_v39 = vrot.slane %v1880_v46, 1  ;;  %2041 = vmatprep.subr.bf16.mxu0 %v2160_v49 }
  0xa9   : > { %v343_v41 = vmul.bf16 %v2532_v35, %v231_v37  ;;  %v342_v31 = vmul.bf16 %v2535_v40, %v230_v17  ;;  %1984 = vmatmul.mubr.msk.bf16.vlgmr.msra.gmra.mrb[0].mxu1 %vm426_vm1, %v1832_v54  ;;  %v1842_v0 = vcombine.low %v755_v4, %v756_v2  ;;  %v1889_v2 = vcombine.low %v1313_v47, %v1314_v60 }
  0xaa   : > { %v329_v38 = vpop.permute.xlu1 %328  ;;  %v317_v5 = vpop.permute.xlu0 %316  ;;  %1992 = vmatpush3.bf16.msra.mxu1 %v2365_v25  ;;  %v759_v25 = vmul.bf16 %v2472_v57, %v2278_v19  ;;  %v1218_v46 = vsel %vm790_vm5, %v1215_v10, %v1217_v39  ;;  %v1220_v54 = vsel %vm790_vm5, %v1217_v39, %v1219_v30  ;;  %v1316_v10 = vmul.bf16 %v2286_v22, %v2505_v61 }
  0xab   : > { %v2542_v26 = vrot.slane %v329_v38, %v2436_v44  ;;  %v758_v38 = vmul.bf16 %v2464_v45, %v2254_v11  ;;  %v1833_v21 = vcombine.low %v342_v31, %v343_v41  ;;  %v2569_v17 = vrot.slane %v317_v5, %v2436_v44  ;;  %2001 = vmatprep.subr.bf16.mxu1 %v2550_v53 }
  0xac   : > { %v762_v44 = vmul.bf16 %v2502_v3, %v2332_v56  ;;  %2027 = vmatprep.mubr.msk.bf16.mxu0 %vm426_vm1, %v1218_v46  ;;  %v1844_v5 = vcombine.low %v759_v25, %v760_v16  ;;  %v1315_v47 = vmul.bf16 %v2257_v12, %v2511_v9  ;;  %v1318_v41 = vmul.bf16 %v2424_v7, %v2532_v35  ;;  %v2162_v12 = vld [vmem:[%s2706_s1 + $0x40] sm:$0xff]  }
  0xad   : > { %v345_v37 = vmul.bf16 %v2542_v26, %v233_v1  ;;  %v344_v15 = vmul.bf16 %v2569_v17, %v232_v28  ;;  %1987 = vmatprep.mubr.msk.bf16.mxu1 %vm426_vm1, %v1833_v21  ;;  %v1843_v27 = vcombine.low %v757_v50, %v758_v38  ;;  %v761_v28 = vmul.bf16 %v2516_v62, %v2329_v55  ;;  %v1312_v21 = vld [vmem:[%s2244_s14 + $0x24] sm:$0xf] }
  0xae   : > { %2028 = vmatmul.mubr.msk.bf16.gmra.mrb[4].mxu0 %vm426_vm1, %v1220_v54  ;;  %v791_v1 = vrot.slane %v1842_v0, 1  ;;  %v1317_v0 = vmul.bf16 %v2289_v23, %v2535_v40  ;;  %v794_v31 = vrot.slane %v1844_v5, 1  ;;  %v763_v22 = vmul.bf16 %v2495_v42, %v2315_v43 }
  0xaf   : > { %v1834_v29 = vcombine.low %v344_v15, %v345_v37  ;;  %v792_v48 = vrot.slane %v1843_v27, 1  ;;  %2033 = vmatprep.mubr.msk.bf16.mxu0 %vm426_vm1, %v1889_v2  ;;  %v1845_v50 = vcombine.low %v761_v28, %v762_v44  ;;  %v1890_v4 = vcombine.low %v1315_v47, %v1316_v10  ;;  %v2731_v2 = vld [vmem:[#allocation4_spill] sm:$0xff] }
  0xb0   : > { %v1891_v60 = vcombine.low %v1317_v0, %v1318_v41  ;;  %v1846_v7 = vcombine.low %v763_v22, %v763_v22  ;;  %v1320_v37 = vmul.bf16 %v1312_v21, %v2542_v26  ;;  %v1319_v43 = vmul.bf16 %v2421_v6, %v2569_v17 }
  0xb1   : > { %1988 = vmatmul.mubr.msk.bf16.gmra.mrb[4].mxu1 %vm426_vm1, %v1834_v29  ;;  %v793_v30 = vsel %vm790_vm5, %v791_v1, %v792_v48  ;;  %v796_v38 = vrot.slane %v1845_v50, 1  ;;  %v795_v23 = vsel %vm790_vm5, %v792_v48, %v794_v31  ;;  %v892_v16 = vmul.bf16 %v2275_v18, %v2490_v14  ;;  %v1597_v14 = vld [vmem:[%s2244_s14 + $0x8] sm:$0xe]  ;;  %v2732_v48 = vld [vmem:[#allocation8_spill] sm:$0xff] }
  0xb2   : > { %1993 = vmatprep.mubr.msk.bf16.mxu1 %vm426_vm1, %v793_v30  ;;  %v798_v15 = vrot.slane %v1846_v7, 1  ;;  %v1892_v6 = vcombine.low %v1319_v43, %v1320_v37  ;;  %v895_v18 = vmul.bf16 %v2278_v19, %v2505_v61  ;;  %v1601_v44 = vmul.bf16 %v2382_v33, %v2464_v45  ;;  %v891_v61 = vld [vmem:[%s2244_s14 + $0x20] sm:$0xf]  ;;  %v2728_v33 = vld [vmem:[#allocation3_spill] sm:$0xff]  ;;  %s1925_s14 = sshll.u32 %s2737_s19, 6 }
  0xb3   : > { %v797_v39 = vsel %vm790_vm5, %v794_v31, %v796_v38  ;;  %v1599_v46 = vmul.bf16 %v2385_v34, %v2453_v24  ;;  %v1603_v45 = vmul.bf16 %v2728_v33, %v2476_v59  ;;  %v2729_v34 = vld [vmem:[#allocation5_spill] sm:$0xff]  ;;  %v898_v24 = vmul.bf16 %v2332_v56, %v2569_v17  ;;  %v2735_v30 = vld [vmem:[#allocation10_spill] sm:$0xff]  ;;  %s2684_s8 = scalar_lea.vmem %s2710_s5, %s1925_s14 }
  0xb4   : > { %v799_v25 = vsel %vm790_vm5, %v796_v38, %v798_v15  ;;  %v1604_v29 = vmul.bf16 %v2731_v2, %v2516_v62  ;;  %v2734_v17 = vld [vmem:[#allocation9_spill] sm:$0xff] }
  0xb6   : > { %2034 = vmatmul.mubr.msk.bf16.vlgmr.msra.gmra.mrb[0].mxu0 %vm426_vm1, %v1890_v4  ;;  %v1922_v4 = vld [vmem:[%s2709_s4] ss:$0 sm:$0xff] }
  0xb7   : > { %2042 = vmatpush3.bf16.msra.mxu0 %v2160_v49  ;;  %2037 = vmatprep.mubr.msk.bf16.mxu0 %vm426_vm1, %v1891_v60  ;;  %v893_v49 = vmul.bf16 %v2261_v13, %v2481_v63  ;;  %v1600_v13 = vmul.bf16 %v2379_v32, %v2457_v36  ;;  %v894_v63 = vmul.bf16 %v2254_v11, %v2511_v9 }
  0xb8   : > { %2051 = vmatprep.subr.bf16.mxu0 %v2162_v12  ;;  %v1598_v32 = vmul.bf16 %v1597_v14, %v2441_v58  ;;  %v899_v58 = vmul.bf16 %v891_v61, %v2542_v26  ;;  %v2733_v26 = vld [vmem:[#allocation6_spill] sm:$0xff] }
  0xb9   : > { %1994 = vmatmul.mubr.msk.bf16.vlgmr.msra.gmra.mrb[0].mxu1 %vm426_vm1, %v795_v23  ;;  %v1854_v27 = vcombine.low %v892_v16, %v893_v49  ;;  %v1855_v36 = vcombine.low %v894_v63, %v895_v18  ;;  %v1913_v11 = vcombine.low %v1600_v13, %v1601_v44 }
  0xba   : > { %2002 = vmatpush3.bf16.msra.mxu1 %v2550_v53  ;;  %1997 = vmatprep.mubr.msk.bf16.mxu1 %vm426_vm1, %v797_v39  ;;  %v897_v53 = vmul.bf16 %v2329_v55, %v2532_v35  ;;  %v2727_v55 = vld [vmem:[#allocation7_spill] sm:$0xff]  ;;  %v2730_v35 = vld [vmem:[#allocation2_spill] sm:$0xff] }
  0xbb   : > { %2061 = vmatprep.subr.bf16.mxu1 %v2239_v8  ;;  %v1634_v9 = vrot.slane %v1913_v11, 1 }
  0xbe   : > { %2038 = vmatmul.mubr.msk.bf16.gmra.mrb[4].mxu0 %vm426_vm1, %v1892_v6 }
  0xbf   : > { %2043 = vmatprep.mubr.msk.bf16.mxu0 %vm426_vm1, %v2399_v51  ;;  %v896_v51 = vmul.bf16 %v2281_v20, %v2535_v40  ;;  %v1912_v20 = vcombine.low %v1598_v32, %v1599_v46  ;;  %v1602_v40 = vmul.bf16 %v2730_v35, %v2472_v57  ;;  %v1606_v57 = vmul.bf16 %v2733_v26, %v2495_v42 }
  0xc1   : > { %1998 = vmatmul.mubr.msk.bf16.gmra.mrb[4].mxu1 %vm426_vm1, %v799_v25  ;;  %v1856_v19 = vcombine.low %v896_v51, %v897_v53  ;;  %v1633_v59 = vrot.slane %v1912_v20, 1  ;;  %v1914_v54 = vcombine.low %v1602_v40, %v1603_v45  ;;  %v1916_v1 = vcombine.low %v1606_v57, %v1606_v57 }
  0xc2   : > { %2003 = vmatprep.mubr.msk.bf16.mxu1 %vm426_vm1, %v1854_v27 }
  0xc3   : > { %v1636_v56 = vrot.slane %v1914_v54, 1  ;;  %v1640_v47 = vrot.slane %v1916_v1, 1 }
  0xc5   : > { %v1637_v5 = vsel %vm790_vm5, %v1634_v9, %v1636_v56 }
  0xc6   : > { %2044 = vmatmul.mubr.msk.bf16.vlgmr.msra.gmra.mrb[0].mxu0 %vm426_vm1, %v2402_v52  ;;  %v1605_v52 = vmul.bf16 %v2729_v34, %v2502_v3  ;;  %v1635_v3 = vsel %vm790_vm5, %v1633_v59, %v1634_v9 }
  0xc7   : > { %2052 = vmatpush3.bf16.msra.mxu0 %v2162_v12  ;;  %2047 = vmatprep.mubr.msk.bf16.mxu0 %vm426_vm1, %v2727_v55 }
  0xc8   : > { %v1915_v28 = vcombine.low %v1604_v29, %v1605_v52 }
  0xc9   : > { %2004 = vmatmul.mubr.msk.bf16.vlgmr.msra.gmra.mrb[0].mxu1 %vm426_vm1, %v1855_v36 }
  0xca   : > { %2062 = vmatpush3.bf16.msra.mxu1 %v2239_v8  ;;  %2007 = vmatprep.mubr.msk.bf16.mxu1 %vm426_vm1, %v1856_v19  ;;  %v1857_v8 = vcombine.low %v898_v24, %v899_v58  ;;  %v1638_v62 = vrot.slane %v1915_v28, 1 }
  0xcc   : > { %v1639_v10 = vsel %vm790_vm5, %v1636_v56, %v1638_v62  ;;  %v1641_v42 = vsel %vm790_vm5, %v1638_v62, %v1640_v47 }
  0xce   : > { %2048 = vmatmul.mubr.msk.bf16.gmra.mrb[4].mxu0 %vm426_vm1, %v2732_v48 }
  0xcf   : > { %2053 = vmatprep.mubr.msk.bf16.mxu0 %vm426_vm1, %v1635_v3 }
  0xd1   : > { %2008 = vmatmul.mubr.msk.bf16.gmra.mrb[4].mxu1 %vm426_vm1, %v1857_v8 }
  0xd2   : > { %2017 = vmatprep.mubr.msk.bf16.mxu1 %vm426_vm1, %v2734_v17 }
  0xd6   : > { %2054 = vmatmul.mubr.msk.bf16.vlgmr.msra.gmra.mrb[0].mxu0 %vm426_vm1, %v1637_v5 }
  0xd7   : > { %2057 = vmatprep.mubr.msk.bf16.mxu0 %vm426_vm1, %v1639_v10 }
  0xdd   : > { %2018 = vmatmul.mubr.msk.bf16.vlgmr.msra.gmra.mrb[4].mxu1 %vm426_vm1, %v2735_v30 }
  0xde   : > { %2058 = vmatmul.mubr.msk.bf16.gmra.mrb[4].mxu0 %vm426_vm1, %v1641_v42 }
 0x19c   : > { %v2005_v50 = vpop.f32.mrb[0].mxu1 }
 0x19d   : > { %v975_v41 = vpop.f32.mrb[1].mxu1 }
 0x19e   : > { %v2006_v0 = vpop.f32.mrb[2].mxu1 }
 0x19f   : > { %v978_v31 = vpop.f32.mrb[3].mxu1 }
 0x1a9   : > { %v2055_v22 = vpop.f32.mrb[0].mxu0 }
 0x1aa   : > { %v2063_v38 = vadd.f32 %v2055_v22, %v2005_v50  ;;  %v1694_v12 = vpop.f32.mrb[1].mxu0 }
 0x1ab   : > { %v2064_v60 = vadd.f32 %v1694_v12, %v975_v41  ;;  %v2056_v21 = vpop.f32.mrb[2].mxu0 }
 0x1ac   : > { %v1742_v7 = vadd.f32 %v2063_v38, %v1922_v4  ;;  %v2065_v23 = vadd.f32 %v2056_v21, %v2006_v0  ;;  %v1697_v37 = vpop.f32.mrb[3].mxu0 }
 0x1ad   : > { %v1740_v43 = vadd.f32 %v2064_v60, %v1922_v4  ;;  %v2066_v39 = vadd.f32 %v1697_v37, %v978_v31 }
 0x1ae   : > { %1750 = vst.msk [vmem:[%s2684_s8 + $0x10] sm:$0xff] %vm426_vm1, %v1742_v7  ;;  %v1743_v49 = vadd.f32 %v2065_v23, %v1922_v4 }
 0x1af   : > { %1748 = vst.msk [vmem:[%s2684_s8] sm:$0xff] %vm426_vm1, %v1740_v43  ;;  %v1741_v16 = vadd.f32 %v2066_v39, %v1922_v4 }
 0x1b0   : > { %v2019_v15 = vpop.f32.mrb[4].mxu1  ;;  %1751 = vst.msk [vmem:[%s2684_s8 + $0x18] sm:$0xff] %vm426_vm1, %v1743_v49 }
 0x1b1   : > { %v1153_v6 = vpop.f32.mrb[5].mxu1  ;;  %1749 = vst.msk [vmem:[%s2684_s8 + $0x8] sm:$0xff] %vm426_vm1, %v1741_v16  ;;  %v2059_v27 = vpop.f32.mrb[4].mxu0 }
 0x1b2   : > { %v2020_v25 = vpop.f32.mrb[6].mxu1  ;;  %v2067_v13 = vadd.f32 %v2059_v27, %v2019_v15  ;;  %v1710_v18 = vpop.f32.mrb[5].mxu0 }
 0x1b3   : > { %v1156_v63 = vpop.f32.mrb[7].mxu1  ;;  %v2068_v14 = vadd.f32 %v1710_v18, %v1153_v6  ;;  %v2060_v53 = vpop.f32.mrb[6].mxu0 }
 0x1b4   : > { %v1746_v51 = vadd.f32 %v2067_v13, %v1922_v4  ;;  %v2069_v44 = vadd.f32 %v2060_v53, %v2020_v25  ;;  %v1713_v46 = vpop.f32.mrb[7].mxu0 }
 0x1b5   : > { %v1744_v32 = vadd.f32 %v2068_v14, %v1922_v4  ;;  %v2070_v36 = vadd.f32 %v1713_v46, %v1156_v63 }
 0x1b6   : > { %1754 = vst.msk [vmem:[%s2684_s8 + $0x30] sm:$0xff] %vm426_vm1, %v1746_v51  ;;  %v1747_v11 = vadd.f32 %v2069_v44, %v1922_v4 }
 0x1b7   : > { %1752 = vst.msk [vmem:[%s2684_s8 + $0x20] sm:$0xff] %vm426_vm1, %v1744_v32  ;;  %v1745_v19 = vadd.f32 %v2070_v36, %v1922_v4 }
 0x1b8   : > { %1755 = vst.msk [vmem:[%s2684_s8 + $0x38] sm:$0xff] %vm426_vm1, %v1747_v11 }
 0x1b9   : > { %1753 = vst.msk [vmem:[%s2684_s8 + $0x28] sm:$0xff] %vm426_vm1, %v1745_v19 }
 0x1ba PF: > { %s15_s18 = sadd.s32 1, %s2170_s18  }
 0x1bb   : > { %p12_p4 = scmp.ge.s32.totalorder %s15_s18, 4  }
 0x1bd   :  { %14 = sbr.rel (!%p12_p4) target bundleno = 1 (0x1), region = 78 }

// kernel: realnvp_forward.110
= control target key start
LH: loop header
LB: loop body
LE: loop exit
PB: predicated region body
PF: predicated region fallthrough
CT: control target
= control target key end

     0   :  { %s607_s18 = smov 0   ;;  %s674_s0 = inlined_call_operand.vmem [shape: f32[128,128], index: 0, kind: input, shape index: {}]   ;;  %s675_s1 = inlined_call_operand.vmem [shape: f32[1,128], index: 1, kind: input, shape index: {}]   ;;  %s676_s2 = inlined_call_operand.vmem [shape: f32[1,128], index: 2, kind: input, shape index: {}]   ;;  %s677_s3 = inlined_call_operand.vmem [shape: bf16[128,128], index: 3, kind: input, shape index: {}]   ;;  %s678_s4 = inlined_call_operand.vmem [shape: f32[1,128], index: 4, kind: input, shape index: {}]   ;;  %s679_s5 = inlined_call_operand.vmem [shape: f32[128,128], index: 5, kind: output, shape index: {}]  }
   0x1 LB: > { %s479_s19 = sadd.s32 4294967295, %s575_s18   ;;  %p483_p0 = scmp.ge.s32.totalorder %s575_s18, 1  ;;  %s575_s18 = sphi %s607_s18, %s15_s18  }
   0x2   : > { %p188_p1 = scmp.lt.s32.totalorder %s575_s18, 3 }
   0x4   : > { %p189_p2 = pnand %p483_p0, %p188_p1 }
   0x5   : > { %v561_v0 = vld [vmem:[%s677_s3] sm:$0xff] (!%p189_p2)   ;;  %s484_s22 = sshll.u32 (!%p189_p2), %s479_s19, 3  ;;  %v562_v1 = vld [vmem:[%s677_s3 + $0x8] sm:$0xff] (!%p189_p2)   ;;  %v563_v2 = vld [vmem:[%s677_s3 + $0x10] sm:$0xff] (!%p189_p2)  }
   0x6   : > { %192 = sbr.rel (%p189_p2) target bundleno = 256 (0x100), region = 40  ;;  %p217_p3 = scmp.lt.s32.totalorder (!%p189_p2), %s484_s22, 15  ;;  %513 = vmatprep.subr.bf16.mxu0 (!%p189_p2), %v561_v0  ;;  %537 = vmatprep.subr.bf16.mxu1 (!%p189_p2), %v561_v0  ;;  %v564_v3 = vld [vmem:[%s677_s3 + $0x18] sm:$0xff] (!%p189_p2)   ;;  %v488_v6 = vld [vmem:[%s675_s1] ss:$0 sm:$0xff] (!%p189_p2)  ;;  %v566_v28 = vld [vmem:[%s677_s3 + $0x28] sm:$0xff] (!%p189_p2)  }
   0x7   : > { %514 = vmatpush3.bf16.msra.mxu0 (!%p189_p2), %v561_v0  ;;  %545 = vmatpush3.bf16.msra.mxu1 (!%p189_p2), %v561_v0  ;;  %v489_v9 = vld [vmem:[%s676_s2] ss:$0 sm:$0xff] (!%p189_p2)  ;;  %v567_v34 = vld [vmem:[%s677_s3 + $0x30] sm:$0xff] (!%p189_p2)   ;;  %v568_v39 = vld [vmem:[%s677_s3 + $0x38] sm:$0xff] (!%p189_p2)  }
   0x8   : > { %515 = vmatprep.subr.bf16.mxu0 (!%p189_p2), %v562_v1  ;;  %538 = vmatprep.subr.bf16.mxu1 (!%p189_p2), %v562_v1  ;;  %v565_v16 = vld [vmem:[%s677_s3 + $0x20] sm:$0xff] (!%p189_p2)  }
   0x9   : > { %v490_v46 = vld [vmem:[%s678_s4] ss:$0 sm:$0xff] (!%p189_p2) }
   0xb   : > { %516 = vmatpush3.bf16.msra.mxu0 (!%p189_p2), %v562_v1  ;;  %546 = vmatpush3.bf16.msra.mxu1 (!%p189_p2), %v562_v1 }
   0xc   : > { %517 = vmatprep.subr.bf16.mxu0 (!%p189_p2), %v563_v2  ;;  %539 = vmatprep.subr.bf16.mxu1 (!%p189_p2), %v563_v2 }
   0xd   : > { %s681_s22 = smov (!%p217_p3, %s484_s22), 15 }
   0xe   : > { %s485_s27 = sshll.u32 %s681_s22, 3 }
   0xf   : > { %s632_s30 = scalar_lea.vmem %s674_s0, %s485_s27  ;;  %518 = vmatpush3.bf16.msra.mxu0 %v563_v2  ;;  %547 = vmatpush3.bf16.msra.mxu1 %v563_v2  ;;  %s226_s26 = scalar_lea.vmem %s679_s5, %s485_s27 }
  0x10   : > { %v229_v4 = vld [vmem:[%s632_s30] sm:$0xff]  ;;  %v230_v5 = vld [vmem:[%s632_s30 + $0x8] sm:$0xff]  ;;  %519 = vmatprep.subr.bf16.mxu0 %v564_v3  ;;  %540 = vmatprep.subr.bf16.mxu1 %v564_v3  ;;  %v231_v23 = vld [vmem:[%s632_s30 + $0x10] sm:$0xff] }
  0x11   : > { %v244_v7 = vmul.f32 %v488_v6, %v229_v4  ;;  %v245_v8 = vmul.f32 %v488_v6, %v230_v5  ;;  %v233_v10 = vld [vmem:[%s632_s30 + $0x20] sm:$0xff]  ;;  %v234_v11 = vld [vmem:[%s632_s30 + $0x28] sm:$0xff]  ;;  %v232_v25 = vld [vmem:[%s632_s30 + $0x18] sm:$0xff]  ;;  %v246_v30 = vmul.f32 %v488_v6, %v231_v23 }
  0x12   : > { %v248_v12 = vmul.f32 %v488_v6, %v233_v10  ;;  %v249_v13 = vmul.f32 %v488_v6, %v234_v11  ;;  %v235_v26 = vld [vmem:[%s632_s30 + $0x30] sm:$0xff]  ;;  %v236_v27 = vld [vmem:[%s632_s30 + $0x38] sm:$0xff]  ;;  %v247_v31 = vmul.f32 %v488_v6, %v232_v25 }
  0x13   : > { %v259_v14 = vadd.f32 %v489_v9, %v244_v7  ;;  %v260_v15 = vadd.f32 %v489_v9, %v245_v8  ;;  %520 = vmatpush3.bf16.msra.mxu0 %v564_v3  ;;  %548 = vmatpush3.bf16.msra.mxu1 %v564_v3  ;;  %v250_v32 = vmul.f32 %v488_v6, %v235_v26 }
  0x14   : > { %v263_v17 = vadd.f32 %v489_v9, %v248_v12  ;;  %v264_v18 = vadd.f32 %v489_v9, %v249_v13  ;;  %521 = vmatprep.subr.bf16.mxu0 %v565_v16  ;;  %541 = vmatprep.subr.bf16.mxu1 %v565_v16  ;;  %v251_v33 = vmul.f32 %v488_v6, %v236_v27 }
  0x15   : > { %v267_v19 = vmax.f32 %v259_v14, 0.0  ;;  %v268_v20 = vmax.f32 %v260_v15, 0.0  ;;  %v261_v35 = vadd.f32 %v489_v9, %v246_v30  ;;  %v262_v36 = vadd.f32 %v489_v9, %v247_v31 }
  0x16   : > { %v271_v21 = vmax.f32 %v263_v17, 0.0  ;;  %v272_v22 = vmax.f32 %v264_v18, 0.0  ;;  %v265_v37 = vadd.f32 %v489_v9, %v250_v32  ;;  %v266_v38 = vadd.f32 %v489_v9, %v251_v33 }
  0x17   : > { %v275_v24 = vpack.c.bf16 %v268_v20, %v267_v19  ;;  %522 = vmatpush3.bf16.msra.mxu0 %v565_v16  ;;  %549 = vmatpush3.bf16.msra.mxu1 %v565_v16  ;;  %v269_v40 = vmax.f32 %v261_v35, 0.0  ;;  %v270_v41 = vmax.f32 %v262_v36, 0.0 }
  0x18   : > { %v277_v29 = vpack.c.bf16 %v272_v22, %v271_v21  ;;  %523 = vmatprep.subr.bf16.mxu0 %v566_v28  ;;  %542 = vmatprep.subr.bf16.mxu1 %v566_v28  ;;  %v273_v42 = vmax.f32 %v265_v37, 0.0  ;;  %v274_v43 = vmax.f32 %v266_v38, 0.0 }
  0x19   : > { %529 = vmatprep.mubr.bf16.mxu0 %v275_v24  ;;  %v276_v44 = vpack.c.bf16 %v270_v41, %v269_v40 }
  0x1a   : > { %533 = vmatprep.mubr.bf16.mxu1 %v277_v29  ;;  %v278_v45 = vpack.c.bf16 %v274_v43, %v273_v42 }
  0x1b   : > { %524 = vmatpush3.bf16.msra.mxu0 %v566_v28  ;;  %550 = vmatpush3.bf16.msra.mxu1 %v566_v28 }
  0x1c   : > { %525 = vmatprep.subr.bf16.mxu0 %v567_v34  ;;  %543 = vmatprep.subr.bf16.mxu1 %v567_v34 }
  0x1f   : > { %526 = vmatpush3.bf16.msra.mxu0 %v567_v34  ;;  %551 = vmatpush3.bf16.msra.mxu1 %v567_v34 }
  0x20   : > { %527 = vmatprep.subr.bf16.mxu0 %v568_v39  ;;  %544 = vmatprep.subr.bf16.mxu1 %v568_v39 }
  0x23   : > { %528 = vmatpush3.bf16.msra.mxu0 %v568_v39  ;;  %552 = vmatpush3.bf16.msra.mxu1 %v568_v39 }
  0x26   : > { %530 = vmatmul.mubr.bf16.vlgmr.msra.gmra.mrb[0].mxu0 %v276_v44  ;;  %534 = vmatmul.mubr.bf16.vlgmr.msra.gmra.mrb[0].mxu1 %v278_v45 }
  0xf9   : > { %v531_v47 = vpop.f32.mrb[0].mxu0  ;;  %v535_v48 = vpop.f32.mrb[0].mxu1 }
  0xfa   : > { %v393_v49 = vadd.f32 %v531_v47, %v490_v46  ;;  %v409_v50 = vadd.f32 %v535_v48, %v490_v46  ;;  %v384_v51 = vpop.f32.mrb[1].mxu0  ;;  %v400_v52 = vpop.f32.mrb[1].mxu1 }
  0xfb   : > { %v385_v53 = vadd.f32 %v490_v46, %v384_v51  ;;  %v401_v54 = vadd.f32 %v490_v46, %v400_v52  ;;  %v532_v55 = vpop.f32.mrb[2].mxu0  ;;  %v536_v56 = vpop.f32.mrb[2].mxu1 }
  0xfc   : > { %417 = vst [vmem:[%s226_s26 + $0x10] sm:$0xff] %v393_v49  ;;  %421 = vst [vmem:[%s226_s26 + $0x30] sm:$0xff] %v409_v50  ;;  %v396_v57 = vadd.f32 %v532_v55, %v490_v46  ;;  %v412_v58 = vadd.f32 %v536_v56, %v490_v46  ;;  %v387_v59 = vpop.f32.mrb[3].mxu0  ;;  %v403_v60 = vpop.f32.mrb[3].mxu1 }
  0xfd   : > { %415 = vst [vmem:[%s226_s26] sm:$0xff] %v385_v53  ;;  %419 = vst [vmem:[%s226_s26 + $0x20] sm:$0xff] %v401_v54  ;;  %v388_v61 = vadd.f32 %v490_v46, %v387_v59  ;;  %v404_v62 = vadd.f32 %v490_v46, %v403_v60 }
  0xfe   : > { %418 = vst [vmem:[%s226_s26 + $0x18] sm:$0xff] %v396_v57  ;;  %422 = vst [vmem:[%s226_s26 + $0x38] sm:$0xff] %v412_v58 }
  0xff   : > { %416 = vst [vmem:[%s226_s26 + $0x8] sm:$0xff] %v388_v61  ;;  %420 = vst [vmem:[%s226_s26 + $0x28] sm:$0xff] %v404_v62 }
 0x100 PF: > { %s15_s18 = sadd.s32 1, %s575_s18  }
 0x101   : > { %p12_p4 = scmp.ge.s32.totalorder %s15_s18, 4  }
 0x103   :  { %14 = sbr.rel (!%p12_p4) target bundleno = 1 (0x1), region = 70 }

// kernel: realnvp_forward.111
= control target key start
LH: loop header
LB: loop body
LE: loop exit
PB: predicated region body
PF: predicated region fallthrough
CT: control target
= control target key end

     0   :  { %v28_v0 = vlaneseq  ;;  %s154_s1 = inlined_call_operand.vmem [shape: f32[8,256], index: 1, kind: input, shape index: {}]   ;;  %s155_s3 = inlined_call_operand.vmem [shape: f32[1,256], index: 3, kind: input, shape index: {}, may-alias: {3,4}]   ;;  %s156_s4 = inlined_call_operand.vmem [shape: f32[1,256], index: 4, kind: input, shape index: {}, may-alias: {3,4}]   ;;  %s157_s2 = inlined_call_operand.vmem [shape: f32[8,256], index: 2, kind: input, shape index: {}]   ;;  %s158_s6 = inlined_call_operand.vmem [shape: f32[8,128], index: 6, kind: output, shape index: {1}]   ;;  %s159_s0 = inlined_call_operand.vmem [shape: f32[8,256], index: 0, kind: input, shape index: {}]   ;;  %s160_s5 = inlined_call_operand.vmem [shape: f32[8,256], index: 5, kind: output, shape index: {0}]  }
   0x1   :  { %v23_v1 = vld [vmem:[%s154_s1] sm:$0xff]  ;;  %v24_v3 = vld [vmem:[%s154_s1 + $0x8] sm:$0xff] }
   0x2   :  { %78 = vtanh.f32 %v23_v1  ;;  %v29_v2 = vshrl.u32 %v28_v0, 7  ;;  %v22_v5 = vld [vmem:[%s155_s3] sm:$0x3]  ;;  %v41_v20 = vld [vmem:[%s157_s2 + $0x8] sm:$0xff] }
   0x3   :  { %80 = vtanh.f32 %v24_v3  ;;  %v42_v12 = vld [vmem:[%s156_s4] sm:$0x3]  ;;  %v57_v24 = vld [vmem:[%s159_s0 + $0x8] sm:$0xff] }
   0x4   :  { %v30_v4 = vsub.s32 0, %v29_v2  ;;  %v34_v6 = vsub.s32 1, %v29_v2  ;;  %v40_v18 = vld [vmem:[%s157_s2] sm:$0xff] }
   0x5   :  { %v56_v22 = vld [vmem:[%s159_s0] sm:$0xff] }
   0x6   :  { %v31_v7 = vrot.slane %v22_v5, %v30_v4  ;;  %v35_v8 = vrot.slane %v22_v5, %v34_v6  ;;  %v47_v15 = vrot.slane %v42_v12, %v30_v4  ;;  %v51_v19 = vrot.slane %v42_v12, %v34_v6 }
   0x8   :  { %v54_v21 = vmul.f32 %v47_v15, %v40_v18  ;;  %v55_v23 = vmul.f32 %v51_v19, %v41_v20 }
   0xa   :  { %v58_v25 = vadd.f32 %v56_v22, %v54_v21  ;;  %v59_v26 = vadd.f32 %v57_v24, %v55_v23 }
   0xc   :  { %v79_v9 = vpop.eup %78 }
   0xd   :  { %v81_v10 = vpop.eup %80  ;;  %v38_v11 = vmul.f32 %v79_v9, %v31_v7 }
   0xe   :  { %v39_v13 = vmul.f32 %v81_v10, %v35_v8 }
   0xf   :  { %v60_v14 = vmul.f32 1.442695, %v38_v11 }
  0x10   :  { %v62_v16 = vmul.f32 1.442695, %v39_v13  ;;  %v68_v17 = vadd.f32 %v39_v13, %v38_v11 }
  0x11   :  { %82 = vpow2.f32 %v60_v14 }
  0x12   :  { %84 = vpow2.f32 %v62_v16  ;;  %69 = vst [vmem:[%s158_s6] sm:$0xff] %v68_v17 }
  0x1b   :  { %v83_v27 = vpop.eup %82 }
  0x1c   :  { %v85_v28 = vpop.eup %84  ;;  %v64_v29 = vmul.f32 %v83_v27, %v58_v25 }
  0x1d   :  { %v65_v30 = vmul.f32 %v85_v28, %v59_v26 }
  0x1e   :  { %66 = vst [vmem:[%s160_s5] sm:$0xff] %v64_v29 }
  0x1f   :  { %67 = vst [vmem:[%s160_s5 + $0x8] sm:$0xff] %v65_v30 }

// kernel: realnvp_forward.133
= control target key start
LH: loop header
LB: loop body
LE: loop exit
PB: predicated region body
PF: predicated region fallthrough
CT: control target
= control target key end

     0   :  { %s378_s12 = smov 0   ;;  %s404_s0 = inlined_call_operand.vmem [shape: bf16[32,32], index: 0, kind: input, shape index: {}]   ;;  %s405_s1 = inlined_call_operand.vmem [shape: bf16[32,128], index: 1, kind: input, shape index: {}]   ;;  %s406_s2 = inlined_call_operand.vmem [shape: f32[1,128], index: 2, kind: input, shape index: {}]   ;;  %s407_s3 = inlined_call_operand.vmem [shape: f32[32,128], index: 3, kind: output, shape index: {}]  }
   0x1 LB: > { %s308_s13 = sadd.s32 4294967295, %s354_s12   ;;  %p312_p0 = scmp.ge.s32.totalorder %s354_s12, 1  ;;  %s354_s12 = sphi %s378_s12, %s13_s12  }
   0x2   : > { %p138_p1 = scmp.lt.s32.totalorder %s354_s12, 3 }
   0x4   : > { %p139_p2 = pnand %p312_p0, %p138_p1 }
   0x5   : > { %v345_v0 = vld [vmem:[%s405_s1] sm:$0xff] (!%p139_p2)   ;;  %v356_v1 = vmov (!%p139_p2), 0.0   ;;  %v346_v2 = vld [vmem:[%s405_s1 + $0x8] sm:$0xff] (!%p139_p2)   ;;  %vm357_vm0 = vmmov (!%p139_p2), 0   ;;  %s313_s18 = sshll.u32 (!%p139_p2), %s308_s13, 1  ;;  %vm205_vm1 = vcmask (!%p139_p2), 261120  }
   0x6   : > { %142 = sbr.rel (%p139_p2) target bundleno = 234 (0xea), region = 32  ;;  %327 = vmatprep.subr.bf16.mxu0 (!%p139_p2), %v356_v1  ;;  %331 = vmatprep.mubr.msk.bf16.mxu0 (!%p139_p2), %vm357_vm0, %v356_v1  ;;  %p163_p3 = scmp.lt.s32.totalorder (!%p139_p2), %s313_s18, 3  ;;  %v317_v4 = vld [vmem:[%s406_s2] ss:$0 sm:$0xff] (!%p139_p2) }
   0x7   : > { %328 = vmatpush3.bf16.msra.mxu0 (!%p139_p2), %v345_v0 }
   0x8   : > { %329 = vmatprep.subr.bf16.mxu0 (!%p139_p2), %v356_v1 }
   0xb   : > { %330 = vmatpush3.bf16.msra.mxu0 (!%p139_p2), %v346_v2 }
   0xd   : > { %s409_s18 = smov (!%p163_p3, %s313_s18), 3 }
   0xe   : > { %s314_s19 = sshll.u32 %s409_s18, 2  ;;  %s316_s23 = sshll.u32 %s409_s18, 3 }
   0xf   : > { %s166_s22 = scalar_lea.vmem %s404_s0, %s314_s19  ;;  %s172_s28 = scalar_lea.vmem %s407_s3, %s316_s23 }
  0x10   : > { %v347_v3 = vld [vmem:[%s166_s22] sm:$0xff]  }
  0x11   : > { %332 = vmatmul.mubr.msk.bf16.vlgmr.msra.gmra.mrb[0].mxu0 %vm205_vm1, %v347_v3 }
  0xe4   : > { %v243_v5 = vpop.f32.mrb[0].mxu0 }
  0xe5   : > { %v244_v6 = vadd.f32 %v317_v4, %v243_v5  ;;  %v333_v7 = vpop.f32.mrb[1].mxu0 }
  0xe6   : > { %v246_v8 = vpop.f32.mrb[2].mxu0 }
  0xe7   : > { %250 = vst [vmem:[%s172_s28] sm:$0xff] %v244_v6  ;;  %v247_v9 = vadd.f32 %v317_v4, %v246_v8  ;;  %v334_v10 = vpop.f32.mrb[3].mxu0 }
  0xe9   : > { %251 = vst [vmem:[%s172_s28 + $0x8] sm:$0xff] %v247_v9 }
  0xea PF: > { %s13_s12 = sadd.s32 1, %s354_s12  }
  0xeb   : > { %p10_p4 = scmp.ge.s32.totalorder %s13_s12, 4  }
  0xed   :  { %12 = sbr.rel (!%p10_p4) target bundleno = 1 (0x1), region = 62 }

// kernel: realnvp_forward.136
= control target key start
LH: loop header
LB: loop body
LE: loop exit
PB: predicated region body
PF: predicated region fallthrough
CT: control target
= control target key end

     0   :  { %s450_s15 = smov 0   ;;  %s479_s0 = inlined_call_operand.vmem [shape: bf16[32,32], index: 0, kind: input, shape index: {}]   ;;  %s480_s1 = inlined_call_operand.vmem [shape: bf16[32,128], index: 1, kind: input, shape index: {}]   ;;  %s481_s2 = inlined_call_operand.vmem [shape: f32[1,128], index: 2, kind: input, shape index: {}]   ;;  %s482_s3 = inlined_call_operand.vmem [shape: f32[32,128], index: 3, kind: input, shape index: {}, may-alias: {3,4}]   ;;  %s483_s4 = inlined_call_operand.vmem [shape: f32[32,128], index: 4, kind: output, shape index: {}, may-alias: {3,4}]  }
   0x1 LB: > { %s373_s16 = sadd.s32 4294967295, %s421_s15   ;;  %p377_p0 = scmp.ge.s32.totalorder %s421_s15, 1  ;;  %s421_s15 = sphi %s450_s15, %s14_s15  }
   0x2   : > { %p174_p1 = scmp.lt.s32.totalorder %s421_s15, 3 }
   0x4   : > { %p175_p2 = pnand %p377_p0, %p174_p1 }
   0x5   : > { %v412_v0 = vld [vmem:[%s480_s1] sm:$0xff] (!%p175_p2)   ;;  %v423_v1 = vmov (!%p175_p2), 0.0   ;;  %v413_v2 = vld [vmem:[%s480_s1 + $0x8] sm:$0xff] (!%p175_p2)   ;;  %vm424_vm0 = vmmov (!%p175_p2), 0   ;;  %s378_s21 = sshll.u32 (!%p175_p2), %s373_s16, 1  ;;  %vm254_vm1 = vcmask (!%p175_p2), 261120  }
   0x6   : > { %178 = sbr.rel (%p175_p2) target bundleno = 236 (0xec), region = 36  ;;  %394 = vmatprep.subr.bf16.mxu0 (!%p175_p2), %v423_v1  ;;  %398 = vmatprep.mubr.msk.bf16.mxu0 (!%p175_p2), %vm424_vm0, %v423_v1  ;;  %p206_p3 = scmp.lt.s32.totalorder (!%p175_p2), %s378_s21, 3  ;;  %v384_v4 = vld [vmem:[%s481_s2] ss:$0 sm:$0xff] (!%p175_p2) }
   0x7   : > { %395 = vmatpush3.bf16.msra.mxu0 (!%p175_p2), %v412_v0 }
   0x8   : > { %396 = vmatprep.subr.bf16.mxu0 (!%p175_p2), %v423_v1 }
   0xb   : > { %397 = vmatpush3.bf16.msra.mxu0 (!%p175_p2), %v413_v2 }
   0xd   : > { %s485_s21 = smov (!%p206_p3, %s378_s21), 3 }
   0xe   : > { %s379_s22 = sshll.u32 %s485_s21, 2  ;;  %s381_s26 = sshll.u32 %s485_s21, 3 }
   0xf   : > { %s209_s25 = scalar_lea.vmem %s479_s0, %s379_s22  ;;  %s215_s29 = scalar_lea.vmem %s482_s3, %s381_s26 }
  0x10   : > { %v414_v3 = vld [vmem:[%s209_s25] sm:$0xff]   ;;  %s221_s8 = scalar_lea.vmem %s483_s4, %s381_s26  ;;  %v300_v10 = vld [vmem:[%s215_s29 + $0x8] sm:$0xff] }
  0x11   : > { %399 = vmatmul.mubr.msk.bf16.vlgmr.msra.gmra.mrb[0].mxu0 %vm254_vm1, %v414_v3  ;;  %v299_v6 = vld [vmem:[%s215_s29] sm:$0xff] }
  0xe4   : > { %v292_v5 = vpop.f32.mrb[0].mxu0 }
  0xe5   : > { %v293_v7 = vadd.f32 %v384_v4, %v292_v5  ;;  %v400_v8 = vpop.f32.mrb[1].mxu0 }
  0xe6   : > { %v295_v9 = vpop.f32.mrb[2].mxu0 }
  0xe7   : > { %v301_v11 = vadd.f32 %v299_v6, %v293_v7  ;;  %v296_v12 = vadd.f32 %v384_v4, %v295_v9  ;;  %v401_v13 = vpop.f32.mrb[3].mxu0 }
  0xe9   : > { %v302_v14 = vadd.f32 %v300_v10, %v296_v12  ;;  %303 = vst [vmem:[%s221_s8] sm:$0xff] %v301_v11 }
  0xeb   : > { %304 = vst [vmem:[%s221_s8 + $0x8] sm:$0xff] %v302_v14 }
  0xec PF: > { %s14_s15 = sadd.s32 1, %s421_s15  }
  0xed   : > { %p11_p4 = scmp.ge.s32.totalorder %s14_s15, 4  }
  0xef   :  { %13 = sbr.rel (!%p11_p4) target bundleno = 1 (0x1), region = 69 }

// kernel: realnvp_forward.134
= control target key start
LH: loop header
LB: loop body
LE: loop exit
PB: predicated region body
PF: predicated region fallthrough
CT: control target
= control target key end

     0   :  { %s1365_s18 = smov 0   ;;  %s1589_s0 = inlined_call_operand.vmem [shape: bf16[2,26,32], index: 0, kind: input, shape index: {}]   ;;  %s1590_s1 = inlined_call_operand.vmem [shape: bf16[9,32,32], index: 1, kind: input, shape index: {}]   ;;  %s1591_s2 = inlined_call_operand.vmem [shape: bf16[16,1], index: 2, kind: input, shape index: {}]   ;;  %s1592_s3 = inlined_call_operand.vmem [shape: bf16[16,1], index: 3, kind: input, shape index: {}]   ;;  %s1593_s4 = inlined_call_operand.vmem [shape: f32[1,32], index: 4, kind: input, shape index: {}]   ;;  %s1594_s5 = inlined_call_operand.vmem [shape: f32[2,16,32], index: 5, kind: output, shape index: {}]  }
   0x1 LB: > { %s1097_s19 = sadd.s32 4294967295, %s1329_s18   ;;  %p1101_p0 = scmp.ge.s32.totalorder %s1329_s18, 1  ;;  %s1329_s18 = sphi %s1365_s18, %s15_s18  }
   0x2   : > { %p187_p1 = scmp.lt.s32.totalorder %s1329_s18, 3 }
   0x4   : > { %p188_p2 = pnand %p1101_p0, %p187_p1 }
   0x5   : > { %v408_v0 = vld [vmem:[%s1592_s3] sm:$0xf] (!%p188_p2)  ;;  %v1331_v2 = vmov (!%p188_p2), 0   ;;  %v409_v3 = vld [vmem:[%s1592_s3 + $0x4] sm:$0xf] (!%p188_p2)  ;;  %v1299_v5 = vld [vmem:[%s1590_s1 + $0x10] sm:$0xff] (!%p188_p2)   ;;  %v238_v38 = vlaneseq (!%p188_p2) }
   0x6   : > { %191 = sbr.rel (%p188_p2) target bundleno = 395 (0x18b), region = 40  ;;  %v228_v1 = vld [vmem:[%s1591_s2] sm:$0xf] (!%p188_p2)  ;;  %1298 = vset.pattern.permute.xlu1 (!%p188_p2), %v1331_v2  ;;  %1297 = vset.pattern.permute.xlu0 (!%p188_p2), %v1331_v2  ;;  %v229_v4 = vld [vmem:[%s1591_s2 + $0x4] sm:$0xf] (!%p188_p2)  ;;  %v1332_v6 = vmov (!%p188_p2), 0.0  }
   0x7   : > { %412 = vperm.xlu0 (!%p188_p2), %1297, %v408_v0   ;;  %232 = vperm.xlu1 (!%p188_p2), %1298, %v228_v1   ;;  %p215_p3 = scmp.lt.s32.totalorder (!%p188_p2), %s1097_s19, 1  ;;  %v1301_v7 = vld [vmem:[%s1590_s1 + $0x18] sm:$0xff] (!%p188_p2)   ;;  %v1302_v8 = vld [vmem:[%s1590_s1] sm:$0xff] (!%p188_p2)   ;;  %vm1333_vm0 = vmmov (!%p188_p2), 0   ;;  %v1308_v15 = vld [vmem:[%s1590_s1 + $0x8] sm:$0xff] (!%p188_p2)   ;;  %vm301_vm2 = vcmask (!%p188_p2), 261120  }
   0x8   : > { %1213 = vmatprep.subr.bf16.mxu0 (!%p188_p2), %v1332_v6  ;;  %1221 = vmatprep.subr.bf16.mxu1 (!%p188_p2), %v1332_v6  ;;  %vm276_vm1 = vsmask.f32 (!%p188_p2), 7424  ;;  %v1309_v21 = vld [vmem:[%s1590_s1 + $0x20] sm:$0xff] (!%p188_p2)   ;;  %v1311_v24 = vld [vmem:[%s1590_s1 + $0x28] sm:$0xff] (!%p188_p2)   ;;  %v1334_v36 = vmov (!%p188_p2), 839922192  }
   0x9   : > { %1214 = vmatpush3.bf16.msra.mxu0 (!%p188_p2), %v1299_v5  ;;  %1222 = vmatpush3.bf16.msra.mxu1 (!%p188_p2), %v1302_v8  ;;  %v236_v37 = vunpack.c.l.s4 (!%p188_p2), %v1334_v36  ;;  %v239_v40 = vshrl.u32 (!%p188_p2), %v238_v38, 7  ;;  %vm436_vm3 = vcmask (!%p188_p2), 1040384   ;;  %vm437_vm4 = vcmask (!%p188_p2), 1044484  }
   0xa   : > { %1215 = vmatprep.subr.bf16.mxu0 (!%p188_p2), %v1332_v6  ;;  %1223 = vmatprep.subr.bf16.mxu1 (!%p188_p2), %v1332_v6  ;;  %vm529_vm5 = vcmask (!%p188_p2), 1041408   ;;  %vm530_vm6 = vcmask (!%p188_p2), 1045508   ;;  %vm438_vm7 = vmor (!%p188_p2), %vm436_vm3, %vm437_vm4  ;;  %vm707_vm8 = vcmask (!%p188_p2), 1042432   ;;  %vm708_vm9 = vcmask (!%p188_p2), 1046532  }
   0xb   : > { %424 = vperm.xlu0 (!%p188_p2), %1297, %v409_v3   ;;  %244 = vperm.xlu1 (!%p188_p2), %1298, %v229_v4   ;;  %v237_v39 = vunpack.c.0.s8 (!%p188_p2), %v236_v37  ;;  %vm1474_vm10 = vmor (!%p188_p2), %vm529_vm5, %vm530_vm6  ;;  %vm463_vm12 = vcmask (!%p188_p2), 1046528   ;;  %vm556_vm13 = vcmask (!%p188_p2), 1045504   ;;  %vm630_vm14 = vsmask.f32 (!%p188_p2), 5376 }
   0xc   : > { %1217 = vmatprep.mubr.msk.bf16.mxu0 (!%p188_p2), %vm1333_vm0, %v1332_v6  ;;  %1225 = vmatprep.mubr.msk.bf16.mxu1 (!%p188_p2), %vm1333_vm0, %v1332_v6  ;;  %vm709_vm11 = vmor (!%p188_p2), %vm707_vm8, %vm708_vm9  ;;  %vm734_vm15 = vcmask (!%p188_p2), 1044480  }
   0xd   : > { %s1598_s19 = smov (!%p215_p3, %s1097_s19), 1  ;;  %1216 = vmatpush3.bf16.msra.mxu0 %v1301_v7  ;;  %1224 = vmatpush3.bf16.msra.mxu1 %v1308_v15  ;;  %v240_v41 = vsub.s32 %v237_v39, %v239_v40  ;;  %v1313_v39 = vld [vmem:[%s1590_s1 + $0x40] sm:$0xff]  }
   0xe   : > { %s1184_s9 = sshll.u32 %s1598_s19, 4  ;;  %1229 = vmatprep.subr.bf16.mxu0 %v1332_v6  ;;  %1237 = vmatprep.subr.bf16.mxu1 %v1332_v6 }
   0xf   : > { %s1406_s12 = scalar_lea.vmem %s1589_s0, %s1184_s9  ;;  %s224_s27 = scalar_lea.vmem %s1594_s5, %s1184_s9 }
  0x10   : > { %v1410_v9 = vld [vmem:[%s1406_s12 + $0x8] sm:$0x1]  ;;  %v1413_v10 = vld [vmem:[%s1406_s12 + $0x4] sm:$0xf]  ;;  %v260_v12 = vld [vmem:[%s1406_s12] sm:$0xf] }
  0x11   : > { %v1111_v11 = vcombine.low %v1410_v9, %v1410_v9  ;;  %v1110_v13 = vcombine.low %v260_v12, %v1413_v10  ;;  %v867_v23 = vld [vmem:[%s1406_s12 + $0x4] sm:$0xf]  ;;  %v1440_v25 = vld [vmem:[%s1406_s12 + $0x8] sm:$0xf]  ;;  %v1443_v26 = vld [vmem:[%s1406_s12 + $0xc] sm:$0x1] }
  0x12   : > { %v1167_v27 = vcombine.low %v867_v23, %v1440_v25  ;;  %v1168_v28 = vcombine.low %v1443_v26, %v1443_v26  ;;  %v226_v47 = vld [vmem:[%s1406_s12] sm:$0xf]  ;;  %v618_v53 = vld [vmem:[%s1406_s12 + $0x8] sm:$0x7]  ;;  %v227_v56 = vld [vmem:[%s1406_s12 + $0x4] sm:$0xf] }
  0x13   : > { %v285_v14 = vshll.u32 %v1111_v11, 16  ;;  %v278_v16 = vshrl.u32 %v1110_v13, 16  ;;  %v280_v17 = vshll.u32 %v1110_v13, 16  ;;  %v525_v48 = vld [vmem:[%s1406_s12] sm:$0xc]  ;;  %v1142_v55 = vcombine.low %v618_v53, %v618_v53  ;;  %v1310_v12 = vld [vmem:[%s1590_s1 + $0x30] sm:$0xff]  }
  0x14   : > { %v886_v29 = vshll.u32 %v1167_v27, 16  ;;  %v891_v30 = vshll.u32 %v1168_v28, 16  ;;  %v884_v31 = vshrl.u32 %v1167_v27, 16  ;;  %v1141_v52 = vcombine.low %v525_v48, %v1413_v10  ;;  %v407_v59 = vld [vmem:[%s1406_s12] sm:$0xe] }
  0x15   : > { %v282_v18 = vrot.slane %v280_v17, 1  ;;  %v287_v19 = vrot.slane %v285_v14, 1  ;;  %v640_v11 = vshrl.u32 %v1142_v55, 16  ;;  %v643_v15 = vshll.u32 %v1142_v55, 16  ;;  %v953_v2 = vld [vmem:[%s1406_s12 + $0x4] sm:$0xe] }
  0x16   : > { %v893_v32 = vrot.slane %v891_v30, 1  ;;  %v888_v33 = vrot.slane %v886_v29, 1  ;;  %v632_v0 = vshrl.u32 %v1141_v52, 16  ;;  %v635_v5 = vshll.u32 %v1141_v52, 16 }
  0x17   : > { %v283_v20 = vor.u32 %v282_v18, %v278_v16  ;;  %v642_v37 = vrot.slane %v640_v11, 2  ;;  %v645_v38 = vrot.slane %v643_v15, 3 }
  0x18   : > { %v889_v34 = vor.u32 %v888_v33, %v884_v31  ;;  %v634_v27 = vrot.slane %v632_v0, 2  ;;  %v637_v31 = vrot.slane %v635_v5, 3  ;;  %v1318_v0 = vld [vmem:[%s1590_s1 + $0x70] sm:$0xff]  }
  0x19   : > { %v288_v22 = vsel %vm276_vm1, %v283_v20, %v287_v19  ;;  %v526_v20 = vld [vmem:[%s1406_s12 + $0x8] sm:$0x3] }
  0x1a   : > { %1218 = vmatmul.mubr.msk.bf16.vlgmr.msra.gmra.mrb[0].mxu0 %vm301_vm2, %v288_v22  ;;  %v1450_v35 = vsel %vm276_vm1, %v889_v34, %v893_v32  ;;  %v706_v34 = vld [vmem:[%s1406_s12] sm:$0x8]  ;;  %v638_v52 = vor.u32 %v637_v31, %v634_v27 }
  0x1b   : > { %1230 = vmatpush3.bf16.msra.mxu0 %v1309_v21  ;;  %1233 = vmatprep.mubr.msk.bf16.mxu0 %vm1333_vm0, %v1332_v6 }
  0x1c   : > { %1231 = vmatprep.subr.bf16.mxu0 %v1332_v6 }
  0x1f   : > { %1232 = vmatpush3.bf16.msra.mxu0 %v1311_v24 }
  0x20   : > { %1245 = vmatprep.subr.bf16.mxu0 %v1332_v6 }
  0x86   : > { %v413_v42 = vpop.permute.xlu0 %412  ;;  %v233_v43 = vpop.permute.xlu1 %232 }
  0x87   : > { %v1452_v44 = vrot.slane %v413_v42, %v240_v41  ;;  %v1454_v45 = vrot.slane %v233_v43, %v240_v41 }
  0x89   : > { %v1457_v46 = vrot.slane %v1452_v44, 7  ;;  %v532_v49 = vrot.slane %v1454_v45, 6  ;;  %v254_v57 = vmul.bf16 %v1454_v45, %v226_v47  ;;  %v710_v61 = vrot.slane %v1452_v44, 5 }
  0x8a   : > { %v425_v50 = vpop.permute.xlu0 %424  ;;  %v245_v51 = vpop.permute.xlu1 %244 }
  0x8b   : > { %v433_v54 = vrot.slane %v425_v50, %v240_v41  ;;  %v1468_v58 = vrot.slane %v245_v51, %v240_v41  ;;  %v440_v60 = vrot.slane %v1457_v46, 4  ;;  %v533_v62 = vrot.slane %v532_v49, 4  ;;  %v1314_v50 = vld [vmem:[%s1590_s1 + $0x50] sm:$0xff]   ;;  %v1315_v51 = vld [vmem:[%s1590_s1 + $0x48] sm:$0xff]  }
  0x8c   : > { %v447_v13 = vmul.bf16 %v1457_v46, %v407_v59  ;;  %v711_v17 = vrot.slane %v710_v61, 4  ;;  %v540_v18 = vmul.bf16 %v532_v49, %v525_v48  ;;  %v718_v48 = vmul.bf16 %v710_v61, %v706_v34 }
  0x8d   : > { %v441_v63 = vrot.slane %v433_v54, 7  ;;  %v712_v1 = vrot.slane %v433_v54, 5  ;;  %v255_v3 = vmul.bf16 %v1468_v58, %v227_v56  ;;  %v534_v4 = vrot.slane %v1468_v58, 6 }
  0x8f   : > { %v1480_v7 = vsel %vm438_vm7, %v440_v60, %v441_v63  ;;  %v1482_v8 = vrot.slane %v441_v63, 4  ;;  %v1115_v16 = vcombine.low %v254_v57, %v255_v3  ;;  %v535_v21 = vsel %vm1474_vm10, %v533_v62, %v534_v4  ;;  %v1316_v57 = vld [vmem:[%s1590_s1 + $0x58] sm:$0xff]   ;;  %v1317_v60 = vld [vmem:[%s1590_s1 + $0x60] sm:$0xff]   ;;  %v796_v63 = vld [vmem:[%s1406_s12 + $0x8] sm:$0xf] }
  0x90   : > { %v448_v14 = vmul.bf16 %v1480_v7, %v1413_v10  ;;  %v714_v23 = vrot.slane %v712_v1, 4  ;;  %v536_v24 = vrot.slane %v534_v4, 4  ;;  %v713_v29 = vsel %vm709_vm11, %v711_v17, %v712_v1  ;;  %v1319_v1 = vld [vmem:[%s1590_s1 + $0x68] sm:$0xff]  }
  0x91   : > { %v449_v19 = vmul.bf16 %v1482_v8, %v1410_v9  ;;  %1226 = vmatmul.mubr.msk.bf16.vlgmr.msra.gmra.mrb[0].mxu1 %vm301_vm2, %v1115_v16  ;;  %v541_v30 = vmul.bf16 %v535_v21, %v1413_v10  ;;  %v1312_v9 = vld [vmem:[%s1590_s1 + $0x38] sm:$0xff]   ;;  %v719_v41 = vmul.bf16 %v713_v29, %v1413_v10  ;;  %v797_v3 = vmul.bf16 %v1413_v10, %v1454_v45 }
  0x92   : > { %v1123_v22 = vcombine.low %v447_v13, %v448_v14  ;;  %1238 = vmatpush3.bf16.msra.mxu1 %v1310_v12  ;;  %v542_v32 = vmul.bf16 %v536_v24, %v526_v20  ;;  %1241 = vmatprep.mubr.msk.bf16.mxu1 %vm1333_vm0, %v1332_v6  ;;  %v720_v42 = vmul.bf16 %v714_v23, %v618_v53  ;;  %v1320_v10 = vld [vmem:[%s1590_s1 + $0x78] sm:$0xff]  }
  0x93   : > { %v1124_v28 = vcombine.low %v449_v19, %v449_v19  ;;  %1239 = vmatprep.subr.bf16.mxu1 %v1332_v6  ;;  %v1132_v40 = vcombine.low %v540_v18, %v541_v30  ;;  %v646_v53 = vor.u32 %v645_v38, %v642_v37  ;;  %v1150_v54 = vcombine.low %v718_v48, %v719_v41 }
  0x94   : > { %v464_v33 = vrot.slane %v1123_v22, 1  ;;  %v1133_v43 = vcombine.low %v542_v32, %v542_v32  ;;  %v1151_v55 = vcombine.low %v720_v42, %v720_v42  ;;  %v798_v4 = vmul.bf16 %v796_v63, %v1468_v58 }
  0x95   : > { %v465_v36 = vrot.slane %v1124_v28, 1  ;;  %v557_v47 = vrot.slane %v1132_v40, 2  ;;  %v647_v59 = vsel %vm630_vm14, %v638_v52, %v646_v53  ;;  %v735_v62 = vrot.slane %v1150_v54, 3 }
  0x96   : > { %1240 = vmatpush3.bf16.msra.mxu1 %v1312_v9  ;;  %v558_v49 = vrot.slane %v1133_v43, 2  ;;  %v736_v61 = vrot.slane %v1151_v55, 3  ;;  %v955_v11 = vmul.bf16 %v1440_v25, %v1480_v7  ;;  %v956_v12 = vmul.bf16 %v1443_v26, %v1482_v8  ;;  %v1321_v25 = vld [vmem:[%s1590_s1 + $0x80] sm:$0xff]  }
  0x97   : > { %v466_v44 = vsel %vm463_vm12, %v464_v33, %v465_v36  ;;  %1253 = vmatprep.subr.bf16.mxu1 %v1332_v6  ;;  %v954_v45 = vmul.bf16 %v953_v2, %v1457_v46  ;;  %v1159_v26 = vcombine.low %v797_v3, %v798_v4  ;;  %v1322_v46 = vld [vmem:[%s1590_s1 + $0x88] sm:$0xff]  }
  0x98   : > { %1234 = vmatmul.mubr.msk.bf16.vlgmr.msra.gmra.mrb[4].mxu0 %vm301_vm2, %v466_v44  ;;  %v559_v56 = vsel %vm556_vm13, %v557_v47, %v558_v49  ;;  %v737_v5 = vsel %vm734_vm15, %v735_v62, %v736_v61  ;;  %v1177_v7 = vcombine.low %v956_v12, %v956_v12 }
  0x99   : > { %1246 = vmatpush3.bf16.msra.mxu0 %v1313_v39  ;;  %1249 = vmatprep.mubr.msk.bf16.mxu0 %vm1333_vm0, %v1332_v6  ;;  %v1176_v58 = vcombine.low %v954_v45, %v955_v11 }
  0x9a   : > { %1247 = vmatprep.subr.bf16.mxu0 %v1332_v6  ;;  %1242 = vmatmul.mubr.msk.bf16.vlgmr.msra.gmra.mrb[4].mxu1 %vm301_vm2, %v559_v56  ;;  %v971_v8 = vrot.slane %v1177_v7, 1 }
  0x9b   : > { %1254 = vmatpush3.bf16.msra.mxu1 %v1314_v50  ;;  %1257 = vmatprep.mubr.msk.bf16.mxu1 %vm1333_vm0, %v1332_v6  ;;  %v970_v13 = vrot.slane %v1176_v58, 1 }
  0x9c   : > { %1255 = vmatprep.subr.bf16.mxu1 %v1332_v6 }
  0x9d   : > { %1248 = vmatpush3.bf16.msra.mxu0 %v1315_v51  ;;  %v972_v14 = vsel %vm463_vm12, %v970_v13, %v971_v8 }
  0x9e   : > { %1261 = vmatprep.subr.bf16.mxu0 %v1332_v6 }
  0x9f   : > { %1256 = vmatpush3.bf16.msra.mxu1 %v1316_v57 }
  0xa0   : > { %1250 = vmatmul.mubr.msk.bf16.vlgmr.msra.gmra.mrb[8].mxu0 %vm301_vm2, %v647_v59  ;;  %1269 = vmatprep.subr.bf16.mxu1 %v1332_v6 }
  0xa1   : > { %1262 = vmatpush3.bf16.msra.mxu0 %v1317_v60  ;;  %1265 = vmatprep.mubr.msk.bf16.mxu0 %vm1333_vm0, %v1332_v6 }
  0xa2   : > { %1263 = vmatprep.subr.bf16.mxu0 %v1332_v6  ;;  %1258 = vmatmul.mubr.msk.bf16.vlgmr.msra.gmra.mrb[8].mxu1 %vm301_vm2, %v737_v5 }
  0xa3   : > { %1270 = vmatpush3.bf16.msra.mxu1 %v1318_v0  ;;  %1273 = vmatprep.mubr.msk.bf16.mxu1 %vm1333_vm0, %v1332_v6 }
  0xa4   : > { %1271 = vmatprep.subr.bf16.mxu1 %v1332_v6 }
  0xa5   : > { %1264 = vmatpush3.bf16.msra.mxu0 %v1319_v1  ;;  %v1181_v1 = vld [vmem:[%s1593_s4] ss:$0 sm:$0xff] }
  0xa6   : > { %1277 = vmatprep.subr.bf16.mxu0 %v1332_v6 }
  0xa7   : > { %1272 = vmatpush3.bf16.msra.mxu1 %v1320_v10 }
  0xa8   : > { %1266 = vmatmul.mubr.msk.bf16.vlgmr.msra.gmra.mrb[12].mxu0 %vm301_vm2, %v1159_v26 }
  0xa9   : > { %1278 = vmatpush3.bf16.msra.mxu0 %v1321_v25  ;;  %1281 = vmatprep.mubr.msk.bf16.mxu0 %vm1333_vm0, %v1332_v6 }
  0xaa   : > { %1279 = vmatprep.subr.bf16.mxu0 %v1332_v6  ;;  %1274 = vmatmul.mubr.msk.bf16.vlgmr.msra.gmra.mrb[12].mxu1 %vm301_vm2, %v1450_v35 }
  0xad   : > { %1280 = vmatpush3.bf16.msra.mxu0 %v1322_v46 }
  0xb0   : > { %1282 = vmatmul.mubr.msk.bf16.vlgmr.msra.gmra.mrb[16].mxu0 %vm301_vm2, %v972_v14 }
  0xed   : > { %v339_v15 = vpop.f32.mrb[0].mxu0 }
  0xee   : > { %v1219_v16 = vpop.f32.mrb[1].mxu0 }
  0xef   : > { %v342_v17 = vpop.f32.mrb[2].mxu0 }
  0xf0   : > { %v1220_v18 = vpop.f32.mrb[3].mxu0 }
 0x164   : > { %v400_v19 = vpop.f32.mrb[0].mxu1 }
 0x165   : > { %v401_v20 = vadd.f32 %v400_v19, %v339_v15  ;;  %v1227_v21 = vpop.f32.mrb[1].mxu1 }
 0x166   : > { %v403_v22 = vpop.f32.mrb[2].mxu1 }
 0x167   : > { %v404_v23 = vadd.f32 %v403_v22, %v342_v17  ;;  %v1228_v6 = vpop.f32.mrb[3].mxu1 }
 0x16b   : > { %v516_v24 = vpop.f32.mrb[4].mxu0 }
 0x16c   : > { %v523_v27 = vadd.f32 %v516_v24, %v401_v20  ;;  %v1235_v28 = vpop.f32.mrb[5].mxu0 }
 0x16d   : > { %v519_v35 = vpop.f32.mrb[6].mxu0  ;;  %v609_v29 = vpop.f32.mrb[4].mxu1 }
 0x16e   : > { %v524_v30 = vadd.f32 %v519_v35, %v404_v23  ;;  %v1236_v9 = vpop.f32.mrb[7].mxu0  ;;  %v616_v31 = vadd.f32 %v609_v29, %v523_v27  ;;  %v1243_v32 = vpop.f32.mrb[5].mxu1 }
 0x16f   : > { %v612_v33 = vpop.f32.mrb[6].mxu1 }
 0x170   : > { %v617_v34 = vadd.f32 %v612_v33, %v524_v30  ;;  %v1244_v36 = vpop.f32.mrb[7].mxu1 }
 0x173   : > { %v697_v37 = vpop.f32.mrb[8].mxu0 }
 0x174   : > { %v704_v38 = vadd.f32 %v697_v37, %v616_v31  ;;  %v1251_v39 = vpop.f32.mrb[9].mxu0 }
 0x175   : > { %v700_v40 = vpop.f32.mrb[10].mxu0  ;;  %v787_v41 = vpop.f32.mrb[8].mxu1 }
 0x176   : > { %v705_v42 = vadd.f32 %v700_v40, %v617_v34  ;;  %v1252_v43 = vpop.f32.mrb[11].mxu0  ;;  %v794_v44 = vadd.f32 %v787_v41, %v704_v38  ;;  %v1259_v47 = vpop.f32.mrb[9].mxu1 }
 0x177   : > { %v790_v48 = vpop.f32.mrb[10].mxu1 }
 0x178   : > { %v795_v49 = vadd.f32 %v790_v48, %v705_v42  ;;  %v1260_v50 = vpop.f32.mrb[11].mxu1 }
 0x17b   : > { %v858_v51 = vpop.f32.mrb[12].mxu0 }
 0x17c   : > { %v865_v52 = vadd.f32 %v858_v51, %v794_v44  ;;  %v1267_v53 = vpop.f32.mrb[13].mxu0 }
 0x17d   : > { %v861_v54 = vpop.f32.mrb[14].mxu0  ;;  %v944_v56 = vpop.f32.mrb[12].mxu1 }
 0x17e   : > { %v866_v55 = vadd.f32 %v861_v54, %v795_v49  ;;  %v1268_v57 = vpop.f32.mrb[15].mxu0  ;;  %v951_v59 = vadd.f32 %v944_v56, %v865_v52  ;;  %v1275_v60 = vpop.f32.mrb[13].mxu1 }
 0x17f   : > { %v947_v61 = vpop.f32.mrb[14].mxu1 }
 0x180   : > { %v952_v62 = vadd.f32 %v947_v61, %v866_v55  ;;  %v1276_v63 = vpop.f32.mrb[15].mxu1 }
 0x183   : > { %v1022_v0 = vpop.f32.mrb[16].mxu0 }
 0x184   : > { %v1029_v2 = vadd.f32 %v1022_v0, %v951_v59  ;;  %v1283_v3 = vpop.f32.mrb[17].mxu0 }
 0x185   : > { %v1025_v4 = vpop.f32.mrb[18].mxu0 }
 0x186   : > { %v1038_v5 = vadd.f32 %v1181_v1, %v1029_v2  ;;  %v1030_v11 = vadd.f32 %v1025_v4, %v952_v62  ;;  %v1284_v12 = vpop.f32.mrb[19].mxu0 }
 0x188   : > { %1040 = vst.msk [vmem:[%s224_s27] sm:$0xff] %vm301_vm2, %v1038_v5  ;;  %v1039_v10 = vadd.f32 %v1181_v1, %v1030_v11 }
 0x18a   : > { %1041 = vst.msk [vmem:[%s224_s27 + $0x8] sm:$0xff] %vm301_vm2, %v1039_v10 }
 0x18b PF: > { %s15_s18 = sadd.s32 1, %s1329_s18  }
 0x18c   : > { %p12_p4 = scmp.ge.s32.totalorder %s15_s18, 4  }
 0x18e   :  { %14 = sbr.rel (!%p12_p4) target bundleno = 1 (0x1), region = 78 }

// kernel: realnvp_forward.132
= control target key start
LH: loop header
LB: loop body
LE: loop exit
PB: predicated region body
PF: predicated region fallthrough
CT: control target
= control target key end

     0   :  { %s1252_s18 = smov 0   ;;  %s1453_s0 = inlined_call_operand.vmem [shape: bf16[2,26,12], index: 0, kind: input, shape index: {}]   ;;  %s1454_s1 = inlined_call_operand.vmem [shape: bf16[9,12,32], index: 1, kind: input, shape index: {}]   ;;  %s1455_s2 = inlined_call_operand.vmem [shape: bf16[16,1], index: 2, kind: input, shape index: {}]   ;;  %s1456_s3 = inlined_call_operand.vmem [shape: bf16[16,1], index: 3, kind: input, shape index: {}]   ;;  %s1457_s4 = inlined_call_operand.vmem [shape: f32[1,32], index: 4, kind: input, shape index: {}]   ;;  %s1458_s5 = inlined_call_operand.vmem [shape: f32[2,16,32], index: 5, kind: output, shape index: {}]  }
   0x1 LB: > { %s1045_s19 = sadd.s32 4294967295, %s1216_s18   ;;  %p1049_p0 = scmp.ge.s32.totalorder %s1216_s18, 1  ;;  %s1216_s18 = sphi %s1252_s18, %s15_s18  }
   0x2   : > { %p187_p1 = scmp.lt.s32.totalorder %s1216_s18, 3 }
   0x4   : > { %p188_p2 = pnand %p1049_p0, %p187_p1 }
   0x5   : > { %v397_v0 = vld [vmem:[%s1456_s3] sm:$0xf] (!%p188_p2)  ;;  %p215_p3 = scmp.lt.s32.totalorder (!%p188_p2), %s1045_s19, 1  ;;  %v1218_v2 = vmov (!%p188_p2), 0   ;;  %v398_v3 = vld [vmem:[%s1456_s3 + $0x4] sm:$0xf] (!%p188_p2)  ;;  %v238_v38 = vlaneseq (!%p188_p2) }
   0x6   : > { %191 = sbr.rel (%p188_p2) target bundleno = 395 (0x18b), region = 40  ;;  %v228_v1 = vld [vmem:[%s1455_s2] sm:$0xf] (!%p188_p2)  ;;  %1194 = vset.pattern.permute.xlu1 (!%p188_p2), %v1218_v2  ;;  %1193 = vset.pattern.permute.xlu0 (!%p188_p2), %v1218_v2  ;;  %v229_v4 = vld [vmem:[%s1455_s2 + $0x4] sm:$0xf] (!%p188_p2)  ;;  %vm294_vm0 = vcmask (!%p188_p2), 1045504  }
   0x7   : > { %401 = vperm.xlu0 (!%p188_p2), %1193, %v397_v0   ;;  %232 = vperm.xlu1 (!%p188_p2), %1194, %v228_v1   ;;  %v1196_v5 = vld [vmem:[%s1454_s1 + $0x8] sm:$0x3f] (!%p188_p2)   ;;  %v1219_v6 = vmov (!%p188_p2), 0.0   ;;  %vm1220_vm1 = vmmov (!%p188_p2), 0   ;;  %vm272_vm2 = vsmask.f32 (!%p188_p2), 7424 }
   0x8   : > { %1127 = vmatprep.subr.bf16.mxu0 (!%p188_p2), %v1219_v6  ;;  %v296_v7 = vsel (!%p188_p2), %vm294_vm0, %v1196_v5, 0  ;;  %1133 = vmatprep.subr.bf16.mxu1 (!%p188_p2), %v1219_v6  ;;  %v1202_v16 = vld [vmem:[%s1454_s1] sm:$0x3f] (!%p188_p2)   ;;  %vm290_vm3 = vcmask (!%p188_p2), 97280   ;;  %v1203_v21 = vld [vmem:[%s1454_s1 + $0x10] sm:$0x3f] (!%p188_p2)  }
   0x9   : > { %1128 = vmatpush3.bf16.msra.mxu0 (!%p188_p2), %v296_v7  ;;  %1129 = vmatprep.mubr.msk.bf16.mxu0 (!%p188_p2), %vm1220_vm1, %v1219_v6  ;;  %v353_v19 = vsel (!%p188_p2), %vm294_vm0, %v1202_v16, 0  ;;  %v463_v23 = vsel (!%p188_p2), %vm294_vm0, %v1203_v21, 0  ;;  %v1221_v36 = vmov (!%p188_p2), 839922192   ;;  %v239_v40 = vshrl.u32 (!%p188_p2), %v238_v38, 7 }
   0xa   : > { %1139 = vmatprep.subr.bf16.mxu0 (!%p188_p2), %v1219_v6  ;;  %1135 = vmatprep.mubr.msk.bf16.mxu1 (!%p188_p2), %vm1220_vm1, %v1219_v6  ;;  %v236_v37 = vunpack.c.l.s4 (!%p188_p2), %v1221_v36  ;;  %vm425_vm4 = vcmask (!%p188_p2), 1040384   ;;  %vm426_vm5 = vcmask (!%p188_p2), 1044484   ;;  %vm678_vm6 = vcmask (!%p188_p2), 1042432   ;;  %v1204_v60 = vld [vmem:[%s1454_s1 + $0x18] sm:$0x3f] (!%p188_p2)  }
   0xb   : > { %413 = vperm.xlu0 (!%p188_p2), %1193, %v398_v3   ;;  %244 = vperm.xlu1 (!%p188_p2), %1194, %v229_v4   ;;  %vm512_vm7 = vcmask (!%p188_p2), 1041408   ;;  %vm513_vm8 = vcmask (!%p188_p2), 1045508   ;;  %vm427_vm9 = vmor (!%p188_p2), %vm425_vm4, %vm426_vm5  ;;  %vm679_vm10 = vcmask (!%p188_p2), 1046532   ;;  %vm450_vm13 = vcmask (!%p188_p2), 1046528  }
   0xc   : > { %1134 = vmatpush3.bf16.msra.mxu1 (!%p188_p2), %v353_v19  ;;  %v237_v39 = vunpack.c.0.s8 (!%p188_p2), %v236_v37  ;;  %vm1354_vm11 = vmor (!%p188_p2), %vm512_vm7, %vm513_vm8  ;;  %vm605_vm14 = vsmask.f32 (!%p188_p2), 5376  ;;  %vm703_vm15 = vcmask (!%p188_p2), 1044480  }
   0xd   : > { %s1464_s19 = smov (!%p215_p3, %s1045_s19), 1  ;;  %1145 = vmatprep.subr.bf16.mxu1 %v1219_v6  ;;  %vm1367_vm12 = vmor %vm678_vm6, %vm679_vm10 }
   0xe   : > { %s1107_s30 = sshll.u32 %s1464_s19, 4  ;;  %v240_v41 = vsub.s32 %v237_v39, %v239_v40 }
   0xf   : > { %s1283_s8 = scalar_lea.vmem %s1453_s0, %s1107_s30  ;;  %s224_s7 = scalar_lea.vmem %s1458_s5, %s1107_s30 }
  0x10   : > { %v1289_v8 = vld [vmem:[%s1283_s8 + $0x4] sm:$0xf]  ;;  %v1292_v9 = vld [vmem:[%s1283_s8 + $0x8] sm:$0x1]  ;;  %v258_v11 = vld [vmem:[%s1283_s8] sm:$0xf] }
  0x11   : > { %v1057_v10 = vcombine.low %v1292_v9, %v1292_v9  ;;  %v1056_v12 = vcombine.low %v258_v11, %v1289_v8  ;;  %v826_v24 = vld [vmem:[%s1283_s8 + $0x4] sm:$0xf]  ;;  %v1319_v25 = vld [vmem:[%s1283_s8 + $0x8] sm:$0xf]  ;;  %v1322_v26 = vld [vmem:[%s1283_s8 + $0xc] sm:$0x1] }
  0x12   : > { %v1094_v27 = vcombine.low %v826_v24, %v1319_v25  ;;  %v1095_v28 = vcombine.low %v1322_v26, %v1322_v26  ;;  %v508_v46 = vld [vmem:[%s1283_s8] sm:$0xc]  ;;  %v595_v53 = vld [vmem:[%s1283_s8 + $0x8] sm:$0x7]  ;;  %v227_v56 = vld [vmem:[%s1283_s8 + $0x4] sm:$0xf] }
  0x13   : > { %v281_v13 = vshll.u32 %v1057_v10, 16  ;;  %v274_v14 = vshrl.u32 %v1056_v12, 16  ;;  %v276_v15 = vshll.u32 %v1056_v12, 16  ;;  %v1077_v47 = vcombine.low %v508_v46, %v1289_v8  ;;  %v226_v49 = vld [vmem:[%s1283_s8] sm:$0xf] }
  0x14   : > { %v843_v29 = vshll.u32 %v1094_v27, 16  ;;  %v848_v30 = vshll.u32 %v1095_v28, 16  ;;  %v841_v31 = vshrl.u32 %v1094_v27, 16  ;;  %v1078_v55 = vcombine.low %v595_v53, %v595_v53  ;;  %v396_v61 = vld [vmem:[%s1283_s8] sm:$0xe] }
  0x15   : > { %v278_v17 = vrot.slane %v276_v15, 1  ;;  %v283_v18 = vrot.slane %v281_v13, 1  ;;  %v607_v58 = vshrl.u32 %v1077_v47, 16  ;;  %v610_v2 = vshll.u32 %v1077_v47, 16  ;;  %v906_v4 = vld [vmem:[%s1283_s8 + $0x4] sm:$0xe] }
  0x16   : > { %v850_v32 = vrot.slane %v848_v30, 1  ;;  %v845_v33 = vrot.slane %v843_v29, 1  ;;  %v615_v12 = vshrl.u32 %v1078_v55, 16  ;;  %v618_v13 = vshll.u32 %v1078_v55, 16  ;;  %v1205_v29 = vld [vmem:[%s1454_s1 + $0x20] sm:$0x3f]  }
  0x17   : > { %v279_v20 = vor.u32 %v278_v17, %v274_v14  ;;  %v609_v30 = vrot.slane %v607_v58, 2  ;;  %v632_v47 = vsel %vm294_vm0, %v1205_v29, 0 }
  0x18   : > { %v846_v34 = vor.u32 %v845_v33, %v841_v31  ;;  %v677_v33 = vld [vmem:[%s1283_s8] sm:$0x8]  ;;  %v617_v39 = vrot.slane %v615_v12, 2  ;;  %v620_v40 = vrot.slane %v618_v13, 3 }
  0x19   : > { %v284_v22 = vsel %vm272_vm2, %v279_v20, %v283_v18  ;;  %v550_v18 = vsel %vm294_vm0, %v1204_v60, 0  ;;  %v1207_v60 = vld [vmem:[%s1454_s1 + $0x30] sm:$0x3f]   ;;  %v1209_v13 = vld [vmem:[%s1454_s1 + $0x40] sm:$0x3f]  }
  0x1a   : > { %1130 = vmatmul.mubr.msk.bf16.vlgmr.msra.gmra.mrb[0].mxu0 %vm290_vm3, %v284_v22  ;;  %v1328_v35 = vsel %vm272_vm2, %v846_v34, %v850_v32  ;;  %v509_v22 = vld [vmem:[%s1283_s8 + $0x8] sm:$0x3]  ;;  %v612_v34 = vrot.slane %v610_v2, 3 }
  0x1b   : > { %1140 = vmatpush3.bf16.msra.mxu0 %v463_v23  ;;  %1141 = vmatprep.mubr.msk.bf16.mxu0 %vm1220_vm1, %v1219_v6  ;;  %v761_v2 = vld [vmem:[%s1283_s8 + $0x8] sm:$0xf] }
  0x1c   : > { %1151 = vmatprep.subr.bf16.mxu0 %v1219_v6  ;;  %v613_v55 = vor.u32 %v612_v34, %v609_v30 }
  0x86   : > { %v402_v42 = vpop.permute.xlu0 %401  ;;  %v233_v43 = vpop.permute.xlu1 %232 }
  0x87   : > { %v1330_v44 = vrot.slane %v402_v42, %v240_v41  ;;  %v1332_v45 = vrot.slane %v233_v43, %v240_v41  ;;  %v1206_v42 = vld [vmem:[%s1454_s1 + $0x28] sm:$0x3f]  }
  0x89   : > { %v1337_v48 = vrot.slane %v1330_v44, 7  ;;  %v515_v50 = vrot.slane %v1332_v45, 6  ;;  %v254_v57 = vmul.bf16 %v1332_v45, %v226_v49  ;;  %v681_v63 = vrot.slane %v1330_v44, 5 }
  0x8a   : > { %v414_v51 = vpop.permute.xlu0 %413  ;;  %v245_v52 = vpop.permute.xlu1 %244 }
  0x8b   : > { %v422_v54 = vrot.slane %v414_v51, %v240_v41  ;;  %v1344_v59 = vrot.slane %v245_v52, %v240_v41  ;;  %v429_v62 = vrot.slane %v1337_v48, 4  ;;  %v516_v0 = vrot.slane %v515_v50, 4 }
  0x8c   : > { %v436_v14 = vmul.bf16 %v1337_v48, %v396_v61  ;;  %v682_v19 = vrot.slane %v681_v63, 4  ;;  %v523_v20 = vmul.bf16 %v515_v50, %v508_v46  ;;  %v689_v51 = vmul.bf16 %v681_v63, %v677_v33 }
  0x8d   : > { %v430_v1 = vrot.slane %v422_v54, 7  ;;  %v683_v3 = vrot.slane %v422_v54, 5  ;;  %v255_v5 = vmul.bf16 %v1344_v59, %v227_v56  ;;  %v517_v7 = vrot.slane %v1344_v59, 6 }
  0x8e   : > { %v716_v54 = vsel %vm294_vm0, %v1206_v42, 0  ;;  %v621_v56 = vor.u32 %v620_v40, %v617_v39 }
  0x8f   : > { %v1360_v10 = vsel %vm427_vm9, %v429_v62, %v430_v1  ;;  %v1362_v11 = vrot.slane %v430_v1, 4  ;;  %v1060_v17 = vcombine.low %v254_v57, %v255_v5  ;;  %v518_v23 = vsel %vm1354_vm11, %v516_v0, %v517_v7  ;;  %v1208_v62 = vld [vmem:[%s1454_s1 + $0x38] sm:$0x3f]  }
  0x90   : > { %v437_v16 = vmul.bf16 %v1360_v10, %v1289_v8  ;;  %v685_v27 = vrot.slane %v683_v3, 4  ;;  %v519_v28 = vrot.slane %v517_v7, 4  ;;  %v684_v32 = vsel %vm1367_vm12, %v682_v19, %v683_v3 }
  0x91   : > { %v438_v21 = vmul.bf16 %v1362_v11, %v1292_v9  ;;  %1136 = vmatmul.mubr.msk.bf16.vlgmr.msra.gmra.mrb[0].mxu1 %vm290_vm3, %v1060_v17  ;;  %v524_v9 = vmul.bf16 %v518_v23, %v1289_v8  ;;  %v690_v43 = vmul.bf16 %v684_v32, %v1289_v8  ;;  %v622_v61 = vsel %vm605_vm14, %v613_v55, %v621_v56 }
  0x92   : > { %v1065_v24 = vcombine.low %v436_v14, %v437_v16  ;;  %1146 = vmatpush3.bf16.msra.mxu1 %v550_v18  ;;  %v525_v36 = vmul.bf16 %v519_v28, %v509_v22  ;;  %1147 = vmatprep.mubr.msk.bf16.mxu1 %vm1220_vm1, %v1219_v6  ;;  %v691_v44 = vmul.bf16 %v685_v27, %v595_v53  ;;  %v781_v0 = vsel %vm294_vm0, %v1207_v60, 0 }
  0x93   : > { %v1066_v31 = vcombine.low %v438_v21, %v438_v21  ;;  %1157 = vmatprep.subr.bf16.mxu1 %v1219_v6  ;;  %v1071_v41 = vcombine.low %v523_v20, %v524_v9  ;;  %v1083_v53 = vcombine.low %v689_v51, %v690_v43  ;;  %v861_v3 = vsel %vm294_vm0, %v1208_v62, 0 }
  0x94   : > { %v451_v37 = vrot.slane %v1065_v24, 1  ;;  %v1072_v46 = vcombine.low %v525_v36, %v525_v36  ;;  %v1084_v57 = vcombine.low %v691_v44, %v691_v44  ;;  %v762_v5 = vmul.bf16 %v1289_v8, %v1332_v45 }
  0x95   : > { %v452_v38 = vrot.slane %v1066_v31, 1  ;;  %v538_v50 = vrot.slane %v1071_v41, 2  ;;  %v704_v1 = vrot.slane %v1083_v53, 3  ;;  %v763_v7 = vmul.bf16 %v761_v2, %v1344_v59  ;;  %v1104_v2 = vld [vmem:[%s1457_s4] ss:$0 sm:$0xff] }
  0x96   : > { %v539_v52 = vrot.slane %v1072_v46, 2  ;;  %v705_v63 = vrot.slane %v1084_v57, 3  ;;  %v908_v14 = vmul.bf16 %v1319_v25, %v1360_v10  ;;  %v909_v15 = vmul.bf16 %v1322_v26, %v1362_v11 }
  0x97   : > { %v453_v49 = vsel %vm450_vm13, %v451_v37, %v452_v38  ;;  %v907_v8 = vmul.bf16 %v906_v4, %v1337_v48  ;;  %v1089_v45 = vcombine.low %v762_v5, %v763_v7  ;;  %v933_v59 = vsel %vm294_vm0, %v1209_v13, 0 }
  0x98   : > { %1142 = vmatmul.mubr.msk.bf16.vlgmr.msra.gmra.mrb[4].mxu0 %vm290_vm3, %v453_v49  ;;  %v540_v58 = vsel %vm294_vm0, %v538_v50, %v539_v52  ;;  %v706_v12 = vsel %vm703_vm15, %v704_v1, %v705_v63  ;;  %v1101_v17 = vcombine.low %v909_v15, %v909_v15  ;;  %vm987_vm0 = vcmask 261120  }
  0x99   : > { %1152 = vmatpush3.bf16.msra.mxu0 %v632_v47  ;;  %1153 = vmatprep.mubr.msk.bf16.mxu0 %vm1220_vm1, %v1219_v6  ;;  %v1100_v16 = vcombine.low %v907_v8, %v908_v14 }
  0x9a   : > { %1163 = vmatprep.subr.bf16.mxu0 %v1219_v6  ;;  %1148 = vmatmul.mubr.msk.bf16.vlgmr.msra.gmra.mrb[4].mxu1 %vm290_vm3, %v540_v58  ;;  %v922_v25 = vrot.slane %v1101_v17, 1 }
  0x9b   : > { %1158 = vmatpush3.bf16.msra.mxu1 %v716_v54  ;;  %1159 = vmatprep.mubr.msk.bf16.mxu1 %vm1220_vm1, %v1219_v6  ;;  %v921_v26 = vrot.slane %v1100_v16, 1 }
  0x9c   : > { %1169 = vmatprep.subr.bf16.mxu1 %v1219_v6 }
  0x9d   : > { %v923_v10 = vsel %vm450_vm13, %v921_v26, %v922_v25 }
  0xa0   : > { %1154 = vmatmul.mubr.msk.bf16.vlgmr.msra.gmra.mrb[8].mxu0 %vm290_vm3, %v622_v61 }
  0xa1   : > { %1164 = vmatpush3.bf16.msra.mxu0 %v781_v0  ;;  %1165 = vmatprep.mubr.msk.bf16.mxu0 %vm1220_vm1, %v1219_v6 }
  0xa2   : > { %1175 = vmatprep.subr.bf16.mxu0 %v1219_v6  ;;  %1160 = vmatmul.mubr.msk.bf16.vlgmr.msra.gmra.mrb[8].mxu1 %vm290_vm3, %v706_v12 }
  0xa3   : > { %1170 = vmatpush3.bf16.msra.mxu1 %v861_v3  ;;  %1171 = vmatprep.mubr.msk.bf16.mxu1 %vm1220_vm1, %v1219_v6 }
  0xa8   : > { %1166 = vmatmul.mubr.msk.bf16.vlgmr.msra.gmra.mrb[12].mxu0 %vm290_vm3, %v1089_v45 }
  0xa9   : > { %1176 = vmatpush3.bf16.msra.mxu0 %v933_v59  ;;  %1177 = vmatprep.mubr.msk.bf16.mxu0 %vm1220_vm1, %v1219_v6 }
  0xaa   : > { %1172 = vmatmul.mubr.msk.bf16.vlgmr.msra.gmra.mrb[12].mxu1 %vm290_vm3, %v1328_v35 }
  0xb0   : > { %1178 = vmatmul.mubr.msk.bf16.vlgmr.msra.gmra.mrb[16].mxu0 %vm290_vm3, %v923_v10 }
  0xed   : > { %v332_v48 = vpop.f32.mrb[0].mxu0 }
  0xee   : > { %v1131_v11 = vpop.f32.mrb[1].mxu0 }
  0xef   : > { %v335_v18 = vpop.f32.mrb[2].mxu0 }
  0xf0   : > { %v1132_v19 = vpop.f32.mrb[3].mxu0 }
 0x164   : > { %v389_v20 = vpop.f32.mrb[0].mxu1 }
 0x165   : > { %v390_v21 = vadd.f32 %v389_v20, %v332_v48  ;;  %v1137_v22 = vpop.f32.mrb[1].mxu1 }
 0x166   : > { %v392_v23 = vpop.f32.mrb[2].mxu1 }
 0x167   : > { %v393_v24 = vadd.f32 %v392_v23, %v335_v18  ;;  %v1138_v27 = vpop.f32.mrb[3].mxu1 }
 0x16b   : > { %v499_v6 = vpop.f32.mrb[4].mxu0 }
 0x16c   : > { %v506_v28 = vadd.f32 %v499_v6, %v390_v21  ;;  %v1143_v29 = vpop.f32.mrb[5].mxu0 }
 0x16d   : > { %v502_v30 = vpop.f32.mrb[6].mxu0  ;;  %v586_v35 = vpop.f32.mrb[4].mxu1 }
 0x16e   : > { %v507_v31 = vadd.f32 %v502_v30, %v393_v24  ;;  %v1144_v32 = vpop.f32.mrb[7].mxu0  ;;  %v593_v9 = vadd.f32 %v586_v35, %v506_v28  ;;  %v1149_v33 = vpop.f32.mrb[5].mxu1 }
 0x16f   : > { %v589_v34 = vpop.f32.mrb[6].mxu1 }
 0x170   : > { %v594_v36 = vadd.f32 %v589_v34, %v507_v31  ;;  %v1150_v37 = vpop.f32.mrb[7].mxu1 }
 0x173   : > { %v668_v38 = vpop.f32.mrb[8].mxu0 }
 0x174   : > { %v675_v39 = vadd.f32 %v668_v38, %v593_v9  ;;  %v1155_v40 = vpop.f32.mrb[9].mxu0 }
 0x175   : > { %v671_v41 = vpop.f32.mrb[10].mxu0  ;;  %v752_v42 = vpop.f32.mrb[8].mxu1 }
 0x176   : > { %v676_v43 = vadd.f32 %v671_v41, %v594_v36  ;;  %v1156_v44 = vpop.f32.mrb[11].mxu0  ;;  %v759_v46 = vadd.f32 %v752_v42, %v675_v39  ;;  %v1161_v47 = vpop.f32.mrb[9].mxu1 }
 0x177   : > { %v755_v49 = vpop.f32.mrb[10].mxu1 }
 0x178   : > { %v760_v50 = vadd.f32 %v755_v49, %v676_v43  ;;  %v1162_v51 = vpop.f32.mrb[11].mxu1 }
 0x17b   : > { %v817_v52 = vpop.f32.mrb[12].mxu0 }
 0x17c   : > { %v824_v54 = vadd.f32 %v817_v52, %v759_v46  ;;  %v1167_v55 = vpop.f32.mrb[13].mxu0 }
 0x17d   : > { %v820_v56 = vpop.f32.mrb[14].mxu0  ;;  %v897_v57 = vpop.f32.mrb[12].mxu1 }
 0x17e   : > { %v825_v53 = vadd.f32 %v820_v56, %v760_v50  ;;  %v1168_v58 = vpop.f32.mrb[15].mxu0  ;;  %v904_v60 = vadd.f32 %v897_v57, %v824_v54  ;;  %v1173_v61 = vpop.f32.mrb[13].mxu1 }
 0x17f   : > { %v900_v62 = vpop.f32.mrb[14].mxu1 }
 0x180   : > { %v905_v63 = vadd.f32 %v900_v62, %v825_v53  ;;  %v1174_v0 = vpop.f32.mrb[15].mxu1 }
 0x183   : > { %v969_v1 = vpop.f32.mrb[16].mxu0 }
 0x184   : > { %v976_v3 = vadd.f32 %v969_v1, %v904_v60  ;;  %v1179_v4 = vpop.f32.mrb[17].mxu0 }
 0x185   : > { %v972_v5 = vpop.f32.mrb[18].mxu0 }
 0x186   : > { %v985_v7 = vadd.f32 %v1104_v2, %v976_v3  ;;  %v977_v12 = vadd.f32 %v972_v5, %v905_v63  ;;  %v1180_v13 = vpop.f32.mrb[19].mxu0 }
 0x188   : > { %988 = vst.msk [vmem:[%s224_s7] sm:$0xff] %vm987_vm0, %v985_v7  ;;  %v986_v14 = vadd.f32 %v1104_v2, %v977_v12 }
 0x18a   : > { %989 = vst.msk [vmem:[%s224_s7 + $0x8] sm:$0xff] %vm987_vm0, %v986_v14 }
 0x18b PF: > { %s15_s18 = sadd.s32 1, %s1216_s18  }
 0x18c   : > { %p12_p4 = scmp.ge.s32.totalorder %s15_s18, 4  }
 0x18e   :  { %14 = sbr.rel (!%p12_p4) target bundleno = 1 (0x1), region = 78 }

// kernel: realnvp_forward.140
= control target key start
LH: loop header
LB: loop body
LE: loop exit
PB: predicated region body
PF: predicated region fallthrough
CT: control target
= control target key end

     0   :  { %s531_s18 = smov 0   ;;  %s588_s0 = inlined_call_operand.vmem [shape: f32[32,128], index: 0, kind: input, shape index: {}]   ;;  %s589_s1 = inlined_call_operand.vmem [shape: f32[1,128], index: 1, kind: input, shape index: {}]   ;;  %s590_s2 = inlined_call_operand.vmem [shape: f32[1,128], index: 2, kind: input, shape index: {}]   ;;  %s591_s3 = inlined_call_operand.vmem [shape: bf16[128,128], index: 3, kind: input, shape index: {}]   ;;  %s592_s4 = inlined_call_operand.vmem [shape: f32[1,128], index: 4, kind: input, shape index: {}]   ;;  %s593_s5 = inlined_call_operand.vmem [shape: f32[32,128], index: 5, kind: output, shape index: {}]  }
   0x1 LB: > { %s422_s19 = sadd.s32 4294967295, %s497_s18   ;;  %p426_p0 = scmp.ge.s32.totalorder %s497_s18, 1  ;;  %s497_s18 = sphi %s531_s18, %s15_s18  }
   0x2   : > { %p188_p1 = scmp.lt.s32.totalorder %s497_s18, 3 }
   0x4   : > { %p189_p2 = pnand %p426_p0, %p188_p1 }
   0x5   : > { %v483_v0 = vld [vmem:[%s591_s3] sm:$0xff] (!%p189_p2)   ;;  %v499_v1 = vmov (!%p189_p2), 0.0   ;;  %v484_v2 = vld [vmem:[%s591_s3 + $0x8] sm:$0xff] (!%p189_p2)   ;;  %vm500_vm0 = vmmov (!%p189_p2), 0   ;;  %s427_s24 = sshll.u32 (!%p189_p2), %s422_s19, 1  ;;  %v485_v3 = vld [vmem:[%s591_s3 + $0x10] sm:$0xff] (!%p189_p2)  }
   0x6   : > { %192 = sbr.rel (%p189_p2) target bundleno = 255 (0xff), region = 40  ;;  %453 = vmatprep.subr.bf16.mxu0 (!%p189_p2), %v499_v1  ;;  %469 = vmatprep.mubr.msk.bf16.mxu0 (!%p189_p2), %vm500_vm0, %v499_v1  ;;  %p217_p3 = scmp.lt.s32.totalorder (!%p189_p2), %s427_s24, 3  ;;  %v486_v4 = vld [vmem:[%s591_s3 + $0x18] sm:$0xff] (!%p189_p2)   ;;  %v487_v5 = vld [vmem:[%s591_s3 + $0x20] sm:$0xff] (!%p189_p2)   ;;  %v488_v11 = vld [vmem:[%s591_s3 + $0x28] sm:$0xff] (!%p189_p2)  }
   0x7   : > { %454 = vmatpush3.bf16.msra.mxu0 (!%p189_p2), %v483_v0  ;;  %v431_v8 = vld [vmem:[%s589_s1] ss:$0 sm:$0xff] (!%p189_p2)  ;;  %v489_v15 = vld [vmem:[%s591_s3 + $0x30] sm:$0xff] (!%p189_p2)   ;;  %v490_v18 = vld [vmem:[%s591_s3 + $0x38] sm:$0xff] (!%p189_p2)  }
   0x8   : > { %455 = vmatprep.subr.bf16.mxu0 (!%p189_p2), %v499_v1  ;;  %v432_v12 = vld [vmem:[%s590_s2] ss:$0 sm:$0xff] (!%p189_p2) }
   0x9   : > { %v433_v20 = vld [vmem:[%s592_s4] ss:$0 sm:$0xff] (!%p189_p2) }
   0xb   : > { %456 = vmatpush3.bf16.msra.mxu0 (!%p189_p2), %v484_v2 }
   0xc   : > { %457 = vmatprep.subr.bf16.mxu0 (!%p189_p2), %v499_v1 }
   0xd   : > { %s595_s24 = smov (!%p217_p3, %s427_s24), 3 }
   0xe   : > { %s428_s27 = sshll.u32 %s595_s24, 3 }
   0xf   : > { %458 = vmatpush3.bf16.msra.mxu0 %v485_v3  ;;  %s220_s7 = scalar_lea.vmem %s588_s0, %s428_s27  ;;  %s226_s26 = scalar_lea.vmem %s593_s5, %s428_s27 }
  0x10   : > { %459 = vmatprep.subr.bf16.mxu0 %v499_v1  ;;  %v229_v6 = vld [vmem:[%s220_s7] sm:$0xff]  ;;  %v230_v7 = vld [vmem:[%s220_s7 + $0x8] sm:$0xff] }
  0x11   : > { %v238_v9 = vmul.f32 %v431_v8, %v229_v6  ;;  %v239_v10 = vmul.f32 %v431_v8, %v230_v7 }
  0x13   : > { %460 = vmatpush3.bf16.msra.mxu0 %v486_v4  ;;  %v247_v13 = vadd.f32 %v432_v12, %v238_v9  ;;  %v248_v14 = vadd.f32 %v432_v12, %v239_v10 }
  0x14   : > { %461 = vmatprep.subr.bf16.mxu0 %v499_v1 }
  0x15   : > { %v249_v16 = vmax.f32 %v247_v13, 0.0  ;;  %v250_v17 = vmax.f32 %v248_v14, 0.0 }
  0x17   : > { %462 = vmatpush3.bf16.msra.mxu0 %v487_v5  ;;  %v251_v19 = vpack.c.bf16 %v250_v17, %v249_v16 }
  0x18   : > { %463 = vmatprep.subr.bf16.mxu0 %v499_v1 }
  0x1b   : > { %464 = vmatpush3.bf16.msra.mxu0 %v488_v11 }
  0x1c   : > { %465 = vmatprep.subr.bf16.mxu0 %v499_v1 }
  0x1f   : > { %466 = vmatpush3.bf16.msra.mxu0 %v489_v15 }
  0x20   : > { %467 = vmatprep.subr.bf16.mxu0 %v499_v1 }
  0x23   : > { %468 = vmatpush3.bf16.msra.mxu0 %v490_v18 }
  0x26   : > { %470 = vmatmul.mubr.bf16.vlgmr.msra.gmra.mrb[0].mxu0 %v251_v19 }
  0xf9   : > { %v357_v21 = vpop.f32.mrb[0].mxu0 }
  0xfa   : > { %v358_v22 = vadd.f32 %v433_v20, %v357_v21  ;;  %v471_v23 = vpop.f32.mrb[1].mxu0 }
  0xfb   : > { %v360_v24 = vpop.f32.mrb[2].mxu0 }
  0xfc   : > { %364 = vst [vmem:[%s226_s26] sm:$0xff] %v358_v22  ;;  %v361_v25 = vadd.f32 %v433_v20, %v360_v24  ;;  %v472_v26 = vpop.f32.mrb[3].mxu0 }
  0xfe   : > { %365 = vst [vmem:[%s226_s26 + $0x8] sm:$0xff] %v361_v25 }
  0xff PF: > { %s15_s18 = sadd.s32 1, %s497_s18  }
 0x100   : > { %p12_p4 = scmp.ge.s32.totalorder %s15_s18, 4  }
 0x102   :  { %14 = sbr.rel (!%p12_p4) target bundleno = 1 (0x1), region = 70 }

// kernel: realnvp_forward.141
= control target key start
LH: loop header
LB: loop body
LE: loop exit
PB: predicated region body
PF: predicated region fallthrough
CT: control target
= control target key end

     0   :  { %s118_s1 = inlined_call_operand.vmem [shape: f32[8,128], index: 1, kind: input, shape index: {}]   ;;  %s119_s3 = inlined_call_operand.vmem [shape: f32[1,128], index: 3, kind: input, shape index: {}, may-alias: {3,4}]   ;;  %s120_s6 = inlined_call_operand.vmem [shape: f32[8,128], index: 6, kind: output, shape index: {1}]   ;;  %s121_s2 = inlined_call_operand.vmem [shape: f32[8,128], index: 2, kind: input, shape index: {}]   ;;  %s122_s4 = inlined_call_operand.vmem [shape: f32[1,128], index: 4, kind: input, shape index: {}, may-alias: {3,4}]   ;;  %s123_s0 = inlined_call_operand.vmem [shape: f32[8,128], index: 0, kind: input, shape index: {}]   ;;  %s124_s5 = inlined_call_operand.vmem [shape: f32[8,128], index: 5, kind: output, shape index: {0}]  }
   0x1   :  { %v23_v0 = vld [vmem:[%s118_s1] sm:$0xff] }
   0x2   :  { %58 = vtanh.f32 %v23_v0  ;;  %v56_v1 = vld [vmem:[%s119_s3] ss:$0 sm:$0xff] }
   0x3   :  { %v32_v5 = vld [vmem:[%s121_s2] sm:$0xff] }
   0x4   :  { %v57_v6 = vld [vmem:[%s122_s4] ss:$0 sm:$0xff] }
   0x5   :  { %v40_v7 = vmul.f32 %v57_v6, %v32_v5  ;;  %v41_v8 = vld [vmem:[%s123_s0] sm:$0xff] }
   0x7   :  { %v42_v9 = vadd.f32 %v41_v8, %v40_v7 }
   0xc   :  { %v59_v2 = vpop.eup %58 }
   0xd   :  { %v31_v3 = vmul.f32 %v59_v2, %v56_v1 }
   0xf   :  { %v43_v4 = vmul.f32 1.442695, %v31_v3  ;;  %47 = vst [vmem:[%s120_s6] sm:$0xff] %v31_v3 }
  0x11   :  { %60 = vpow2.f32 %v43_v4 }
  0x1b   :  { %v61_v10 = vpop.eup %60 }
  0x1c   :  { %v45_v11 = vmul.f32 %v61_v10, %v42_v9 }
  0x1e   :  { %46 = vst [vmem:[%s124_s5] sm:$0xff] %v45_v11 }

</bundles_post_ra>
